<compile_context>
chip_gen: v7x
topology: tpu7x:2x2x1
jax: 0.10.0
libtpu: 0.0.40
codegen_flags: <defaults>
</compile_context>

<pallas_src>
import functools

import jax
import jax.numpy as jnp
from jax.experimental import pallas as pl
from jax.experimental.pallas import tpu as pltpu

KSIZE = 7
PAD = KSIZE // 2


def _spatial_attention_kernel(w_sref, x_ref, m_ref, o_ref, *, W):
    # w_sref : (2*7*7,) f32 SMEM scalars (OIHW conv weights, flattened; the
    #          "mean" channel (c=0) is pre-scaled by 1/C so the kernel only
    #          needs a channel SUM).
    # x_ref  : (nb, C, HW) input block, lane-dense flattened spatial axis.
    # m_ref  : (14, HW) f32 masks; rows 0..6  = column validity per dj,
    #                              rows 7..13 = row validity per di.
    # o_ref  : (nb, C, HW) output block.
    nb, C, HW = x_ref.shape

    # ---- pass 1: fused channel sum + max (single sweep over x, f32) ----
    x0 = x_ref[:, 0, :].astype(jnp.float32)
    ch_sum = x0
    ch_max = x0
    for c in range(1, C):
        xc = x_ref[:, c, :].astype(jnp.float32)
        ch_sum = ch_sum + xc
        ch_max = jnp.maximum(ch_max, xc)

    # Stack pooled maps on the sublane axis: rows [0, nb) = sum ("mean" with
    # 1/C folded into the weights), rows [nb, 2nb) = max.
    S = jnp.concatenate([ch_sum, ch_max], axis=0)                # (2nb, HW)
    row_sel = jax.lax.broadcasted_iota(jnp.int32, (2 * nb, HW), 0) < nb

    # Hoist the (1, HW) mask rows once.
    cmasks = [m_ref[d : d + 1, :] for d in range(KSIZE)]          # per dj
    rmasks = [m_ref[KSIZE + d : KSIZE + d + 1, :] for d in range(KSIZE)]  # per di

    # ---- 7x7 'same' conv as 49 lane-rotations (XLU) + masked MACs (VALU) ----
    accs = [jnp.zeros((2 * nb, HW), jnp.float32) for _ in range(4)]
    tap = 0
    for di in range(KSIZE):
        oi = di - PAD
        for dj in range(KSIZE):
            oj = dj - PAD
            # out[p] = S[p + oi*W + oj]  (wrap masked out below)
            shift = (-(oi * W + oj)) % HW
            rolled = S if shift == 0 else pltpu.roll(S, shift, axis=1)
            mcomb = rmasks[di] * cmasks[dj]                       # (1, HW)
            w_sum = w_sref[di * KSIZE + dj]                       # "mean" weight
            w_max = w_sref[KSIZE * KSIZE + di * KSIZE + dj]       # "max" weight
            coef = jnp.where(row_sel, mcomb * w_sum, mcomb * w_max)
            accs[tap % 4] = accs[tap % 4] + rolled * coef
            tap += 1
    conv2 = (accs[0] + accs[1]) + (accs[2] + accs[3])             # (2nb, HW)
    conv = conv2[:nb, :] + conv2[nb:, :]                          # (nb, HW)

    att = jax.nn.sigmoid(conv).astype(o_ref.dtype)                # (nb, HW)

    # ---- pass 2: per-channel broadcast multiply in the input dtype ----
    for c in range(C):
        o_ref[:, c, :] = x_ref[:, c, :] * att


def spatial_attention(x, weight):
    """x: (N, C, H, W); weight: (1, 2, 7, 7) f32 (PyTorch OIHW layout)."""
    N, C, H, W = x.shape
    HW = H * W

    # Fold 1/C into the mean-channel weights so the kernel uses a channel sum.
    w = jnp.asarray(weight, jnp.float32)
    w = w.at[:, 0].multiply(1.0 / C)
    w_flat = w.reshape(-1)                                        # (98,) SMEM prefetch

    # Row/column validity masks for the 7x7 'same' zero padding, built once on
    # the host: rows 0..6 column masks (per dj), rows 7..13 row masks (per di).
    ii = jnp.arange(H).reshape(H, 1)
    jj = jnp.arange(W).reshape(1, W)
    col_masks, row_masks = [], []
    for d in range(KSIZE):
        o = d - PAD
        col_masks.append(jnp.broadcast_to((jj + o >= 0) & (jj + o < W), (H, W)).reshape(HW))
        row_masks.append(jnp.broadcast_to((ii + o >= 0) & (ii + o < H), (H, W)).reshape(HW))
    masks = jnp.stack(col_masks + row_masks, axis=0).astype(jnp.float32)  # (14, HW)

    # Batch-block size: ~6 MiB of input per step, budgeted against in+out
    # double-buffering plus the f32 conv working set (S + 4 accumulators),
    # within the 32 MiB scoped-VMEM limit (safe on v7x's 64 MiB physical).
    itemsize = jnp.dtype(x.dtype).itemsize
    in_bytes = C * HW * itemsize
    work_bytes = 40 * HW                      # (2*HW f32 pooled) + (4 * 2*HW f32 accs)
    per_nb = 4 * in_bytes + work_bytes
    budget = 24 * 1024 * 1024
    nb = max(1, min(N, budget // per_nb))

    # Only v7x has 2 TensorCores sharing the grid: keep >= 4 steps there (>= 2
    # per core so each still double-buffers).  On v5e/v6e, bigger blocks win.
    kind = getattr(jax.devices()[0], "device_kind", "").lower()
    if "v7" in kind and N >= 2:
        nb = min(nb, N // 4 if N >= 4 else 1)

    # Prefer nb a multiple of 8 (sublane-full pooled-map vregs) when it divides N.
    if nb >= 8:
        cand = (nb // 8) * 8
        while cand >= 8 and N % cand:
            cand -= 8
        if cand >= 8:
            nb = cand
    while N % nb:
        nb -= 1

    kernel = functools.partial(_spatial_attention_kernel, W=W)
    x_flat = x.reshape(N, C, HW)                                  # free row-major reshape

    out_flat = pl.pallas_call(
        kernel,
        out_shape=jax.ShapeDtypeStruct((N, C, HW), x.dtype),
        grid_spec=pltpu.PrefetchScalarGridSpec(
            num_scalar_prefetch=1,
            grid=(N // nb,),
            in_specs=[
                pl.BlockSpec((nb, C, HW), lambda b, w_ref: (b, 0, 0)),
                pl.BlockSpec((2 * KSIZE, HW), lambda b, w_ref: (0, 0)),
            ],
            out_specs=pl.BlockSpec((nb, C, HW), lambda b, w_ref: (b, 0, 0)),
        ),
        compiler_params=pltpu.CompilerParams(
            dimension_semantics=("parallel",),
            vmem_limit_bytes=32 * 1024 * 1024,
        ),
    )(w_flat, x_flat, masks)

    return out_flat.reshape(N, C, H, W)


def spatial_attention_reference(x, weight):
    """Plain-JAX reference matching the PyTorch forward exactly."""
    mean_map = jnp.mean(x, axis=1, keepdims=True)
    max_map = jnp.max(x, axis=1, keepdims=True)
    s = jnp.concatenate([mean_map, max_map], axis=1)              # (N, 2, H, W)
    conv = jax.lax.conv_general_dilated(
        s, weight, window_strides=(1, 1), padding="SAME",
        dimension_numbers=("NCHW", "OIHW", "NCHW"))               # (N, 1, H, W)
    att = jax.nn.sigmoid(conv)
    return x * att


if __name__ == "__main__":
    key = jax.random.PRNGKey(0)
    kx, kw = jax.random.split(key)

    # Small NCHW input consistent with the module.
    N, C, H, W = 2, 4, 16, 16
    x = jax.random.normal(kx, (N, C, H, W), dtype=jnp.float32)

    # Deterministic xavier_uniform_ for Conv2d(2, 1, 7) weight, shape (1, 2, 7, 7).
    fan_in = 2 * KSIZE * KSIZE
    fan_out = 1 * KSIZE * KSIZE
    bound = (6.0 / (fan_in + fan_out)) ** 0.5
    weight = jax.random.uniform(
        kw, (1, 2, KSIZE, KSIZE), dtype=jnp.float32, minval=-bound, maxval=bound)

    out = jax.block_until_ready(spatial_attention(x, weight))
    ref = jax.block_until_ready(spatial_attention_reference(x, weight))

    assert out.shape == x.shape and out.dtype == x.dtype
    assert jnp.allclose(out, ref, atol=1e-5, rtol=1e-5), "mismatch vs reference"
    print("KERNEL_OK")
</pallas_src>

<mosaic_0001>
module attributes {stable_mosaic.version = 11 : i64} {
  func.func @_spatial_attention_kernel(%arg0: i32, %arg1: memref<98xf32, #tpu.memory_space<smem>>, %arg2: memref<2x4x256xf32, #tpu.memory_space<vmem>>, %arg3: memref<14x256xf32, #tpu.memory_space<vmem>>, %arg4: memref<2x4x256xf32, #tpu.memory_space<vmem>>) attributes {dimension_semantics = [#tpu.dimension_semantics<parallel>], iteration_bounds = array<i64: 1>, scalar_prefetch = 1 : i64, scratch_operands = 0 : i64, tpu.core_type = #tpu.core_type<tc>, window_params = [{transform_indices = @transform_0, window_bounds = array<i64: 2, 4, 256>}, {pipeline_mode = #tpu.pipeline_mode<synchronous>, transform_indices = @transform_1, window_bounds = array<i64: 14, 256>}, {transform_indices = @transform_2, window_bounds = array<i64: 2, 4, 256>}]} {
    %c0 = arith.constant 0 : index
    %c0_0 = arith.constant 0 : index
    %c0_1 = arith.constant 0 : index
    %0 = vector.load %arg2[%c0, %c0_0, %c0_1] : memref<2x4x256xf32, #tpu.memory_space<vmem>>, vector<2x1x256xf32>
    %1 = vector.shape_cast %0 : vector<2x1x256xf32> to vector<2x256xf32>
    %c0_2 = arith.constant 0 : index
    %c1 = arith.constant 1 : index
    %c0_3 = arith.constant 0 : index
    %2 = vector.load %arg2[%c0_2, %c1, %c0_3] : memref<2x4x256xf32, #tpu.memory_space<vmem>>, vector<2x1x256xf32>
    %3 = vector.shape_cast %2 : vector<2x1x256xf32> to vector<2x256xf32>
    %4 = arith.addf %1, %3 : vector<2x256xf32>
    %5 = arith.maximumf %1, %3 : vector<2x256xf32>
    %c0_4 = arith.constant 0 : index
    %c2 = arith.constant 2 : index
    %c0_5 = arith.constant 0 : index
    %6 = vector.load %arg2[%c0_4, %c2, %c0_5] : memref<2x4x256xf32, #tpu.memory_space<vmem>>, vector<2x1x256xf32>
    %7 = vector.shape_cast %6 : vector<2x1x256xf32> to vector<2x256xf32>
    %8 = arith.addf %4, %7 : vector<2x256xf32>
    %9 = arith.maximumf %5, %7 : vector<2x256xf32>
    %c0_6 = arith.constant 0 : index
    %c3 = arith.constant 3 : index
    %c0_7 = arith.constant 0 : index
    %10 = vector.load %arg2[%c0_6, %c3, %c0_7] : memref<2x4x256xf32, #tpu.memory_space<vmem>>, vector<2x1x256xf32>
    %11 = vector.shape_cast %10 : vector<2x1x256xf32> to vector<2x256xf32>
    %12 = arith.addf %8, %11 : vector<2x256xf32>
    %13 = arith.maximumf %9, %11 : vector<2x256xf32>
    %14 = tpu.concatenate %12, %13 in 0 : vector<2x256xf32>, vector<2x256xf32> -> vector<4x256xf32>
    %15 = tpu.iota {dimensions = array<i32: 0>} : vector<4x256xi32>
    %c2_i32 = arith.constant 2 : i32
    %16 = vector.broadcast %c2_i32 : i32 to vector<4x256xi32>
    %17 = arith.cmpi slt, %15, %16 : vector<4x256xi32>
    %c0_8 = arith.constant 0 : index
    %c0_9 = arith.constant 0 : index
    %18 = vector.load %arg3[%c0_8, %c0_9] : memref<14x256xf32, #tpu.memory_space<vmem>>, vector<1x256xf32>
    %c1_10 = arith.constant 1 : index
    %c0_11 = arith.constant 0 : index
    %19 = vector.load %arg3[%c1_10, %c0_11] : memref<14x256xf32, #tpu.memory_space<vmem>>, vector<1x256xf32>
    %c2_12 = arith.constant 2 : index
    %c0_13 = arith.constant 0 : index
    %20 = vector.load %arg3[%c2_12, %c0_13] : memref<14x256xf32, #tpu.memory_space<vmem>>, vector<1x256xf32>
    %c3_14 = arith.constant 3 : index
    %c0_15 = arith.constant 0 : index
    %21 = vector.load %arg3[%c3_14, %c0_15] : memref<14x256xf32, #tpu.memory_space<vmem>>, vector<1x256xf32>
    %c4 = arith.constant 4 : index
    %c0_16 = arith.constant 0 : index
    %22 = vector.load %arg3[%c4, %c0_16] : memref<14x256xf32, #tpu.memory_space<vmem>>, vector<1x256xf32>
    %c5 = arith.constant 5 : index
    %c0_17 = arith.constant 0 : index
    %23 = vector.load %arg3[%c5, %c0_17] : memref<14x256xf32, #tpu.memory_space<vmem>>, vector<1x256xf32>
    %c6 = arith.constant 6 : index
    %c0_18 = arith.constant 0 : index
    %24 = vector.load %arg3[%c6, %c0_18] : memref<14x256xf32, #tpu.memory_space<vmem>>, vector<1x256xf32>
    %c7 = arith.constant 7 : index
    %c0_19 = arith.constant 0 : index
    %25 = vector.load %arg3[%c7, %c0_19] : memref<14x256xf32, #tpu.memory_space<vmem>>, vector<1x256xf32>
    %c8 = arith.constant 8 : index
    %c0_20 = arith.constant 0 : index
    %26 = vector.load %arg3[%c8, %c0_20] : memref<14x256xf32, #tpu.memory_space<vmem>>, vector<1x256xf32>
    %c9 = arith.constant 9 : index
    %c0_21 = arith.constant 0 : index
    %27 = vector.load %arg3[%c9, %c0_21] : memref<14x256xf32, #tpu.memory_space<vmem>>, vector<1x256xf32>
    %c10 = arith.constant 10 : index
    %c0_22 = arith.constant 0 : index
    %28 = vector.load %arg3[%c10, %c0_22] : memref<14x256xf32, #tpu.memory_space<vmem>>, vector<1x256xf32>
    %c11 = arith.constant 11 : index
    %c0_23 = arith.constant 0 : index
    %29 = vector.load %arg3[%c11, %c0_23] : memref<14x256xf32, #tpu.memory_space<vmem>>, vector<1x256xf32>
    %c12 = arith.constant 12 : index
    %c0_24 = arith.constant 0 : index
    %30 = vector.load %arg3[%c12, %c0_24] : memref<14x256xf32, #tpu.memory_space<vmem>>, vector<1x256xf32>
    %c13 = arith.constant 13 : index
    %c0_25 = arith.constant 0 : index
    %31 = vector.load %arg3[%c13, %c0_25] : memref<14x256xf32, #tpu.memory_space<vmem>>, vector<1x256xf32>
    %cst = arith.constant 0.000000e+00 : f32
    %32 = vector.broadcast %cst : f32 to vector<4x256xf32>
    %cst_26 = arith.constant 0.000000e+00 : f32
    %33 = vector.broadcast %cst_26 : f32 to vector<4x256xf32>
    %cst_27 = arith.constant 0.000000e+00 : f32
    %34 = vector.broadcast %cst_27 : f32 to vector<4x256xf32>
    %cst_28 = arith.constant 0.000000e+00 : f32
    %35 = vector.broadcast %cst_28 : f32 to vector<4x256xf32>
    %c51_i32 = arith.constant 51 : i32
    %36 = tpu.dynamic_rotate %14 by %c51_i32 dim 1 : vector<4x256xf32>, i32 -> vector<4x256xf32>
    %37 = arith.mulf %25, %18 : vector<1x256xf32>
    %c0_29 = arith.constant 0 : index
    %38 = memref.load %arg1[%c0_29] : memref<98xf32, #tpu.memory_space<smem>>
    %c49 = arith.constant 49 : index
    %39 = memref.load %arg1[%c49] : memref<98xf32, #tpu.memory_space<smem>>
    %40 = vector.broadcast %38 : f32 to vector<1x256xf32>
    %41 = arith.mulf %37, %40 : vector<1x256xf32>
    %42 = vector.broadcast %39 : f32 to vector<1x256xf32>
    %43 = arith.mulf %37, %42 : vector<1x256xf32>
    %44 = vector.shape_cast %41 : vector<1x256xf32> to vector<1x256xf32>
    %45 = vector.broadcast %44 : vector<1x256xf32> to vector<4x256xf32>
    %46 = vector.shape_cast %43 : vector<1x256xf32> to vector<1x256xf32>
    %47 = vector.broadcast %46 : vector<1x256xf32> to vector<4x256xf32>
    %48 = arith.select %17, %45, %47 : vector<4x256xi1>, vector<4x256xf32>
    %49 = arith.mulf %36, %48 : vector<4x256xf32>
    %50 = arith.addf %32, %49 : vector<4x256xf32>
    %c50_i32 = arith.constant 50 : i32
    %51 = tpu.dynamic_rotate %14 by %c50_i32 dim 1 : vector<4x256xf32>, i32 -> vector<4x256xf32>
    %52 = arith.mulf %25, %19 : vector<1x256xf32>
    %c1_30 = arith.constant 1 : index
    %53 = memref.load %arg1[%c1_30] : memref<98xf32, #tpu.memory_space<smem>>
    %c50 = arith.constant 50 : index
    %54 = memref.load %arg1[%c50] : memref<98xf32, #tpu.memory_space<smem>>
    %55 = vector.broadcast %53 : f32 to vector<1x256xf32>
    %56 = arith.mulf %52, %55 : vector<1x256xf32>
    %57 = vector.broadcast %54 : f32 to vector<1x256xf32>
    %58 = arith.mulf %52, %57 : vector<1x256xf32>
    %59 = vector.shape_cast %56 : vector<1x256xf32> to vector<1x256xf32>
    %60 = vector.broadcast %59 : vector<1x256xf32> to vector<4x256xf32>
    %61 = vector.shape_cast %58 : vector<1x256xf32> to vector<1x256xf32>
    %62 = vector.broadcast %61 : vector<1x256xf32> to vector<4x256xf32>
    %63 = arith.select %17, %60, %62 : vector<4x256xi1>, vector<4x256xf32>
    %64 = arith.mulf %51, %63 : vector<4x256xf32>
    %65 = arith.addf %33, %64 : vector<4x256xf32>
    %c49_i32 = arith.constant 49 : i32
    %66 = tpu.dynamic_rotate %14 by %c49_i32 dim 1 : vector<4x256xf32>, i32 -> vector<4x256xf32>
    %67 = arith.mulf %25, %20 : vector<1x256xf32>
    %c2_31 = arith.constant 2 : index
    %68 = memref.load %arg1[%c2_31] : memref<98xf32, #tpu.memory_space<smem>>
    %c51 = arith.constant 51 : index
    %69 = memref.load %arg1[%c51] : memref<98xf32, #tpu.memory_space<smem>>
    %70 = vector.broadcast %68 : f32 to vector<1x256xf32>
    %71 = arith.mulf %67, %70 : vector<1x256xf32>
    %72 = vector.broadcast %69 : f32 to vector<1x256xf32>
    %73 = arith.mulf %67, %72 : vector<1x256xf32>
    %74 = vector.shape_cast %71 : vector<1x256xf32> to vector<1x256xf32>
    %75 = vector.broadcast %74 : vector<1x256xf32> to vector<4x256xf32>
    %76 = vector.shape_cast %73 : vector<1x256xf32> to vector<1x256xf32>
    %77 = vector.broadcast %76 : vector<1x256xf32> to vector<4x256xf32>
    %78 = arith.select %17, %75, %77 : vector<4x256xi1>, vector<4x256xf32>
    %79 = arith.mulf %66, %78 : vector<4x256xf32>
    %80 = arith.addf %34, %79 : vector<4x256xf32>
    %c48_i32 = arith.constant 48 : i32
    %81 = tpu.dynamic_rotate %14 by %c48_i32 dim 1 : vector<4x256xf32>, i32 -> vector<4x256xf32>
    %82 = arith.mulf %25, %21 : vector<1x256xf32>
    %c3_32 = arith.constant 3 : index
    %83 = memref.load %arg1[%c3_32] : memref<98xf32, #tpu.memory_space<smem>>
    %c52 = arith.constant 52 : index
    %84 = memref.load %arg1[%c52] : memref<98xf32, #tpu.memory_space<smem>>
    %85 = vector.broadcast %83 : f32 to vector<1x256xf32>
    %86 = arith.mulf %82, %85 : vector<1x256xf32>
    %87 = vector.broadcast %84 : f32 to vector<1x256xf32>
    %88 = arith.mulf %82, %87 : vector<1x256xf32>
    %89 = vector.shape_cast %86 : vector<1x256xf32> to vector<1x256xf32>
    %90 = vector.broadcast %89 : vector<1x256xf32> to vector<4x256xf32>
    %91 = vector.shape_cast %88 : vector<1x256xf32> to vector<1x256xf32>
    %92 = vector.broadcast %91 : vector<1x256xf32> to vector<4x256xf32>
    %93 = arith.select %17, %90, %92 : vector<4x256xi1>, vector<4x256xf32>
    %94 = arith.mulf %81, %93 : vector<4x256xf32>
    %95 = arith.addf %35, %94 : vector<4x256xf32>
    %c47_i32 = arith.constant 47 : i32
    %96 = tpu.dynamic_rotate %14 by %c47_i32 dim 1 : vector<4x256xf32>, i32 -> vector<4x256xf32>
    %97 = arith.mulf %25, %22 : vector<1x256xf32>
    %c4_33 = arith.constant 4 : index
    %98 = memref.load %arg1[%c4_33] : memref<98xf32, #tpu.memory_space<smem>>
    %c53 = arith.constant 53 : index
    %99 = memref.load %arg1[%c53] : memref<98xf32, #tpu.memory_space<smem>>
    %100 = vector.broadcast %98 : f32 to vector<1x256xf32>
    %101 = arith.mulf %97, %100 : vector<1x256xf32>
    %102 = vector.broadcast %99 : f32 to vector<1x256xf32>
    %103 = arith.mulf %97, %102 : vector<1x256xf32>
    %104 = vector.shape_cast %101 : vector<1x256xf32> to vector<1x256xf32>
    %105 = vector.broadcast %104 : vector<1x256xf32> to vector<4x256xf32>
    %106 = vector.shape_cast %103 : vector<1x256xf32> to vector<1x256xf32>
    %107 = vector.broadcast %106 : vector<1x256xf32> to vector<4x256xf32>
    %108 = arith.select %17, %105, %107 : vector<4x256xi1>, vector<4x256xf32>
    %109 = arith.mulf %96, %108 : vector<4x256xf32>
    %110 = arith.addf %50, %109 : vector<4x256xf32>
    %c46_i32 = arith.constant 46 : i32
    %111 = tpu.dynamic_rotate %14 by %c46_i32 dim 1 : vector<4x256xf32>, i32 -> vector<4x256xf32>
    %112 = arith.mulf %25, %23 : vector<1x256xf32>
    %c5_34 = arith.constant 5 : index
    %113 = memref.load %arg1[%c5_34] : memref<98xf32, #tpu.memory_space<smem>>
    %c54 = arith.constant 54 : index
    %114 = memref.load %arg1[%c54] : memref<98xf32, #tpu.memory_space<smem>>
    %115 = vector.broadcast %113 : f32 to vector<1x256xf32>
    %116 = arith.mulf %112, %115 : vector<1x256xf32>
    %117 = vector.broadcast %114 : f32 to vector<1x256xf32>
    %118 = arith.mulf %112, %117 : vector<1x256xf32>
    %119 = vector.shape_cast %116 : vector<1x256xf32> to vector<1x256xf32>
    %120 = vector.broadcast %119 : vector<1x256xf32> to vector<4x256xf32>
    %121 = vector.shape_cast %118 : vector<1x256xf32> to vector<1x256xf32>
    %122 = vector.broadcast %121 : vector<1x256xf32> to vector<4x256xf32>
    %123 = arith.select %17, %120, %122 : vector<4x256xi1>, vector<4x256xf32>
    %124 = arith.mulf %111, %123 : vector<4x256xf32>
    %125 = arith.addf %65, %124 : vector<4x256xf32>
    %c45_i32 = arith.constant 45 : i32
    %126 = tpu.dynamic_rotate %14 by %c45_i32 dim 1 : vector<4x256xf32>, i32 -> vector<4x256xf32>
    %127 = arith.mulf %25, %24 : vector<1x256xf32>
    %c6_35 = arith.constant 6 : index
    %128 = memref.load %arg1[%c6_35] : memref<98xf32, #tpu.memory_space<smem>>
    %c55 = arith.constant 55 : index
    %129 = memref.load %arg1[%c55] : memref<98xf32, #tpu.memory_space<smem>>
    %130 = vector.broadcast %128 : f32 to vector<1x256xf32>
    %131 = arith.mulf %127, %130 : vector<1x256xf32>
    %132 = vector.broadcast %129 : f32 to vector<1x256xf32>
    %133 = arith.mulf %127, %132 : vector<1x256xf32>
    %134 = vector.shape_cast %131 : vector<1x256xf32> to vector<1x256xf32>
    %135 = vector.broadcast %134 : vector<1x256xf32> to vector<4x256xf32>
    %136 = vector.shape_cast %133 : vector<1x256xf32> to vector<1x256xf32>
    %137 = vector.broadcast %136 : vector<1x256xf32> to vector<4x256xf32>
    %138 = arith.select %17, %135, %137 : vector<4x256xi1>, vector<4x256xf32>
    %139 = arith.mulf %126, %138 : vector<4x256xf32>
    %140 = arith.addf %80, %139 : vector<4x256xf32>
    %c35_i32 = arith.constant 35 : i32
    %141 = tpu.dynamic_rotate %14 by %c35_i32 dim 1 : vector<4x256xf32>, i32 -> vector<4x256xf32>
    %142 = arith.mulf %26, %18 : vector<1x256xf32>
    %c7_36 = arith.constant 7 : index
    %143 = memref.load %arg1[%c7_36] : memref<98xf32, #tpu.memory_space<smem>>
    %c56 = arith.constant 56 : index
    %144 = memref.load %arg1[%c56] : memref<98xf32, #tpu.memory_space<smem>>
    %145 = vector.broadcast %143 : f32 to vector<1x256xf32>
    %146 = arith.mulf %142, %145 : vector<1x256xf32>
    %147 = vector.broadcast %144 : f32 to vector<1x256xf32>
    %148 = arith.mulf %142, %147 : vector<1x256xf32>
    %149 = vector.shape_cast %146 : vector<1x256xf32> to vector<1x256xf32>
    %150 = vector.broadcast %149 : vector<1x256xf32> to vector<4x256xf32>
    %151 = vector.shape_cast %148 : vector<1x256xf32> to vector<1x256xf32>
    %152 = vector.broadcast %151 : vector<1x256xf32> to vector<4x256xf32>
    %153 = arith.select %17, %150, %152 : vector<4x256xi1>, vector<4x256xf32>
    %154 = arith.mulf %141, %153 : vector<4x256xf32>
    %155 = arith.addf %95, %154 : vector<4x256xf32>
    %c34_i32 = arith.constant 34 : i32
    %156 = tpu.dynamic_rotate %14 by %c34_i32 dim 1 : vector<4x256xf32>, i32 -> vector<4x256xf32>
    %157 = arith.mulf %26, %19 : vector<1x256xf32>
    %c8_37 = arith.constant 8 : index
    %158 = memref.load %arg1[%c8_37] : memref<98xf32, #tpu.memory_space<smem>>
    %c57 = arith.constant 57 : index
    %159 = memref.load %arg1[%c57] : memref<98xf32, #tpu.memory_space<smem>>
    %160 = vector.broadcast %158 : f32 to vector<1x256xf32>
    %161 = arith.mulf %157, %160 : vector<1x256xf32>
    %162 = vector.broadcast %159 : f32 to vector<1x256xf32>
    %163 = arith.mulf %157, %162 : vector<1x256xf32>
    %164 = vector.shape_cast %161 : vector<1x256xf32> to vector<1x256xf32>
    %165 = vector.broadcast %164 : vector<1x256xf32> to vector<4x256xf32>
    %166 = vector.shape_cast %163 : vector<1x256xf32> to vector<1x256xf32>
    %167 = vector.broadcast %166 : vector<1x256xf32> to vector<4x256xf32>
    %168 = arith.select %17, %165, %167 : vector<4x256xi1>, vector<4x256xf32>
    %169 = arith.mulf %156, %168 : vector<4x256xf32>
    %170 = arith.addf %110, %169 : vector<4x256xf32>
    %c33_i32 = arith.constant 33 : i32
    %171 = tpu.dynamic_rotate %14 by %c33_i32 dim 1 : vector<4x256xf32>, i32 -> vector<4x256xf32>
    %172 = arith.mulf %26, %20 : vector<1x256xf32>
    %c9_38 = arith.constant 9 : index
    %173 = memref.load %arg1[%c9_38] : memref<98xf32, #tpu.memory_space<smem>>
    %c58 = arith.constant 58 : index
    %174 = memref.load %arg1[%c58] : memref<98xf32, #tpu.memory_space<smem>>
    %175 = vector.broadcast %173 : f32 to vector<1x256xf32>
    %176 = arith.mulf %172, %175 : vector<1x256xf32>
    %177 = vector.broadcast %174 : f32 to vector<1x256xf32>
    %178 = arith.mulf %172, %177 : vector<1x256xf32>
    %179 = vector.shape_cast %176 : vector<1x256xf32> to vector<1x256xf32>
    %180 = vector.broadcast %179 : vector<1x256xf32> to vector<4x256xf32>
    %181 = vector.shape_cast %178 : vector<1x256xf32> to vector<1x256xf32>
    %182 = vector.broadcast %181 : vector<1x256xf32> to vector<4x256xf32>
    %183 = arith.select %17, %180, %182 : vector<4x256xi1>, vector<4x256xf32>
    %184 = arith.mulf %171, %183 : vector<4x256xf32>
    %185 = arith.addf %125, %184 : vector<4x256xf32>
    %c32_i32 = arith.constant 32 : i32
    %186 = tpu.dynamic_rotate %14 by %c32_i32 dim 1 : vector<4x256xf32>, i32 -> vector<4x256xf32>
    %187 = arith.mulf %26, %21 : vector<1x256xf32>
    %c10_39 = arith.constant 10 : index
    %188 = memref.load %arg1[%c10_39] : memref<98xf32, #tpu.memory_space<smem>>
    %c59 = arith.constant 59 : index
    %189 = memref.load %arg1[%c59] : memref<98xf32, #tpu.memory_space<smem>>
    %190 = vector.broadcast %188 : f32 to vector<1x256xf32>
    %191 = arith.mulf %187, %190 : vector<1x256xf32>
    %192 = vector.broadcast %189 : f32 to vector<1x256xf32>
    %193 = arith.mulf %187, %192 : vector<1x256xf32>
    %194 = vector.shape_cast %191 : vector<1x256xf32> to vector<1x256xf32>
    %195 = vector.broadcast %194 : vector<1x256xf32> to vector<4x256xf32>
    %196 = vector.shape_cast %193 : vector<1x256xf32> to vector<1x256xf32>
    %197 = vector.broadcast %196 : vector<1x256xf32> to vector<4x256xf32>
    %198 = arith.select %17, %195, %197 : vector<4x256xi1>, vector<4x256xf32>
    %199 = arith.mulf %186, %198 : vector<4x256xf32>
    %200 = arith.addf %140, %199 : vector<4x256xf32>
    %c31_i32 = arith.constant 31 : i32
    %201 = tpu.dynamic_rotate %14 by %c31_i32 dim 1 : vector<4x256xf32>, i32 -> vector<4x256xf32>
    %202 = arith.mulf %26, %22 : vector<1x256xf32>
    %c11_40 = arith.constant 11 : index
    %203 = memref.load %arg1[%c11_40] : memref<98xf32, #tpu.memory_space<smem>>
    %c60 = arith.constant 60 : index
    %204 = memref.load %arg1[%c60] : memref<98xf32, #tpu.memory_space<smem>>
    %205 = vector.broadcast %203 : f32 to vector<1x256xf32>
    %206 = arith.mulf %202, %205 : vector<1x256xf32>
    %207 = vector.broadcast %204 : f32 to vector<1x256xf32>
    %208 = arith.mulf %202, %207 : vector<1x256xf32>
    %209 = vector.shape_cast %206 : vector<1x256xf32> to vector<1x256xf32>
    %210 = vector.broadcast %209 : vector<1x256xf32> to vector<4x256xf32>
    %211 = vector.shape_cast %208 : vector<1x256xf32> to vector<1x256xf32>
    %212 = vector.broadcast %211 : vector<1x256xf32> to vector<4x256xf32>
    %213 = arith.select %17, %210, %212 : vector<4x256xi1>, vector<4x256xf32>
    %214 = arith.mulf %201, %213 : vector<4x256xf32>
    %215 = arith.addf %155, %214 : vector<4x256xf32>
    %c30_i32 = arith.constant 30 : i32
    %216 = tpu.dynamic_rotate %14 by %c30_i32 dim 1 : vector<4x256xf32>, i32 -> vector<4x256xf32>
    %217 = arith.mulf %26, %23 : vector<1x256xf32>
    %c12_41 = arith.constant 12 : index
    %218 = memref.load %arg1[%c12_41] : memref<98xf32, #tpu.memory_space<smem>>
    %c61 = arith.constant 61 : index
    %219 = memref.load %arg1[%c61] : memref<98xf32, #tpu.memory_space<smem>>
    %220 = vector.broadcast %218 : f32 to vector<1x256xf32>
    %221 = arith.mulf %217, %220 : vector<1x256xf32>
    %222 = vector.broadcast %219 : f32 to vector<1x256xf32>
    %223 = arith.mulf %217, %222 : vector<1x256xf32>
    %224 = vector.shape_cast %221 : vector<1x256xf32> to vector<1x256xf32>
    %225 = vector.broadcast %224 : vector<1x256xf32> to vector<4x256xf32>
    %226 = vector.shape_cast %223 : vector<1x256xf32> to vector<1x256xf32>
    %227 = vector.broadcast %226 : vector<1x256xf32> to vector<4x256xf32>
    %228 = arith.select %17, %225, %227 : vector<4x256xi1>, vector<4x256xf32>
    %229 = arith.mulf %216, %228 : vector<4x256xf32>
    %230 = arith.addf %170, %229 : vector<4x256xf32>
    %c29_i32 = arith.constant 29 : i32
    %231 = tpu.dynamic_rotate %14 by %c29_i32 dim 1 : vector<4x256xf32>, i32 -> vector<4x256xf32>
    %232 = arith.mulf %26, %24 : vector<1x256xf32>
    %c13_42 = arith.constant 13 : index
    %233 = memref.load %arg1[%c13_42] : memref<98xf32, #tpu.memory_space<smem>>
    %c62 = arith.constant 62 : index
    %234 = memref.load %arg1[%c62] : memref<98xf32, #tpu.memory_space<smem>>
    %235 = vector.broadcast %233 : f32 to vector<1x256xf32>
    %236 = arith.mulf %232, %235 : vector<1x256xf32>
    %237 = vector.broadcast %234 : f32 to vector<1x256xf32>
    %238 = arith.mulf %232, %237 : vector<1x256xf32>
    %239 = vector.shape_cast %236 : vector<1x256xf32> to vector<1x256xf32>
    %240 = vector.broadcast %239 : vector<1x256xf32> to vector<4x256xf32>
    %241 = vector.shape_cast %238 : vector<1x256xf32> to vector<1x256xf32>
    %242 = vector.broadcast %241 : vector<1x256xf32> to vector<4x256xf32>
    %243 = arith.select %17, %240, %242 : vector<4x256xi1>, vector<4x256xf32>
    %244 = arith.mulf %231, %243 : vector<4x256xf32>
    %245 = arith.addf %185, %244 : vector<4x256xf32>
    %c19_i32 = arith.constant 19 : i32
    %246 = tpu.dynamic_rotate %14 by %c19_i32 dim 1 : vector<4x256xf32>, i32 -> vector<4x256xf32>
    %247 = arith.mulf %27, %18 : vector<1x256xf32>
    %c14 = arith.constant 14 : index
    %248 = memref.load %arg1[%c14] : memref<98xf32, #tpu.memory_space<smem>>
    %c63 = arith.constant 63 : index
    %249 = memref.load %arg1[%c63] : memref<98xf32, #tpu.memory_space<smem>>
    %250 = vector.broadcast %248 : f32 to vector<1x256xf32>
    %251 = arith.mulf %247, %250 : vector<1x256xf32>
    %252 = vector.broadcast %249 : f32 to vector<1x256xf32>
    %253 = arith.mulf %247, %252 : vector<1x256xf32>
    %254 = vector.shape_cast %251 : vector<1x256xf32> to vector<1x256xf32>
    %255 = vector.broadcast %254 : vector<1x256xf32> to vector<4x256xf32>
    %256 = vector.shape_cast %253 : vector<1x256xf32> to vector<1x256xf32>
    %257 = vector.broadcast %256 : vector<1x256xf32> to vector<4x256xf32>
    %258 = arith.select %17, %255, %257 : vector<4x256xi1>, vector<4x256xf32>
    %259 = arith.mulf %246, %258 : vector<4x256xf32>
    %260 = arith.addf %200, %259 : vector<4x256xf32>
    %c18_i32 = arith.constant 18 : i32
    %261 = tpu.dynamic_rotate %14 by %c18_i32 dim 1 : vector<4x256xf32>, i32 -> vector<4x256xf32>
    %262 = arith.mulf %27, %19 : vector<1x256xf32>
    %c15 = arith.constant 15 : index
    %263 = memref.load %arg1[%c15] : memref<98xf32, #tpu.memory_space<smem>>
    %c64 = arith.constant 64 : index
    %264 = memref.load %arg1[%c64] : memref<98xf32, #tpu.memory_space<smem>>
    %265 = vector.broadcast %263 : f32 to vector<1x256xf32>
    %266 = arith.mulf %262, %265 : vector<1x256xf32>
    %267 = vector.broadcast %264 : f32 to vector<1x256xf32>
    %268 = arith.mulf %262, %267 : vector<1x256xf32>
    %269 = vector.shape_cast %266 : vector<1x256xf32> to vector<1x256xf32>
    %270 = vector.broadcast %269 : vector<1x256xf32> to vector<4x256xf32>
    %271 = vector.shape_cast %268 : vector<1x256xf32> to vector<1x256xf32>
    %272 = vector.broadcast %271 : vector<1x256xf32> to vector<4x256xf32>
    %273 = arith.select %17, %270, %272 : vector<4x256xi1>, vector<4x256xf32>
    %274 = arith.mulf %261, %273 : vector<4x256xf32>
    %275 = arith.addf %215, %274 : vector<4x256xf32>
    %c17_i32 = arith.constant 17 : i32
    %276 = tpu.dynamic_rotate %14 by %c17_i32 dim 1 : vector<4x256xf32>, i32 -> vector<4x256xf32>
    %277 = arith.mulf %27, %20 : vector<1x256xf32>
    %c16 = arith.constant 16 : index
    %278 = memref.load %arg1[%c16] : memref<98xf32, #tpu.memory_space<smem>>
    %c65 = arith.constant 65 : index
    %279 = memref.load %arg1[%c65] : memref<98xf32, #tpu.memory_space<smem>>
    %280 = vector.broadcast %278 : f32 to vector<1x256xf32>
    %281 = arith.mulf %277, %280 : vector<1x256xf32>
    %282 = vector.broadcast %279 : f32 to vector<1x256xf32>
    %283 = arith.mulf %277, %282 : vector<1x256xf32>
    %284 = vector.shape_cast %281 : vector<1x256xf32> to vector<1x256xf32>
    %285 = vector.broadcast %284 : vector<1x256xf32> to vector<4x256xf32>
    %286 = vector.shape_cast %283 : vector<1x256xf32> to vector<1x256xf32>
    %287 = vector.broadcast %286 : vector<1x256xf32> to vector<4x256xf32>
    %288 = arith.select %17, %285, %287 : vector<4x256xi1>, vector<4x256xf32>
    %289 = arith.mulf %276, %288 : vector<4x256xf32>
    %290 = arith.addf %230, %289 : vector<4x256xf32>
    %c16_i32 = arith.constant 16 : i32
    %291 = tpu.dynamic_rotate %14 by %c16_i32 dim 1 : vector<4x256xf32>, i32 -> vector<4x256xf32>
    %292 = arith.mulf %27, %21 : vector<1x256xf32>
    %c17 = arith.constant 17 : index
    %293 = memref.load %arg1[%c17] : memref<98xf32, #tpu.memory_space<smem>>
    %c66 = arith.constant 66 : index
    %294 = memref.load %arg1[%c66] : memref<98xf32, #tpu.memory_space<smem>>
    %295 = vector.broadcast %293 : f32 to vector<1x256xf32>
    %296 = arith.mulf %292, %295 : vector<1x256xf32>
    %297 = vector.broadcast %294 : f32 to vector<1x256xf32>
    %298 = arith.mulf %292, %297 : vector<1x256xf32>
    %299 = vector.shape_cast %296 : vector<1x256xf32> to vector<1x256xf32>
    %300 = vector.broadcast %299 : vector<1x256xf32> to vector<4x256xf32>
    %301 = vector.shape_cast %298 : vector<1x256xf32> to vector<1x256xf32>
    %302 = vector.broadcast %301 : vector<1x256xf32> to vector<4x256xf32>
    %303 = arith.select %17, %300, %302 : vector<4x256xi1>, vector<4x256xf32>
    %304 = arith.mulf %291, %303 : vector<4x256xf32>
    %305 = arith.addf %245, %304 : vector<4x256xf32>
    %c15_i32 = arith.constant 15 : i32
    %306 = tpu.dynamic_rotate %14 by %c15_i32 dim 1 : vector<4x256xf32>, i32 -> vector<4x256xf32>
    %307 = arith.mulf %27, %22 : vector<1x256xf32>
    %c18 = arith.constant 18 : index
    %308 = memref.load %arg1[%c18] : memref<98xf32, #tpu.memory_space<smem>>
    %c67 = arith.constant 67 : index
    %309 = memref.load %arg1[%c67] : memref<98xf32, #tpu.memory_space<smem>>
    %310 = vector.broadcast %308 : f32 to vector<1x256xf32>
    %311 = arith.mulf %307, %310 : vector<1x256xf32>
    %312 = vector.broadcast %309 : f32 to vector<1x256xf32>
    %313 = arith.mulf %307, %312 : vector<1x256xf32>
    %314 = vector.shape_cast %311 : vector<1x256xf32> to vector<1x256xf32>
    %315 = vector.broadcast %314 : vector<1x256xf32> to vector<4x256xf32>
    %316 = vector.shape_cast %313 : vector<1x256xf32> to vector<1x256xf32>
    %317 = vector.broadcast %316 : vector<1x256xf32> to vector<4x256xf32>
    %318 = arith.select %17, %315, %317 : vector<4x256xi1>, vector<4x256xf32>
    %319 = arith.mulf %306, %318 : vector<4x256xf32>
    %320 = arith.addf %260, %319 : vector<4x256xf32>
    %c14_i32 = arith.constant 14 : i32
    %321 = tpu.dynamic_rotate %14 by %c14_i32 dim 1 : vector<4x256xf32>, i32 -> vector<4x256xf32>
    %322 = arith.mulf %27, %23 : vector<1x256xf32>
    %c19 = arith.constant 19 : index
    %323 = memref.load %arg1[%c19] : memref<98xf32, #tpu.memory_space<smem>>
    %c68 = arith.constant 68 : index
    %324 = memref.load %arg1[%c68] : memref<98xf32, #tpu.memory_space<smem>>
    %325 = vector.broadcast %323 : f32 to vector<1x256xf32>
    %326 = arith.mulf %322, %325 : vector<1x256xf32>
    %327 = vector.broadcast %324 : f32 to vector<1x256xf32>
    %328 = arith.mulf %322, %327 : vector<1x256xf32>
    %329 = vector.shape_cast %326 : vector<1x256xf32> to vector<1x256xf32>
    %330 = vector.broadcast %329 : vector<1x256xf32> to vector<4x256xf32>
    %331 = vector.shape_cast %328 : vector<1x256xf32> to vector<1x256xf32>
    %332 = vector.broadcast %331 : vector<1x256xf32> to vector<4x256xf32>
    %333 = arith.select %17, %330, %332 : vector<4x256xi1>, vector<4x256xf32>
    %334 = arith.mulf %321, %333 : vector<4x256xf32>
    %335 = arith.addf %275, %334 : vector<4x256xf32>
    %c13_i32 = arith.constant 13 : i32
    %336 = tpu.dynamic_rotate %14 by %c13_i32 dim 1 : vector<4x256xf32>, i32 -> vector<4x256xf32>
    %337 = arith.mulf %27, %24 : vector<1x256xf32>
    %c20 = arith.constant 20 : index
    %338 = memref.load %arg1[%c20] : memref<98xf32, #tpu.memory_space<smem>>
    %c69 = arith.constant 69 : index
    %339 = memref.load %arg1[%c69] : memref<98xf32, #tpu.memory_space<smem>>
    %340 = vector.broadcast %338 : f32 to vector<1x256xf32>
    %341 = arith.mulf %337, %340 : vector<1x256xf32>
    %342 = vector.broadcast %339 : f32 to vector<1x256xf32>
    %343 = arith.mulf %337, %342 : vector<1x256xf32>
    %344 = vector.shape_cast %341 : vector<1x256xf32> to vector<1x256xf32>
    %345 = vector.broadcast %344 : vector<1x256xf32> to vector<4x256xf32>
    %346 = vector.shape_cast %343 : vector<1x256xf32> to vector<1x256xf32>
    %347 = vector.broadcast %346 : vector<1x256xf32> to vector<4x256xf32>
    %348 = arith.select %17, %345, %347 : vector<4x256xi1>, vector<4x256xf32>
    %349 = arith.mulf %336, %348 : vector<4x256xf32>
    %350 = arith.addf %290, %349 : vector<4x256xf32>
    %c3_i32 = arith.constant 3 : i32
    %351 = tpu.dynamic_rotate %14 by %c3_i32 dim 1 : vector<4x256xf32>, i32 -> vector<4x256xf32>
    %352 = arith.mulf %28, %18 : vector<1x256xf32>
    %c21 = arith.constant 21 : index
    %353 = memref.load %arg1[%c21] : memref<98xf32, #tpu.memory_space<smem>>
    %c70 = arith.constant 70 : index
    %354 = memref.load %arg1[%c70] : memref<98xf32, #tpu.memory_space<smem>>
    %355 = vector.broadcast %353 : f32 to vector<1x256xf32>
    %356 = arith.mulf %352, %355 : vector<1x256xf32>
    %357 = vector.broadcast %354 : f32 to vector<1x256xf32>
    %358 = arith.mulf %352, %357 : vector<1x256xf32>
    %359 = vector.shape_cast %356 : vector<1x256xf32> to vector<1x256xf32>
    %360 = vector.broadcast %359 : vector<1x256xf32> to vector<4x256xf32>
    %361 = vector.shape_cast %358 : vector<1x256xf32> to vector<1x256xf32>
    %362 = vector.broadcast %361 : vector<1x256xf32> to vector<4x256xf32>
    %363 = arith.select %17, %360, %362 : vector<4x256xi1>, vector<4x256xf32>
    %364 = arith.mulf %351, %363 : vector<4x256xf32>
    %365 = arith.addf %305, %364 : vector<4x256xf32>
    %c2_i32_43 = arith.constant 2 : i32
    %366 = tpu.dynamic_rotate %14 by %c2_i32_43 dim 1 : vector<4x256xf32>, i32 -> vector<4x256xf32>
    %367 = arith.mulf %28, %19 : vector<1x256xf32>
    %c22 = arith.constant 22 : index
    %368 = memref.load %arg1[%c22] : memref<98xf32, #tpu.memory_space<smem>>
    %c71 = arith.constant 71 : index
    %369 = memref.load %arg1[%c71] : memref<98xf32, #tpu.memory_space<smem>>
    %370 = vector.broadcast %368 : f32 to vector<1x256xf32>
    %371 = arith.mulf %367, %370 : vector<1x256xf32>
    %372 = vector.broadcast %369 : f32 to vector<1x256xf32>
    %373 = arith.mulf %367, %372 : vector<1x256xf32>
    %374 = vector.shape_cast %371 : vector<1x256xf32> to vector<1x256xf32>
    %375 = vector.broadcast %374 : vector<1x256xf32> to vector<4x256xf32>
    %376 = vector.shape_cast %373 : vector<1x256xf32> to vector<1x256xf32>
    %377 = vector.broadcast %376 : vector<1x256xf32> to vector<4x256xf32>
    %378 = arith.select %17, %375, %377 : vector<4x256xi1>, vector<4x256xf32>
    %379 = arith.mulf %366, %378 : vector<4x256xf32>
    %380 = arith.addf %320, %379 : vector<4x256xf32>
    %c1_i32 = arith.constant 1 : i32
    %381 = tpu.dynamic_rotate %14 by %c1_i32 dim 1 : vector<4x256xf32>, i32 -> vector<4x256xf32>
    %382 = arith.mulf %28, %20 : vector<1x256xf32>
    %c23 = arith.constant 23 : index
    %383 = memref.load %arg1[%c23] : memref<98xf32, #tpu.memory_space<smem>>
    %c72 = arith.constant 72 : index
    %384 = memref.load %arg1[%c72] : memref<98xf32, #tpu.memory_space<smem>>
    %385 = vector.broadcast %383 : f32 to vector<1x256xf32>
    %386 = arith.mulf %382, %385 : vector<1x256xf32>
    %387 = vector.broadcast %384 : f32 to vector<1x256xf32>
    %388 = arith.mulf %382, %387 : vector<1x256xf32>
    %389 = vector.shape_cast %386 : vector<1x256xf32> to vector<1x256xf32>
    %390 = vector.broadcast %389 : vector<1x256xf32> to vector<4x256xf32>
    %391 = vector.shape_cast %388 : vector<1x256xf32> to vector<1x256xf32>
    %392 = vector.broadcast %391 : vector<1x256xf32> to vector<4x256xf32>
    %393 = arith.select %17, %390, %392 : vector<4x256xi1>, vector<4x256xf32>
    %394 = arith.mulf %381, %393 : vector<4x256xf32>
    %395 = arith.addf %335, %394 : vector<4x256xf32>
    %396 = arith.mulf %28, %21 : vector<1x256xf32>
    %c24 = arith.constant 24 : index
    %397 = memref.load %arg1[%c24] : memref<98xf32, #tpu.memory_space<smem>>
    %c73 = arith.constant 73 : index
    %398 = memref.load %arg1[%c73] : memref<98xf32, #tpu.memory_space<smem>>
    %399 = vector.broadcast %397 : f32 to vector<1x256xf32>
    %400 = arith.mulf %396, %399 : vector<1x256xf32>
    %401 = vector.broadcast %398 : f32 to vector<1x256xf32>
    %402 = arith.mulf %396, %401 : vector<1x256xf32>
    %403 = vector.shape_cast %400 : vector<1x256xf32> to vector<1x256xf32>
    %404 = vector.broadcast %403 : vector<1x256xf32> to vector<4x256xf32>
    %405 = vector.shape_cast %402 : vector<1x256xf32> to vector<1x256xf32>
    %406 = vector.broadcast %405 : vector<1x256xf32> to vector<4x256xf32>
    %407 = arith.select %17, %404, %406 : vector<4x256xi1>, vector<4x256xf32>
    %408 = arith.mulf %14, %407 : vector<4x256xf32>
    %409 = arith.addf %350, %408 : vector<4x256xf32>
    %c255_i32 = arith.constant 255 : i32
    %410 = tpu.dynamic_rotate %14 by %c255_i32 dim 1 : vector<4x256xf32>, i32 -> vector<4x256xf32>
    %411 = arith.mulf %28, %22 : vector<1x256xf32>
    %c25 = arith.constant 25 : index
    %412 = memref.load %arg1[%c25] : memref<98xf32, #tpu.memory_space<smem>>
    %c74 = arith.constant 74 : index
    %413 = memref.load %arg1[%c74] : memref<98xf32, #tpu.memory_space<smem>>
    %414 = vector.broadcast %412 : f32 to vector<1x256xf32>
    %415 = arith.mulf %411, %414 : vector<1x256xf32>
    %416 = vector.broadcast %413 : f32 to vector<1x256xf32>
    %417 = arith.mulf %411, %416 : vector<1x256xf32>
    %418 = vector.shape_cast %415 : vector<1x256xf32> to vector<1x256xf32>
    %419 = vector.broadcast %418 : vector<1x256xf32> to vector<4x256xf32>
    %420 = vector.shape_cast %417 : vector<1x256xf32> to vector<1x256xf32>
    %421 = vector.broadcast %420 : vector<1x256xf32> to vector<4x256xf32>
    %422 = arith.select %17, %419, %421 : vector<4x256xi1>, vector<4x256xf32>
    %423 = arith.mulf %410, %422 : vector<4x256xf32>
    %424 = arith.addf %365, %423 : vector<4x256xf32>
    %c254_i32 = arith.constant 254 : i32
    %425 = tpu.dynamic_rotate %14 by %c254_i32 dim 1 : vector<4x256xf32>, i32 -> vector<4x256xf32>
    %426 = arith.mulf %28, %23 : vector<1x256xf32>
    %c26 = arith.constant 26 : index
    %427 = memref.load %arg1[%c26] : memref<98xf32, #tpu.memory_space<smem>>
    %c75 = arith.constant 75 : index
    %428 = memref.load %arg1[%c75] : memref<98xf32, #tpu.memory_space<smem>>
    %429 = vector.broadcast %427 : f32 to vector<1x256xf32>
    %430 = arith.mulf %426, %429 : vector<1x256xf32>
    %431 = vector.broadcast %428 : f32 to vector<1x256xf32>
    %432 = arith.mulf %426, %431 : vector<1x256xf32>
    %433 = vector.shape_cast %430 : vector<1x256xf32> to vector<1x256xf32>
    %434 = vector.broadcast %433 : vector<1x256xf32> to vector<4x256xf32>
    %435 = vector.shape_cast %432 : vector<1x256xf32> to vector<1x256xf32>
    %436 = vector.broadcast %435 : vector<1x256xf32> to vector<4x256xf32>
    %437 = arith.select %17, %434, %436 : vector<4x256xi1>, vector<4x256xf32>
    %438 = arith.mulf %425, %437 : vector<4x256xf32>
    %439 = arith.addf %380, %438 : vector<4x256xf32>
    %c253_i32 = arith.constant 253 : i32
    %440 = tpu.dynamic_rotate %14 by %c253_i32 dim 1 : vector<4x256xf32>, i32 -> vector<4x256xf32>
    %441 = arith.mulf %28, %24 : vector<1x256xf32>
    %c27 = arith.constant 27 : index
    %442 = memref.load %arg1[%c27] : memref<98xf32, #tpu.memory_space<smem>>
    %c76 = arith.constant 76 : index
    %443 = memref.load %arg1[%c76] : memref<98xf32, #tpu.memory_space<smem>>
    %444 = vector.broadcast %442 : f32 to vector<1x256xf32>
    %445 = arith.mulf %441, %444 : vector<1x256xf32>
    %446 = vector.broadcast %443 : f32 to vector<1x256xf32>
    %447 = arith.mulf %441, %446 : vector<1x256xf32>
    %448 = vector.shape_cast %445 : vector<1x256xf32> to vector<1x256xf32>
    %449 = vector.broadcast %448 : vector<1x256xf32> to vector<4x256xf32>
    %450 = vector.shape_cast %447 : vector<1x256xf32> to vector<1x256xf32>
    %451 = vector.broadcast %450 : vector<1x256xf32> to vector<4x256xf32>
    %452 = arith.select %17, %449, %451 : vector<4x256xi1>, vector<4x256xf32>
    %453 = arith.mulf %440, %452 : vector<4x256xf32>
    %454 = arith.addf %395, %453 : vector<4x256xf32>
    %c243_i32 = arith.constant 243 : i32
    %455 = tpu.dynamic_rotate %14 by %c243_i32 dim 1 : vector<4x256xf32>, i32 -> vector<4x256xf32>
    %456 = arith.mulf %29, %18 : vector<1x256xf32>
    %c28 = arith.constant 28 : index
    %457 = memref.load %arg1[%c28] : memref<98xf32, #tpu.memory_space<smem>>
    %c77 = arith.constant 77 : index
    %458 = memref.load %arg1[%c77] : memref<98xf32, #tpu.memory_space<smem>>
    %459 = vector.broadcast %457 : f32 to vector<1x256xf32>
    %460 = arith.mulf %456, %459 : vector<1x256xf32>
    %461 = vector.broadcast %458 : f32 to vector<1x256xf32>
    %462 = arith.mulf %456, %461 : vector<1x256xf32>
    %463 = vector.shape_cast %460 : vector<1x256xf32> to vector<1x256xf32>
    %464 = vector.broadcast %463 : vector<1x256xf32> to vector<4x256xf32>
    %465 = vector.shape_cast %462 : vector<1x256xf32> to vector<1x256xf32>
    %466 = vector.broadcast %465 : vector<1x256xf32> to vector<4x256xf32>
    %467 = arith.select %17, %464, %466 : vector<4x256xi1>, vector<4x256xf32>
    %468 = arith.mulf %455, %467 : vector<4x256xf32>
    %469 = arith.addf %409, %468 : vector<4x256xf32>
    %c242_i32 = arith.constant 242 : i32
    %470 = tpu.dynamic_rotate %14 by %c242_i32 dim 1 : vector<4x256xf32>, i32 -> vector<4x256xf32>
    %471 = arith.mulf %29, %19 : vector<1x256xf32>
    %c29 = arith.constant 29 : index
    %472 = memref.load %arg1[%c29] : memref<98xf32, #tpu.memory_space<smem>>
    %c78 = arith.constant 78 : index
    %473 = memref.load %arg1[%c78] : memref<98xf32, #tpu.memory_space<smem>>
    %474 = vector.broadcast %472 : f32 to vector<1x256xf32>
    %475 = arith.mulf %471, %474 : vector<1x256xf32>
    %476 = vector.broadcast %473 : f32 to vector<1x256xf32>
    %477 = arith.mulf %471, %476 : vector<1x256xf32>
    %478 = vector.shape_cast %475 : vector<1x256xf32> to vector<1x256xf32>
    %479 = vector.broadcast %478 : vector<1x256xf32> to vector<4x256xf32>
    %480 = vector.shape_cast %477 : vector<1x256xf32> to vector<1x256xf32>
    %481 = vector.broadcast %480 : vector<1x256xf32> to vector<4x256xf32>
    %482 = arith.select %17, %479, %481 : vector<4x256xi1>, vector<4x256xf32>
    %483 = arith.mulf %470, %482 : vector<4x256xf32>
    %484 = arith.addf %424, %483 : vector<4x256xf32>
    %c241_i32 = arith.constant 241 : i32
    %485 = tpu.dynamic_rotate %14 by %c241_i32 dim 1 : vector<4x256xf32>, i32 -> vector<4x256xf32>
    %486 = arith.mulf %29, %20 : vector<1x256xf32>
    %c30 = arith.constant 30 : index
    %487 = memref.load %arg1[%c30] : memref<98xf32, #tpu.memory_space<smem>>
    %c79 = arith.constant 79 : index
    %488 = memref.load %arg1[%c79] : memref<98xf32, #tpu.memory_space<smem>>
    %489 = vector.broadcast %487 : f32 to vector<1x256xf32>
    %490 = arith.mulf %486, %489 : vector<1x256xf32>
    %491 = vector.broadcast %488 : f32 to vector<1x256xf32>
    %492 = arith.mulf %486, %491 : vector<1x256xf32>
    %493 = vector.shape_cast %490 : vector<1x256xf32> to vector<1x256xf32>
    %494 = vector.broadcast %493 : vector<1x256xf32> to vector<4x256xf32>
    %495 = vector.shape_cast %492 : vector<1x256xf32> to vector<1x256xf32>
    %496 = vector.broadcast %495 : vector<1x256xf32> to vector<4x256xf32>
    %497 = arith.select %17, %494, %496 : vector<4x256xi1>, vector<4x256xf32>
    %498 = arith.mulf %485, %497 : vector<4x256xf32>
    %499 = arith.addf %439, %498 : vector<4x256xf32>
    %c240_i32 = arith.constant 240 : i32
    %500 = tpu.dynamic_rotate %14 by %c240_i32 dim 1 : vector<4x256xf32>, i32 -> vector<4x256xf32>
    %501 = arith.mulf %29, %21 : vector<1x256xf32>
    %c31 = arith.constant 31 : index
    %502 = memref.load %arg1[%c31] : memref<98xf32, #tpu.memory_space<smem>>
    %c80 = arith.constant 80 : index
    %503 = memref.load %arg1[%c80] : memref<98xf32, #tpu.memory_space<smem>>
    %504 = vector.broadcast %502 : f32 to vector<1x256xf32>
    %505 = arith.mulf %501, %504 : vector<1x256xf32>
    %506 = vector.broadcast %503 : f32 to vector<1x256xf32>
    %507 = arith.mulf %501, %506 : vector<1x256xf32>
    %508 = vector.shape_cast %505 : vector<1x256xf32> to vector<1x256xf32>
    %509 = vector.broadcast %508 : vector<1x256xf32> to vector<4x256xf32>
    %510 = vector.shape_cast %507 : vector<1x256xf32> to vector<1x256xf32>
    %511 = vector.broadcast %510 : vector<1x256xf32> to vector<4x256xf32>
    %512 = arith.select %17, %509, %511 : vector<4x256xi1>, vector<4x256xf32>
    %513 = arith.mulf %500, %512 : vector<4x256xf32>
    %514 = arith.addf %454, %513 : vector<4x256xf32>
    %c239_i32 = arith.constant 239 : i32
    %515 = tpu.dynamic_rotate %14 by %c239_i32 dim 1 : vector<4x256xf32>, i32 -> vector<4x256xf32>
    %516 = arith.mulf %29, %22 : vector<1x256xf32>
    %c32 = arith.constant 32 : index
    %517 = memref.load %arg1[%c32] : memref<98xf32, #tpu.memory_space<smem>>
    %c81 = arith.constant 81 : index
    %518 = memref.load %arg1[%c81] : memref<98xf32, #tpu.memory_space<smem>>
    %519 = vector.broadcast %517 : f32 to vector<1x256xf32>
    %520 = arith.mulf %516, %519 : vector<1x256xf32>
    %521 = vector.broadcast %518 : f32 to vector<1x256xf32>
    %522 = arith.mulf %516, %521 : vector<1x256xf32>
    %523 = vector.shape_cast %520 : vector<1x256xf32> to vector<1x256xf32>
    %524 = vector.broadcast %523 : vector<1x256xf32> to vector<4x256xf32>
    %525 = vector.shape_cast %522 : vector<1x256xf32> to vector<1x256xf32>
    %526 = vector.broadcast %525 : vector<1x256xf32> to vector<4x256xf32>
    %527 = arith.select %17, %524, %526 : vector<4x256xi1>, vector<4x256xf32>
    %528 = arith.mulf %515, %527 : vector<4x256xf32>
    %529 = arith.addf %469, %528 : vector<4x256xf32>
    %c238_i32 = arith.constant 238 : i32
    %530 = tpu.dynamic_rotate %14 by %c238_i32 dim 1 : vector<4x256xf32>, i32 -> vector<4x256xf32>
    %531 = arith.mulf %29, %23 : vector<1x256xf32>
    %c33 = arith.constant 33 : index
    %532 = memref.load %arg1[%c33] : memref<98xf32, #tpu.memory_space<smem>>
    %c82 = arith.constant 82 : index
    %533 = memref.load %arg1[%c82] : memref<98xf32, #tpu.memory_space<smem>>
    %534 = vector.broadcast %532 : f32 to vector<1x256xf32>
    %535 = arith.mulf %531, %534 : vector<1x256xf32>
    %536 = vector.broadcast %533 : f32 to vector<1x256xf32>
    %537 = arith.mulf %531, %536 : vector<1x256xf32>
    %538 = vector.shape_cast %535 : vector<1x256xf32> to vector<1x256xf32>
    %539 = vector.broadcast %538 : vector<1x256xf32> to vector<4x256xf32>
    %540 = vector.shape_cast %537 : vector<1x256xf32> to vector<1x256xf32>
    %541 = vector.broadcast %540 : vector<1x256xf32> to vector<4x256xf32>
    %542 = arith.select %17, %539, %541 : vector<4x256xi1>, vector<4x256xf32>
    %543 = arith.mulf %530, %542 : vector<4x256xf32>
    %544 = arith.addf %484, %543 : vector<4x256xf32>
    %c237_i32 = arith.constant 237 : i32
    %545 = tpu.dynamic_rotate %14 by %c237_i32 dim 1 : vector<4x256xf32>, i32 -> vector<4x256xf32>
    %546 = arith.mulf %29, %24 : vector<1x256xf32>
    %c34 = arith.constant 34 : index
    %547 = memref.load %arg1[%c34] : memref<98xf32, #tpu.memory_space<smem>>
    %c83 = arith.constant 83 : index
    %548 = memref.load %arg1[%c83] : memref<98xf32, #tpu.memory_space<smem>>
    %549 = vector.broadcast %547 : f32 to vector<1x256xf32>
    %550 = arith.mulf %546, %549 : vector<1x256xf32>
    %551 = vector.broadcast %548 : f32 to vector<1x256xf32>
    %552 = arith.mulf %546, %551 : vector<1x256xf32>
    %553 = vector.shape_cast %550 : vector<1x256xf32> to vector<1x256xf32>
    %554 = vector.broadcast %553 : vector<1x256xf32> to vector<4x256xf32>
    %555 = vector.shape_cast %552 : vector<1x256xf32> to vector<1x256xf32>
    %556 = vector.broadcast %555 : vector<1x256xf32> to vector<4x256xf32>
    %557 = arith.select %17, %554, %556 : vector<4x256xi1>, vector<4x256xf32>
    %558 = arith.mulf %545, %557 : vector<4x256xf32>
    %559 = arith.addf %499, %558 : vector<4x256xf32>
    %c227_i32 = arith.constant 227 : i32
    %560 = tpu.dynamic_rotate %14 by %c227_i32 dim 1 : vector<4x256xf32>, i32 -> vector<4x256xf32>
    %561 = arith.mulf %30, %18 : vector<1x256xf32>
    %c35 = arith.constant 35 : index
    %562 = memref.load %arg1[%c35] : memref<98xf32, #tpu.memory_space<smem>>
    %c84 = arith.constant 84 : index
    %563 = memref.load %arg1[%c84] : memref<98xf32, #tpu.memory_space<smem>>
    %564 = vector.broadcast %562 : f32 to vector<1x256xf32>
    %565 = arith.mulf %561, %564 : vector<1x256xf32>
    %566 = vector.broadcast %563 : f32 to vector<1x256xf32>
    %567 = arith.mulf %561, %566 : vector<1x256xf32>
    %568 = vector.shape_cast %565 : vector<1x256xf32> to vector<1x256xf32>
    %569 = vector.broadcast %568 : vector<1x256xf32> to vector<4x256xf32>
    %570 = vector.shape_cast %567 : vector<1x256xf32> to vector<1x256xf32>
    %571 = vector.broadcast %570 : vector<1x256xf32> to vector<4x256xf32>
    %572 = arith.select %17, %569, %571 : vector<4x256xi1>, vector<4x256xf32>
    %573 = arith.mulf %560, %572 : vector<4x256xf32>
    %574 = arith.addf %514, %573 : vector<4x256xf32>
    %c226_i32 = arith.constant 226 : i32
    %575 = tpu.dynamic_rotate %14 by %c226_i32 dim 1 : vector<4x256xf32>, i32 -> vector<4x256xf32>
    %576 = arith.mulf %30, %19 : vector<1x256xf32>
    %c36 = arith.constant 36 : index
    %577 = memref.load %arg1[%c36] : memref<98xf32, #tpu.memory_space<smem>>
    %c85 = arith.constant 85 : index
    %578 = memref.load %arg1[%c85] : memref<98xf32, #tpu.memory_space<smem>>
    %579 = vector.broadcast %577 : f32 to vector<1x256xf32>
    %580 = arith.mulf %576, %579 : vector<1x256xf32>
    %581 = vector.broadcast %578 : f32 to vector<1x256xf32>
    %582 = arith.mulf %576, %581 : vector<1x256xf32>
    %583 = vector.shape_cast %580 : vector<1x256xf32> to vector<1x256xf32>
    %584 = vector.broadcast %583 : vector<1x256xf32> to vector<4x256xf32>
    %585 = vector.shape_cast %582 : vector<1x256xf32> to vector<1x256xf32>
    %586 = vector.broadcast %585 : vector<1x256xf32> to vector<4x256xf32>
    %587 = arith.select %17, %584, %586 : vector<4x256xi1>, vector<4x256xf32>
    %588 = arith.mulf %575, %587 : vector<4x256xf32>
    %589 = arith.addf %529, %588 : vector<4x256xf32>
    %c225_i32 = arith.constant 225 : i32
    %590 = tpu.dynamic_rotate %14 by %c225_i32 dim 1 : vector<4x256xf32>, i32 -> vector<4x256xf32>
    %591 = arith.mulf %30, %20 : vector<1x256xf32>
    %c37 = arith.constant 37 : index
    %592 = memref.load %arg1[%c37] : memref<98xf32, #tpu.memory_space<smem>>
    %c86 = arith.constant 86 : index
    %593 = memref.load %arg1[%c86] : memref<98xf32, #tpu.memory_space<smem>>
    %594 = vector.broadcast %592 : f32 to vector<1x256xf32>
    %595 = arith.mulf %591, %594 : vector<1x256xf32>
    %596 = vector.broadcast %593 : f32 to vector<1x256xf32>
    %597 = arith.mulf %591, %596 : vector<1x256xf32>
    %598 = vector.shape_cast %595 : vector<1x256xf32> to vector<1x256xf32>
    %599 = vector.broadcast %598 : vector<1x256xf32> to vector<4x256xf32>
    %600 = vector.shape_cast %597 : vector<1x256xf32> to vector<1x256xf32>
    %601 = vector.broadcast %600 : vector<1x256xf32> to vector<4x256xf32>
    %602 = arith.select %17, %599, %601 : vector<4x256xi1>, vector<4x256xf32>
    %603 = arith.mulf %590, %602 : vector<4x256xf32>
    %604 = arith.addf %544, %603 : vector<4x256xf32>
    %c224_i32 = arith.constant 224 : i32
    %605 = tpu.dynamic_rotate %14 by %c224_i32 dim 1 : vector<4x256xf32>, i32 -> vector<4x256xf32>
    %606 = arith.mulf %30, %21 : vector<1x256xf32>
    %c38 = arith.constant 38 : index
    %607 = memref.load %arg1[%c38] : memref<98xf32, #tpu.memory_space<smem>>
    %c87 = arith.constant 87 : index
    %608 = memref.load %arg1[%c87] : memref<98xf32, #tpu.memory_space<smem>>
    %609 = vector.broadcast %607 : f32 to vector<1x256xf32>
    %610 = arith.mulf %606, %609 : vector<1x256xf32>
    %611 = vector.broadcast %608 : f32 to vector<1x256xf32>
    %612 = arith.mulf %606, %611 : vector<1x256xf32>
    %613 = vector.shape_cast %610 : vector<1x256xf32> to vector<1x256xf32>
    %614 = vector.broadcast %613 : vector<1x256xf32> to vector<4x256xf32>
    %615 = vector.shape_cast %612 : vector<1x256xf32> to vector<1x256xf32>
    %616 = vector.broadcast %615 : vector<1x256xf32> to vector<4x256xf32>
    %617 = arith.select %17, %614, %616 : vector<4x256xi1>, vector<4x256xf32>
    %618 = arith.mulf %605, %617 : vector<4x256xf32>
    %619 = arith.addf %559, %618 : vector<4x256xf32>
    %c223_i32 = arith.constant 223 : i32
    %620 = tpu.dynamic_rotate %14 by %c223_i32 dim 1 : vector<4x256xf32>, i32 -> vector<4x256xf32>
    %621 = arith.mulf %30, %22 : vector<1x256xf32>
    %c39 = arith.constant 39 : index
    %622 = memref.load %arg1[%c39] : memref<98xf32, #tpu.memory_space<smem>>
    %c88 = arith.constant 88 : index
    %623 = memref.load %arg1[%c88] : memref<98xf32, #tpu.memory_space<smem>>
    %624 = vector.broadcast %622 : f32 to vector<1x256xf32>
    %625 = arith.mulf %621, %624 : vector<1x256xf32>
    %626 = vector.broadcast %623 : f32 to vector<1x256xf32>
    %627 = arith.mulf %621, %626 : vector<1x256xf32>
    %628 = vector.shape_cast %625 : vector<1x256xf32> to vector<1x256xf32>
    %629 = vector.broadcast %628 : vector<1x256xf32> to vector<4x256xf32>
    %630 = vector.shape_cast %627 : vector<1x256xf32> to vector<1x256xf32>
    %631 = vector.broadcast %630 : vector<1x256xf32> to vector<4x256xf32>
    %632 = arith.select %17, %629, %631 : vector<4x256xi1>, vector<4x256xf32>
    %633 = arith.mulf %620, %632 : vector<4x256xf32>
    %634 = arith.addf %574, %633 : vector<4x256xf32>
    %c222_i32 = arith.constant 222 : i32
    %635 = tpu.dynamic_rotate %14 by %c222_i32 dim 1 : vector<4x256xf32>, i32 -> vector<4x256xf32>
    %636 = arith.mulf %30, %23 : vector<1x256xf32>
    %c40 = arith.constant 40 : index
    %637 = memref.load %arg1[%c40] : memref<98xf32, #tpu.memory_space<smem>>
    %c89 = arith.constant 89 : index
    %638 = memref.load %arg1[%c89] : memref<98xf32, #tpu.memory_space<smem>>
    %639 = vector.broadcast %637 : f32 to vector<1x256xf32>
    %640 = arith.mulf %636, %639 : vector<1x256xf32>
    %641 = vector.broadcast %638 : f32 to vector<1x256xf32>
    %642 = arith.mulf %636, %641 : vector<1x256xf32>
    %643 = vector.shape_cast %640 : vector<1x256xf32> to vector<1x256xf32>
    %644 = vector.broadcast %643 : vector<1x256xf32> to vector<4x256xf32>
    %645 = vector.shape_cast %642 : vector<1x256xf32> to vector<1x256xf32>
    %646 = vector.broadcast %645 : vector<1x256xf32> to vector<4x256xf32>
    %647 = arith.select %17, %644, %646 : vector<4x256xi1>, vector<4x256xf32>
    %648 = arith.mulf %635, %647 : vector<4x256xf32>
    %649 = arith.addf %589, %648 : vector<4x256xf32>
    %c221_i32 = arith.constant 221 : i32
    %650 = tpu.dynamic_rotate %14 by %c221_i32 dim 1 : vector<4x256xf32>, i32 -> vector<4x256xf32>
    %651 = arith.mulf %30, %24 : vector<1x256xf32>
    %c41 = arith.constant 41 : index
    %652 = memref.load %arg1[%c41] : memref<98xf32, #tpu.memory_space<smem>>
    %c90 = arith.constant 90 : index
    %653 = memref.load %arg1[%c90] : memref<98xf32, #tpu.memory_space<smem>>
    %654 = vector.broadcast %652 : f32 to vector<1x256xf32>
    %655 = arith.mulf %651, %654 : vector<1x256xf32>
    %656 = vector.broadcast %653 : f32 to vector<1x256xf32>
    %657 = arith.mulf %651, %656 : vector<1x256xf32>
    %658 = vector.shape_cast %655 : vector<1x256xf32> to vector<1x256xf32>
    %659 = vector.broadcast %658 : vector<1x256xf32> to vector<4x256xf32>
    %660 = vector.shape_cast %657 : vector<1x256xf32> to vector<1x256xf32>
    %661 = vector.broadcast %660 : vector<1x256xf32> to vector<4x256xf32>
    %662 = arith.select %17, %659, %661 : vector<4x256xi1>, vector<4x256xf32>
    %663 = arith.mulf %650, %662 : vector<4x256xf32>
    %664 = arith.addf %604, %663 : vector<4x256xf32>
    %c211_i32 = arith.constant 211 : i32
    %665 = tpu.dynamic_rotate %14 by %c211_i32 dim 1 : vector<4x256xf32>, i32 -> vector<4x256xf32>
    %666 = arith.mulf %31, %18 : vector<1x256xf32>
    %c42 = arith.constant 42 : index
    %667 = memref.load %arg1[%c42] : memref<98xf32, #tpu.memory_space<smem>>
    %c91 = arith.constant 91 : index
    %668 = memref.load %arg1[%c91] : memref<98xf32, #tpu.memory_space<smem>>
    %669 = vector.broadcast %667 : f32 to vector<1x256xf32>
    %670 = arith.mulf %666, %669 : vector<1x256xf32>
    %671 = vector.broadcast %668 : f32 to vector<1x256xf32>
    %672 = arith.mulf %666, %671 : vector<1x256xf32>
    %673 = vector.shape_cast %670 : vector<1x256xf32> to vector<1x256xf32>
    %674 = vector.broadcast %673 : vector<1x256xf32> to vector<4x256xf32>
    %675 = vector.shape_cast %672 : vector<1x256xf32> to vector<1x256xf32>
    %676 = vector.broadcast %675 : vector<1x256xf32> to vector<4x256xf32>
    %677 = arith.select %17, %674, %676 : vector<4x256xi1>, vector<4x256xf32>
    %678 = arith.mulf %665, %677 : vector<4x256xf32>
    %679 = arith.addf %619, %678 : vector<4x256xf32>
    %c210_i32 = arith.constant 210 : i32
    %680 = tpu.dynamic_rotate %14 by %c210_i32 dim 1 : vector<4x256xf32>, i32 -> vector<4x256xf32>
    %681 = arith.mulf %31, %19 : vector<1x256xf32>
    %c43 = arith.constant 43 : index
    %682 = memref.load %arg1[%c43] : memref<98xf32, #tpu.memory_space<smem>>
    %c92 = arith.constant 92 : index
    %683 = memref.load %arg1[%c92] : memref<98xf32, #tpu.memory_space<smem>>
    %684 = vector.broadcast %682 : f32 to vector<1x256xf32>
    %685 = arith.mulf %681, %684 : vector<1x256xf32>
    %686 = vector.broadcast %683 : f32 to vector<1x256xf32>
    %687 = arith.mulf %681, %686 : vector<1x256xf32>
    %688 = vector.shape_cast %685 : vector<1x256xf32> to vector<1x256xf32>
    %689 = vector.broadcast %688 : vector<1x256xf32> to vector<4x256xf32>
    %690 = vector.shape_cast %687 : vector<1x256xf32> to vector<1x256xf32>
    %691 = vector.broadcast %690 : vector<1x256xf32> to vector<4x256xf32>
    %692 = arith.select %17, %689, %691 : vector<4x256xi1>, vector<4x256xf32>
    %693 = arith.mulf %680, %692 : vector<4x256xf32>
    %694 = arith.addf %634, %693 : vector<4x256xf32>
    %c209_i32 = arith.constant 209 : i32
    %695 = tpu.dynamic_rotate %14 by %c209_i32 dim 1 : vector<4x256xf32>, i32 -> vector<4x256xf32>
    %696 = arith.mulf %31, %20 : vector<1x256xf32>
    %c44 = arith.constant 44 : index
    %697 = memref.load %arg1[%c44] : memref<98xf32, #tpu.memory_space<smem>>
    %c93 = arith.constant 93 : index
    %698 = memref.load %arg1[%c93] : memref<98xf32, #tpu.memory_space<smem>>
    %699 = vector.broadcast %697 : f32 to vector<1x256xf32>
    %700 = arith.mulf %696, %699 : vector<1x256xf32>
    %701 = vector.broadcast %698 : f32 to vector<1x256xf32>
    %702 = arith.mulf %696, %701 : vector<1x256xf32>
    %703 = vector.shape_cast %700 : vector<1x256xf32> to vector<1x256xf32>
    %704 = vector.broadcast %703 : vector<1x256xf32> to vector<4x256xf32>
    %705 = vector.shape_cast %702 : vector<1x256xf32> to vector<1x256xf32>
    %706 = vector.broadcast %705 : vector<1x256xf32> to vector<4x256xf32>
    %707 = arith.select %17, %704, %706 : vector<4x256xi1>, vector<4x256xf32>
    %708 = arith.mulf %695, %707 : vector<4x256xf32>
    %709 = arith.addf %649, %708 : vector<4x256xf32>
    %c208_i32 = arith.constant 208 : i32
    %710 = tpu.dynamic_rotate %14 by %c208_i32 dim 1 : vector<4x256xf32>, i32 -> vector<4x256xf32>
    %711 = arith.mulf %31, %21 : vector<1x256xf32>
    %c45 = arith.constant 45 : index
    %712 = memref.load %arg1[%c45] : memref<98xf32, #tpu.memory_space<smem>>
    %c94 = arith.constant 94 : index
    %713 = memref.load %arg1[%c94] : memref<98xf32, #tpu.memory_space<smem>>
    %714 = vector.broadcast %712 : f32 to vector<1x256xf32>
    %715 = arith.mulf %711, %714 : vector<1x256xf32>
    %716 = vector.broadcast %713 : f32 to vector<1x256xf32>
    %717 = arith.mulf %711, %716 : vector<1x256xf32>
    %718 = vector.shape_cast %715 : vector<1x256xf32> to vector<1x256xf32>
    %719 = vector.broadcast %718 : vector<1x256xf32> to vector<4x256xf32>
    %720 = vector.shape_cast %717 : vector<1x256xf32> to vector<1x256xf32>
    %721 = vector.broadcast %720 : vector<1x256xf32> to vector<4x256xf32>
    %722 = arith.select %17, %719, %721 : vector<4x256xi1>, vector<4x256xf32>
    %723 = arith.mulf %710, %722 : vector<4x256xf32>
    %724 = arith.addf %664, %723 : vector<4x256xf32>
    %c207_i32 = arith.constant 207 : i32
    %725 = tpu.dynamic_rotate %14 by %c207_i32 dim 1 : vector<4x256xf32>, i32 -> vector<4x256xf32>
    %726 = arith.mulf %31, %22 : vector<1x256xf32>
    %c46 = arith.constant 46 : index
    %727 = memref.load %arg1[%c46] : memref<98xf32, #tpu.memory_space<smem>>
    %c95 = arith.constant 95 : index
    %728 = memref.load %arg1[%c95] : memref<98xf32, #tpu.memory_space<smem>>
    %729 = vector.broadcast %727 : f32 to vector<1x256xf32>
    %730 = arith.mulf %726, %729 : vector<1x256xf32>
    %731 = vector.broadcast %728 : f32 to vector<1x256xf32>
    %732 = arith.mulf %726, %731 : vector<1x256xf32>
    %733 = vector.shape_cast %730 : vector<1x256xf32> to vector<1x256xf32>
    %734 = vector.broadcast %733 : vector<1x256xf32> to vector<4x256xf32>
    %735 = vector.shape_cast %732 : vector<1x256xf32> to vector<1x256xf32>
    %736 = vector.broadcast %735 : vector<1x256xf32> to vector<4x256xf32>
    %737 = arith.select %17, %734, %736 : vector<4x256xi1>, vector<4x256xf32>
    %738 = arith.mulf %725, %737 : vector<4x256xf32>
    %739 = arith.addf %679, %738 : vector<4x256xf32>
    %c206_i32 = arith.constant 206 : i32
    %740 = tpu.dynamic_rotate %14 by %c206_i32 dim 1 : vector<4x256xf32>, i32 -> vector<4x256xf32>
    %741 = arith.mulf %31, %23 : vector<1x256xf32>
    %c47 = arith.constant 47 : index
    %742 = memref.load %arg1[%c47] : memref<98xf32, #tpu.memory_space<smem>>
    %c96 = arith.constant 96 : index
    %743 = memref.load %arg1[%c96] : memref<98xf32, #tpu.memory_space<smem>>
    %744 = vector.broadcast %742 : f32 to vector<1x256xf32>
    %745 = arith.mulf %741, %744 : vector<1x256xf32>
    %746 = vector.broadcast %743 : f32 to vector<1x256xf32>
    %747 = arith.mulf %741, %746 : vector<1x256xf32>
    %748 = vector.shape_cast %745 : vector<1x256xf32> to vector<1x256xf32>
    %749 = vector.broadcast %748 : vector<1x256xf32> to vector<4x256xf32>
    %750 = vector.shape_cast %747 : vector<1x256xf32> to vector<1x256xf32>
    %751 = vector.broadcast %750 : vector<1x256xf32> to vector<4x256xf32>
    %752 = arith.select %17, %749, %751 : vector<4x256xi1>, vector<4x256xf32>
    %753 = arith.mulf %740, %752 : vector<4x256xf32>
    %754 = arith.addf %694, %753 : vector<4x256xf32>
    %c205_i32 = arith.constant 205 : i32
    %755 = tpu.dynamic_rotate %14 by %c205_i32 dim 1 : vector<4x256xf32>, i32 -> vector<4x256xf32>
    %756 = arith.mulf %31, %24 : vector<1x256xf32>
    %c48 = arith.constant 48 : index
    %757 = memref.load %arg1[%c48] : memref<98xf32, #tpu.memory_space<smem>>
    %c97 = arith.constant 97 : index
    %758 = memref.load %arg1[%c97] : memref<98xf32, #tpu.memory_space<smem>>
    %759 = vector.broadcast %757 : f32 to vector<1x256xf32>
    %760 = arith.mulf %756, %759 : vector<1x256xf32>
    %761 = vector.broadcast %758 : f32 to vector<1x256xf32>
    %762 = arith.mulf %756, %761 : vector<1x256xf32>
    %763 = vector.shape_cast %760 : vector<1x256xf32> to vector<1x256xf32>
    %764 = vector.broadcast %763 : vector<1x256xf32> to vector<4x256xf32>
    %765 = vector.shape_cast %762 : vector<1x256xf32> to vector<1x256xf32>
    %766 = vector.broadcast %765 : vector<1x256xf32> to vector<4x256xf32>
    %767 = arith.select %17, %764, %766 : vector<4x256xi1>, vector<4x256xf32>
    %768 = arith.mulf %755, %767 : vector<4x256xf32>
    %769 = arith.addf %709, %768 : vector<4x256xf32>
    %770 = arith.addf %769, %724 : vector<4x256xf32>
    %771 = arith.addf %739, %754 : vector<4x256xf32>
    %772 = arith.addf %770, %771 : vector<4x256xf32>
    %773 = vector.extract_strided_slice %772 {offsets = [0, 0], sizes = [2, 256], strides = [1, 1]} : vector<4x256xf32> to vector<2x256xf32>
    %774 = vector.extract_strided_slice %772 {offsets = [2, 0], sizes = [2, 256], strides = [1, 1]} : vector<4x256xf32> to vector<2x256xf32>
    %775 = arith.addf %773, %774 : vector<2x256xf32>
    %776 = arith.negf %775 : vector<2x256xf32>
    %777 = math.exp %776 : vector<2x256xf32>
    %cst_44 = arith.constant 1.000000e+00 : f32
    %778 = vector.broadcast %cst_44 : f32 to vector<2x256xf32>
    %779 = arith.addf %778, %777 : vector<2x256xf32>
    %780 = arith.divf %778, %779 : vector<2x256xf32>
    %c0_45 = arith.constant 0 : index
    %c0_46 = arith.constant 0 : index
    %c0_47 = arith.constant 0 : index
    %781 = vector.load %arg2[%c0_45, %c0_46, %c0_47] : memref<2x4x256xf32, #tpu.memory_space<vmem>>, vector<2x1x256xf32>
    %782 = vector.shape_cast %781 : vector<2x1x256xf32> to vector<2x256xf32>
    %783 = arith.mulf %782, %780 : vector<2x256xf32>
    %c0_48 = arith.constant 0 : index
    %c0_49 = arith.constant 0 : index
    %c0_50 = arith.constant 0 : index
    %784 = vector.load %arg4[%c0_48, %c0_49, %c0_50] : memref<2x4x256xf32, #tpu.memory_space<vmem>>, vector<2x1x256xf32>
    %785 = vector.shape_cast %784 : vector<2x1x256xf32> to vector<2x256xf32>
    %786 = vector.shape_cast %783 : vector<2x256xf32> to vector<2x1x256xf32>
    tpu.vector_store %arg4[%c0_48, %c0_49, %c0_50], %786 {strides = array<i32>} : memref<2x4x256xf32, #tpu.memory_space<vmem>>, vector<2x1x256xf32>,
    %c0_51 = arith.constant 0 : index
    %c1_52 = arith.constant 1 : index
    %c0_53 = arith.constant 0 : index
    %787 = vector.load %arg2[%c0_51, %c1_52, %c0_53] : memref<2x4x256xf32, #tpu.memory_space<vmem>>, vector<2x1x256xf32>
    %788 = vector.shape_cast %787 : vector<2x1x256xf32> to vector<2x256xf32>
    %789 = arith.mulf %788, %780 : vector<2x256xf32>
    %c0_54 = arith.constant 0 : index
    %c1_55 = arith.constant 1 : index
    %c0_56 = arith.constant 0 : index
    %790 = vector.load %arg4[%c0_54, %c1_55, %c0_56] : memref<2x4x256xf32, #tpu.memory_space<vmem>>, vector<2x1x256xf32>
    %791 = vector.shape_cast %790 : vector<2x1x256xf32> to vector<2x256xf32>
    %792 = vector.shape_cast %789 : vector<2x256xf32> to vector<2x1x256xf32>
    tpu.vector_store %arg4[%c0_54, %c1_55, %c0_56], %792 {strides = array<i32>} : memref<2x4x256xf32, #tpu.memory_space<vmem>>, vector<2x1x256xf32>,
    %c0_57 = arith.constant 0 : index
    %c2_58 = arith.constant 2 : index
    %c0_59 = arith.constant 0 : index
    %793 = vector.load %arg2[%c0_57, %c2_58, %c0_59] : memref<2x4x256xf32, #tpu.memory_space<vmem>>, vector<2x1x256xf32>
    %794 = vector.shape_cast %793 : vector<2x1x256xf32> to vector<2x256xf32>
    %795 = arith.mulf %794, %780 : vector<2x256xf32>
    %c0_60 = arith.constant 0 : index
    %c2_61 = arith.constant 2 : index
    %c0_62 = arith.constant 0 : index
    %796 = vector.load %arg4[%c0_60, %c2_61, %c0_62] : memref<2x4x256xf32, #tpu.memory_space<vmem>>, vector<2x1x256xf32>
    %797 = vector.shape_cast %796 : vector<2x1x256xf32> to vector<2x256xf32>
    %798 = vector.shape_cast %795 : vector<2x256xf32> to vector<2x1x256xf32>
    tpu.vector_store %arg4[%c0_60, %c2_61, %c0_62], %798 {strides = array<i32>} : memref<2x4x256xf32, #tpu.memory_space<vmem>>, vector<2x1x256xf32>,
    %c0_63 = arith.constant 0 : index
    %c3_64 = arith.constant 3 : index
    %c0_65 = arith.constant 0 : index
    %799 = vector.load %arg2[%c0_63, %c3_64, %c0_65] : memref<2x4x256xf32, #tpu.memory_space<vmem>>, vector<2x1x256xf32>
    %800 = vector.shape_cast %799 : vector<2x1x256xf32> to vector<2x256xf32>
    %801 = arith.mulf %800, %780 : vector<2x256xf32>
    %c0_66 = arith.constant 0 : index
    %c3_67 = arith.constant 3 : index
    %c0_68 = arith.constant 0 : index
    %802 = vector.load %arg4[%c0_66, %c3_67, %c0_68] : memref<2x4x256xf32, #tpu.memory_space<vmem>>, vector<2x1x256xf32>
    %803 = vector.shape_cast %802 : vector<2x1x256xf32> to vector<2x256xf32>
    %804 = vector.shape_cast %801 : vector<2x256xf32> to vector<2x1x256xf32>
    tpu.vector_store %arg4[%c0_66, %c3_67, %c0_68], %804 {strides = array<i32>} : memref<2x4x256xf32, #tpu.memory_space<vmem>>, vector<2x1x256xf32>,
    return
  }
  func.func @transform_0(%arg0: i32, %arg1: memref<98xf32, #tpu.memory_space<smem>>) -> (i32, i32, i32) {
    %c0_i32 = arith.constant 0 : i32
    %c0_i32_0 = arith.constant 0 : i32
    %c0_i32_1 = arith.constant 0 : i32
    return %arg0, %c0_i32, %c0_i32_0 : i32, i32, i32
  }
  func.func @transform_1(%arg0: i32, %arg1: memref<98xf32, #tpu.memory_space<smem>>) -> (i32, i32) {
    %c0_i32 = arith.constant 0 : i32
    %c0_i32_0 = arith.constant 0 : i32
    %c0_i32_1 = arith.constant 0 : i32
    return %c0_i32, %c0_i32_0 : i32, i32
  }
  func.func @transform_2(%arg0: i32, %arg1: memref<98xf32, #tpu.memory_space<smem>>) -> (i32, i32, i32) {
    %c0_i32 = arith.constant 0 : i32
    %c0_i32_0 = arith.constant 0 : i32
    %c0_i32_1 = arith.constant 0 : i32
    return %arg0, %c0_i32, %c0_i32_0 : i32, i32, i32
  }
}

</mosaic_0001>

<bundles_post_ra>
// kernel: tpu_custom_call.1
= control target key start
LH: loop header
LB: loop body
LE: loop exit
PB: predicated region body
PF: predicated region fallthrough
CT: control target
= control target key end

     0   :  { %s4444_s0 = inlined_call_operand.hbm [shape: f32[98], index: 0, kind: input, shape index: {}]   ;;  %s4445_s1 = inlined_call_operand.hbm [shape: f32[2,4,256], index: 1, kind: input, shape index: {}]   ;;  %s4446_s2 = inlined_call_operand.hbm [shape: f32[14,256], index: 2, kind: input, shape index: {}]   ;;  %s4447_s3 = inlined_call_operand.hbm [shape: f32[2,4,256], index: 3, kind: output, shape index: {}]  }
   0x1   :  { %s2488_s14 = scalar_lea.hbm %s4444_s0, 16 }
   0x2   :  { %p2489_p0 = scmp.ne.s32.totalorder %s4444_s0, %s2488_s14  ;;  %p2492_p1 = scmp.lt.u32.totalorder %s2488_s14, %s4444_s0 }
   0x4   :  { %p2494_p2 = pnand %p2492_p1, %p2489_p0 }
   0x6   :  { %2497 = shalt.err (!%p2494_p2)  }
   0x7   :  { %s2572_s19 = smov [#allocation3]  }
   0x8   :  { %9 = dma.hbm_to_smem %s4444_s0, 16, %s2572_s19, [#allocation2] }
   0x9   :  { %2564 = dma.done.wait [#allocation2], 16 }
   0xa   :  { %2565 = vsyncadd [#allocation2], 4294967280 }
   0xb   :  { %11 = sfence }
   0xc   :  { %12 = vsyncpa [#allocation5], 0 }
   0xd   :  { %13 = vsyncpa [#allocation8], 0 }
   0xe   :  { %14 = vsyncpa [#allocation6], 0  ;;  %s2573_s22 = smov [#allocation4]   ;;  %s2498_s26 = scalar_lea.hbm %s4445_s1, 256 }
   0xf   :  { %s20_s23 = sshll.u32 %s2573_s22, 4  ;;  %p2499_p3 = scmp.ne.s32.totalorder %s4445_s1, %s2498_s26  ;;  %s21_s23 = int_to_ptr.vmem [resolvable:$true] %s20_s23 }
  0x10   :  { %p2502_p4 = scmp.lt.u32.totalorder %s2498_s26, %s4445_s1 }
  0x12   :  { %p2504_p5 = pnand %p2502_p4, %p2499_p3 }
  0x14   :  { %2507 = shalt.err (!%p2504_p5)
}
  0x15   :  { %s2508_s0 = scalar_lea.vmem %s21_s23, 256  ;;  %p2513_p7 = scmp.lt.s32.totalorder %s21_s23, %s21_s23 }
  0x16   :  { %p2509_p6 = scmp.ne.s32.totalorder %s21_s23, %s2508_s0  ;;  %p2514_p8 = scmp.lt.s32.totalorder %s2508_s0, %s2508_s0 }
  0x18   :  { %p2515_p9 = por %p2514_p8, %p2513_p7 }
  0x1a   :  { %p2516_p10 = pnand %p2515_p9, %p2509_p6 }
  0x1c   :  { %2519 = shalt.err (!%p2516_p10)
}
  0x1d   :  { %s2574_s4 = smov 128   ;;  %s2575_s5 = smov 8  }
  0x1e   :  { %26 = dma.hbm_to_vmem [thread:$0]  %s4445_s1, 256, %s21_s23, [#allocation5], %s2574_s4, %s2574_s4, %s2575_s5  }
  0x1f   :  { %s2576_s8 = smov [#allocation7]   ;;  %s2520_s12 = scalar_lea.hbm %s4446_s2, 512 }
  0x20   :  { %s32_s9 = sshll.u32 %s2576_s8, 4  ;;  %p2521_p11 = scmp.ne.s32.totalorder %s4446_s2, %s2520_s12  ;;  %s33_s9 = int_to_ptr.vmem [resolvable:$true] %s32_s9 }
  0x21   :  { %p2524_p12 = scmp.lt.u32.totalorder %s2520_s12, %s4446_s2 }
  0x23   :  { %p2526_p13 = pnand %p2524_p12, %p2521_p11 }
  0x25   :  { %2529 = shalt.err (!%p2526_p13)
}
  0x26   :  { %s2530_s17 = scalar_lea.vmem %s33_s9, 512  ;;  %p2535_p1 = scmp.lt.s32.totalorder %s33_s9, %s33_s9 }
  0x27   :  { %p2531_p0 = scmp.ne.s32.totalorder %s33_s9, %s2530_s17  ;;  %p2536_p2 = scmp.lt.s32.totalorder %s2530_s17, %s2530_s17 }
  0x29   :  { %p2537_p3 = por %p2536_p2, %p2535_p1 }
  0x2b   :  { %p2538_p4 = pnand %p2537_p3, %p2531_p0 }
  0x2d   :  { %2541 = shalt.err (!%p2538_p4)
}
  0x2e   :  { %s2577_s1 = smov 256   ;;  %s2578_s18 = smov 16  }
  0x2f   :  { %38 = dma.hbm_to_vmem [thread:$0]  %s4446_s2, 512, %s33_s9, [#allocation8], %s2577_s1, %s2577_s1, %s2578_s18  }
  0x30   :  { %2566 = dma.done.wait [#allocation5], 256  }
  0x31   :  { %2567 = vsyncadd [#allocation5], 4294967040 }
  0x32   :  { %2568 = dma.done.wait [#allocation8], 512  }
  0x33   :  { %2569 = vsyncadd [#allocation8], 4294966784  ;;  %v78_v0 = vlaneseq  ;;  %v2579_v1 = vmov 1966171168   ;;  %vm126_vm0 = vcmask 1041408   ;;  %s2580_s2 = smov 50  }
  0x34   :  { %v76_v2 = vunpack.c.l.s4 %v2579_v1  ;;  %v45_v4 = vld [vmem:[#allocation4] ss:$4 sm:$0x3]  ;;  %v47_v5 = vld [vmem:[#allocation4 + $0x8] ss:$4 sm:$0x3] }
  0x35   :  { %v2689_v3 = vshrl.u32 %v78_v0, 7  ;;  %v49_v6 = vld [vmem:[#allocation4 + $0x1] ss:$4 sm:$0x3]  ;;  %s2581_s21 = smov 51   ;;  %s2582_s22 = smov 49  }
  0x36   :  { %v51_v7 = vld [vmem:[#allocation4 + $0x9] ss:$4 sm:$0x3]  ;;  %v77_v8 = vunpack.c.0.s8 %v76_v2  ;;  %v52_v9 = vadd.f32 %v49_v6, %v45_v4  ;;  %v54_v11 = vmax.f32 %v45_v4, %v49_v6  ;;  %v57_v13 = vld [vmem:[#allocation4 + $0x2] ss:$4 sm:$0x3] }
  0x37   :  { %v53_v10 = vadd.f32 %v51_v7, %v47_v5  ;;  %v55_v12 = vmax.f32 %v47_v5, %v51_v7  ;;  %v59_v14 = vld [vmem:[#allocation4 + $0xa] ss:$4 sm:$0x3]  ;;  %v65_v15 = vld [vmem:[#allocation4 + $0x3] ss:$4 sm:$0x3] }
  0x38   :  { %v67_v16 = vld [vmem:[#allocation4 + $0xb] ss:$4 sm:$0x3]  ;;  %v60_v17 = vadd.f32 %v57_v13, %v52_v9  ;;  %v62_v19 = vmax.f32 %v54_v11, %v57_v13  ;;  %v2692_v21 = vsub.s32 %v77_v8, %v2689_v3  ;;  %s2583_s23 = smov 48   ;;  %s2584_s24 = smov 47   ;;  %v2773_v48 = vsub.s32 0, %v2689_v3 }
  0x39   :  { %v61_v18 = vadd.f32 %v59_v14, %v53_v10  ;;  %v63_v20 = vmax.f32 %v55_v12, %v59_v14  ;;  %s2585_s25 = smov 46   ;;  %s2586_s26 = smov 45   ;;  %v2750_v38 = vld [vmem:[#allocation7 + $0x1] ss:$8 sm:$0x3]  ;;  %v2776_v51 = vsub.s32 1, %v2689_v3 }
  0x3a   :  { %v68_v22 = vadd.f32 %v65_v15, %v60_v17  ;;  %v70_v24 = vmax.f32 %v62_v19, %v65_v15  ;;  %s2587_s27 = smov 35   ;;  %s2588_s28 = smov 34   ;;  %v2752_v39 = vld [vmem:[#allocation7 + $0x7] ss:$8 sm:$0x3]  ;;  %vm131_vm1 = vcmp.lt.s32.totalorder %v2689_v3, 2 }
  0x3b   :  { %v69_v23 = vadd.f32 %v67_v16, %v61_v18  ;;  %v71_v25 = vmax.f32 %v63_v20, %v67_v16  ;;  %s2589_s29 = smov 33   ;;  %s2590_s30 = smov 32   ;;  %v2754_v40 = vld [vmem:[#allocation7] ss:$8 sm:$0x3]  ;;  %v210_v41 = vmul.f32 %v2752_v39, %v2750_v38  ;;  %v2824_v8 = vand.u32 127, %v78_v0 }
  0x3c   :  { %s2591_s0 = smov 31   ;;  %s2592_s6 = smov 30   ;;  %v168_v44 = vmul.f32 %v2752_v39, %v2754_v40  ;;  %v2768_v47 = vld [vmem:[#allocation7 + $0x2] ss:$8 sm:$0x3] }
  0x3d   :  { %v74_v26 = vcombine.low %v68_v22, %v69_v23  ;;  %v101_v27 = vcombine.low %v70_v24, %v71_v25  ;;  %s2593_s7 = smov 29   ;;  %s2594_s8 = smov 19   ;;  %v252_v54 = vmul.f32 %v2752_v39, %v2768_v47  ;;  %v2788_v55 = vld [vmem:[#allocation7 + $0x3] ss:$8 sm:$0x3]  ;;  %vm207_vm2 = vcmp.lt.s32.totalorder %v2824_v8, 50 }
  0x3e   :  { %s2595_s9 = smov 18   ;;  %s2596_s10 = smov 17   ;;  %v2793_v57 = vld [vmem:[#allocation7 + $0x4] ss:$8 sm:$0x3]  ;;  %v294_v63 = vmul.f32 %v2752_v39, %v2788_v55  ;;  %vm165_vm3 = vcmp.lt.s32.totalorder %v2824_v8, 51 }
  0x3f   :  { %v81_v28 = vrot.slane %v74_v26, %v2692_v21  ;;  %v108_v29 = vrot.slane %v101_v27, %v2692_v21  ;;  %s2597_s11 = smov 15   ;;  %s2598_s12 = smov 14   ;;  %v336_v11 = vmul.f32 %v2752_v39, %v2793_v57  ;;  %v2834_v12 = vld [vmem:[#allocation7 + $0x5] ss:$8 sm:$0x3]  ;;  %vm249_vm4 = vcmp.lt.s32.totalorder %v2824_v8, 49 }
  0x40   :  { %s2599_s13 = smov 13   ;;  %s2317_s14 = sld [smem:[#allocation3 + $0x1]]  ;;  %v2845_v17 = vld [vmem:[#allocation7 + $0x6] ss:$8 sm:$0x3]  ;;  %v378_v26 = vmul.f32 %v2752_v39, %v2834_v12  ;;  %vm291_vm5 = vcmp.lt.s32.totalorder %v2824_v8, 48 }
  0x41   :  { %v89_v30 = vrot.slane %v81_v28, %v2692_v21  ;;  %v109_v31 = vcombine.low %v108_v29, %v108_v29  ;;  %v82_v32 = vcombine.high %v81_v28, %v81_v28  ;;  %v123_v35 = vrot.slane %v108_v29, %v2692_v21  ;;  %s2318_s15 = sld [smem:[#allocation3 + $0x32]]  ;;  %s169_s16 = sld [smem:[#allocation3]]  ;;  %v2858_v27 = vld [vmem:[#allocation7 + $0x10] ss:$8 sm:$0x3] }
  0x42   :  { %s2316_s17 = sld [smem:[#allocation3 + $0x31]]  ;;  %s2600_s1 = smov 3   ;;  %vm333_vm6 = vcmp.lt.s32.totalorder %v2824_v8, 47  ;;  %vm375_vm7 = vcmp.lt.s32.totalorder %v2824_v8, 46  ;;  %vm417_vm8 = vcmp.lt.s32.totalorder %v2824_v8, 45  ;;  %vm459_vm9 = vcmp.lt.s32.totalorder %v2824_v8, 35 }
  0x43   :  { %v116_v33 = vrot.slane %v109_v31, %v2692_v21  ;;  %v96_v34 = vrot.slane %v82_v32, %v2692_v21  ;;  %s2760_s19 = sld [smem:[#allocation3 + $0x33]]  ;;  %s2601_s20 = smov 2   ;;  %v420_v31 = vmul.f32 %v2752_v39, %v2845_v17  ;;  %vm501_vm10 = vcmp.lt.s32.totalorder %v2824_v8, 34 }
  0x44   :  { %vm543_vm11 = vcmp.lt.s32.totalorder %v2824_v8, 33  ;;  %vm585_vm12 = vcmp.lt.s32.totalorder %v2824_v8, 32  ;;  %vm627_vm13 = vcmp.lt.s32.totalorder %v2824_v8, 31  ;;  %vm669_vm14 = vcmp.lt.s32.totalorder %v2824_v8, 30 }
  0x45   :  { %v2700_v36 = vsel %vm126_vm0, %v89_v30, %v116_v33  ;;  %v2704_v37 = vsel %vm126_vm0, %v96_v34, %v123_v35  ;;  %vm711_vm15 = vcmp.lt.s32.totalorder %v2824_v8, 29  ;;  %vm753_vm0 = vcmp.lt.s32.totalorder %v2824_v8, 19 }
  0x46   :  { %203 = vrot.lane.b32.xlu1 %v2700_v36, %s2580_s2  ;;  %159 = vrot.lane.b32.xlu0 %v2700_v36, %s2581_s21  ;;  %v213_v42 = vstv %s2317_s14  ;;  %s2920_s14 = sld [smem:[#allocation3 + $0x3b]] }
  0x47   :  { %v215_v43 = vstv %s2318_s15  ;;  %v171_v45 = vstv %s169_s16  ;;  %v214_v49 = vmul.f32 %v213_v42, %v210_v41  ;;  %s2607_s15 = smov 114   ;;  %s2963_s16 = sld [smem:[#allocation3 + $0xb]] }
  0x48   :  { %v173_v46 = vstv %s2316_s17  ;;  %v216_v50 = vmul.f32 %v215_v43, %v210_v41  ;;  %v2782_v52 = vmul.f32 %v171_v45, %v168_v44  ;;  %s2608_s17 = smov 113  }
  0x49   :  { %v2784_v53 = vmul.f32 %v173_v46, %v168_v44  ;;  %v221_v58 = vrot.slane %v214_v49, %v2773_v48  ;;  %v257_v60 = vstv %s2760_s19  ;;  %v225_v61 = vrot.slane %v214_v49, %v2776_v51  ;;  %s2994_s19 = sld [smem:[#allocation3 + $0x3d]] }
  0x4a   :  { %205 = vrot.lane.b32.xlu1 %v2704_v37, %s2580_s2  ;;  %161 = vrot.lane.b32.xlu0 %v2704_v37, %s2581_s21  ;;  %s2766_s2 = sld [smem:[#allocation3 + $0x3]]  ;;  %s2770_s21 = sld [smem:[#allocation3 + $0x34]]  ;;  %v232_v59 = vrot.slane %v216_v50, %v2773_v48  ;;  %v236_v62 = vrot.slane %v216_v50, %v2776_v51  ;;  %v179_v1 = vrot.slane %v2782_v52, %v2773_v48 }
  0x4b   :  { %v190_v2 = vrot.slane %v2784_v53, %v2773_v48  ;;  %v258_v6 = vmul.f32 %v257_v60, %v252_v54  ;;  %v183_v10 = vrot.slane %v2782_v52, %v2776_v51  ;;  %v194_v14 = vrot.slane %v2784_v53, %v2776_v51 }
  0x4c   :  { %v2828_v9 = vsel %vm131_vm1, %v221_v58, %v232_v59  ;;  %v2840_v13 = vsel %vm131_vm1, %v225_v61, %v236_v62  ;;  %v462_v44 = vmul.f32 %v2858_v27, %v2754_v40 }
  0x4d   :  { %v2849_v18 = vsel %vm131_vm1, %v179_v1, %v190_v2  ;;  %v274_v24 = vrot.slane %v258_v6, %v2773_v48  ;;  %v278_v25 = vrot.slane %v258_v6, %v2776_v51  ;;  %v2882_v50 = vsel %vm131_vm1, %v183_v10, %v194_v14 }
  0x4e   :  { %247 = vrot.lane.b32.xlu1 %v2704_v37, %s2582_s22  ;;  %245 = vrot.lane.b32.xlu0 %v2700_v36, %s2582_s22  ;;  %s2602_s22 = smov 1  }
  0x50   :  { %v297_v5 = vstv %s2766_s2  ;;  %v299_v7 = vstv %s2770_s21  ;;  %s3042_s2 = sld [smem:[#allocation3 + $0xd]]  ;;  %s2610_s21 = smov 111  }
  0x51   :  { %v298_v15 = vmul.f32 %v297_v5, %v294_v63  ;;  %v300_v20 = vmul.f32 %v299_v7, %v294_v63 }
  0x52   :  { %289 = vrot.lane.b32.xlu1 %v2704_v37, %s2583_s23  ;;  %287 = vrot.lane.b32.xlu0 %v2700_v36, %s2583_s23  ;;  %s2780_s23 = sld [smem:[#allocation3 + $0x4]] }
  0x53   :  { %v305_v32 = vrot.slane %v298_v15, %v2773_v48  ;;  %v309_v41 = vrot.slane %v298_v15, %v2776_v51  ;;  %v316_v42 = vrot.slane %v300_v20, %v2773_v48  ;;  %v320_v43 = vrot.slane %v300_v20, %v2776_v51 }
  0x55   :  { %v2910_v1 = vsel %vm131_vm1, %v305_v32, %v316_v42  ;;  %v2914_v2 = vsel %vm131_vm1, %v309_v41, %v320_v43 }
  0x56   :  { %331 = vrot.lane.b32.xlu1 %v2704_v37, %s2584_s24  ;;  %329 = vrot.lane.b32.xlu0 %v2700_v36, %s2584_s24  ;;  %s2790_s24 = sld [smem:[#allocation3 + $0x35]] }
  0x58   :  { %v339_v16 = vstv %s2780_s23  ;;  %s2611_s23 = smov 110  }
  0x59   :  { %v340_v28 = vmul.f32 %v339_v16, %v336_v11 }
  0x5a   :  { %373 = vrot.lane.b32.xlu1 %v2704_v37, %s2585_s25  ;;  %371 = vrot.lane.b32.xlu0 %v2700_v36, %s2585_s25  ;;  %s2798_s25 = sld [smem:[#allocation3 + $0x5]] }
  0x5b   :  { %v347_v58 = vrot.slane %v340_v28, %v2773_v48  ;;  %v351_v60 = vrot.slane %v340_v28, %v2776_v51 }
  0x5c   :  { %v341_v22 = vstv %s2790_s24  ;;  %s3096_s24 = sld [smem:[#allocation3 + $0xe]] }
  0x5d   :  { %v342_v33 = vmul.f32 %v341_v22, %v336_v11 }
  0x5e   :  { %415 = vrot.lane.b32.xlu1 %v2704_v37, %s2586_s26  ;;  %413 = vrot.lane.b32.xlu0 %v2700_v36, %s2586_s26  ;;  %s2800_s26 = sld [smem:[#allocation3 + $0x36]] }
  0x5f   :  { %v358_v59 = vrot.slane %v342_v33, %v2773_v48  ;;  %v362_v61 = vrot.slane %v342_v33, %v2776_v51 }
  0x60   :  { %v381_v29 = vstv %s2798_s25  ;;  %s3098_s25 = sld [smem:[#allocation3 + $0x3f]] }
  0x61   :  { %v382_v39 = vmul.f32 %v381_v29, %v378_v26  ;;  %v2931_v14 = vsel %vm131_vm1, %v347_v58, %v358_v59  ;;  %v593_v59 = vstv %s2920_s14  ;;  %s3302_s14 = sld [smem:[#allocation3 + $0x44]] }
  0x62   :  { %457 = vrot.lane.b32.xlu1 %v2704_v37, %s2587_s27  ;;  %455 = vrot.lane.b32.xlu0 %v2700_v36, %s2587_s27  ;;  %s2603_s27 = smov 127  }
  0x63   :  { %v393_v6 = vrot.slane %v382_v39, %v2776_v51 }
  0x64   :  { %v383_v30 = vstv %s2800_s26  ;;  %s2612_s26 = smov 109  }
  0x65   :  { %v384_v45 = vmul.f32 %v383_v30, %v378_v26  ;;  %v546_v30 = vmul.f32 %v2858_v27, %v2768_v47 }
  0x66   :  { %499 = vrot.lane.b32.xlu1 %v2704_v37, %s2588_s28  ;;  %497 = vrot.lane.b32.xlu0 %v2700_v36, %s2588_s28  ;;  %s2809_s28 = sld [smem:[#allocation3 + $0x6]] }
  0x67   :  { %v400_v5 = vrot.slane %v384_v45, %v2773_v48  ;;  %v404_v7 = vrot.slane %v384_v45, %v2776_v51  ;;  %v588_v45 = vmul.f32 %v2858_v27, %v2788_v55 }
  0x6a   :  { %541 = vrot.lane.b32.xlu1 %v2704_v37, %s2589_s29  ;;  %539 = vrot.lane.b32.xlu0 %v2700_v36, %s2589_s29  ;;  %s2811_s29 = sld [smem:[#allocation3 + $0x37]] }
  0x6c   :  { %v423_v34 = vstv %s2809_s28  ;;  %s3148_s28 = sld [smem:[#allocation3 + $0x40]] }
  0x6d   :  { %v424_v53 = vmul.f32 %v423_v34, %v420_v31 }
  0x6e   :  { %583 = vrot.lane.b32.xlu1 %v2704_v37, %s2590_s30  ;;  %581 = vrot.lane.b32.xlu0 %v2700_v36, %s2590_s30  ;;  %s2819_s30 = sld [smem:[#allocation3 + $0x7]] }
  0x6f   :  { %v431_v10 = vrot.slane %v424_v53, %v2773_v48  ;;  %v435_v15 = vrot.slane %v424_v53, %v2776_v51 }
  0x70   :  { %v425_v35 = vstv %s2811_s29  ;;  %s3150_s29 = sld [smem:[#allocation3 + $0x10]] }
  0x72   :  { %625 = vrot.lane.b32.xlu1 %v2704_v37, %s2591_s0  ;;  %623 = vrot.lane.b32.xlu0 %v2700_v36, %s2591_s0  ;;  %s2821_s0 = sld [smem:[#allocation3 + $0x38]] }
  0x74   :  { %v465_v46 = vstv %s2819_s30  ;;  %s2613_s30 = smov 99  }
  0x75   :  { %v2904_v62 = vmul.f32 %v465_v46, %v462_v44 }
  0x76   :  { %667 = vrot.lane.b32.xlu1 %v2704_v37, %s2592_s6  ;;  %665 = vrot.lane.b32.xlu0 %v2700_v36, %s2592_s6  ;;  %s2604_s6 = smov 126  }
  0x77   :  { %v473_v20 = vrot.slane %v2904_v62, %v2773_v48  ;;  %v477_v41 = vrot.slane %v2904_v62, %v2776_v51 }
  0x78   :  { %v467_v49 = vstv %s2821_s0  ;;  %s3168_s0 = sld [smem:[#allocation3 + $0x41]] }
  0x79   :  { %v2906_v63 = vmul.f32 %v467_v49, %v462_v44 }
  0x7a   :  { %709 = vrot.lane.b32.xlu1 %v2704_v37, %s2593_s7  ;;  %707 = vrot.lane.b32.xlu0 %v2700_v36, %s2593_s7  ;;  %s2605_s7 = smov 125  }
  0x7b   :  { %v484_v22 = vrot.slane %v2906_v63, %v2773_v48  ;;  %v488_v42 = vrot.slane %v2906_v63, %v2776_v51 }
  0x7d   :  { %v2978_v43 = vsel %vm131_vm1, %v473_v20, %v484_v22  ;;  %v3031_v20 = vmul.f32 %v593_v59, %v588_v45  ;;  %v630_v22 = vmul.f32 %v2858_v27, %v2793_v57 }
  0x7e   :  { %751 = vrot.lane.b32.xlu1 %v2704_v37, %s2594_s8  ;;  %749 = vrot.lane.b32.xlu0 %v2700_v36, %s2594_s8  ;;  %s2876_s8 = sld [smem:[#allocation3 + $0x8]] }
  0x82   :  { %793 = vrot.lane.b32.xlu1 %v2704_v37, %s2595_s9  ;;  %791 = vrot.lane.b32.xlu0 %v2700_v36, %s2595_s9  ;;  %s2878_s9 = sld [smem:[#allocation3 + $0x39]] }
  0x84   :  { %v507_v28 = vstv %s2876_s8  ;;  %s3227_s8 = sld [smem:[#allocation3 + $0x42]] }
  0x86   :  { %835 = vrot.lane.b32.xlu1 %v2704_v37, %s2596_s10  ;;  %833 = vrot.lane.b32.xlu0 %v2700_v36, %s2596_s10  ;;  %s2888_s10 = sld [smem:[#allocation3 + $0x9]] }
  0x88   :  { %v509_v29 = vstv %s2878_s9  ;;  %s2615_s9 = smov 97  }
  0x8a   :  { %877 = vrot.lane.b32.xlu1 %v2704_v37, %s2578_s18  ;;  %875 = vrot.lane.b32.xlu0 %v2700_v36, %s2578_s18  ;;  %s2756_s18 = sld [smem:[#allocation3 + $0x2]] }
  0x8c   :  { %v549_v33 = vstv %s2888_s10  ;;  %s3255_s10 = sld [smem:[#allocation3 + $0x12]] }
  0x8d   :  { %v2986_v53 = vmul.f32 %v549_v33, %v546_v30 }
  0x8e   :  { %919 = vrot.lane.b32.xlu1 %v2704_v37, %s2597_s11  ;;  %917 = vrot.lane.b32.xlu0 %v2700_v36, %s2597_s11  ;;  %s2890_s11 = sld [smem:[#allocation3 + $0x3a]] }
  0x8f   :  { %v561_v33 = vrot.slane %v2986_v53, %v2776_v51 }
  0x90   :  { %v255_v56 = vstv %s2756_s18  ;;  %s2992_s18 = sld [smem:[#allocation3 + $0xc]] }
  0x91   :  { %v256_v4 = vmul.f32 %v255_v56, %v252_v54  ;;  %v426_v54 = vmul.f32 %v425_v35, %v420_v31  ;;  %v2955_v31 = vsel %vm131_vm1, %v393_v6, %v404_v7 }
  0x92   :  { %961 = vrot.lane.b32.xlu1 %v2704_v37, %s2598_s12  ;;  %959 = vrot.lane.b32.xlu0 %v2700_v36, %s2598_s12  ;;  %s2606_s12 = smov 115  }
  0x93   :  { %v263_v19 = vrot.slane %v256_v4, %v2773_v48  ;;  %v267_v23 = vrot.slane %v256_v4, %v2776_v51  ;;  %v389_v4 = vrot.slane %v382_v39, %v2773_v48  ;;  %v442_v11 = vrot.slane %v426_v54, %v2773_v48 }
  0x94   :  { %v446_v16 = vrot.slane %v426_v54, %v2776_v51  ;;  %v551_v34 = vstv %s2890_s11  ;;  %s3257_s11 = sld [smem:[#allocation3 + $0x43]] }
  0x95   :  { %v2886_v52 = vsel %vm131_vm1, %v263_v19, %v274_v24  ;;  %v2898_v56 = vsel %vm131_vm1, %v267_v23, %v278_v25  ;;  %v2937_v19 = vsel %vm131_vm1, %v351_v60, %v362_v61  ;;  %v504_v23 = vmul.f32 %v2858_v27, %v2750_v38 }
  0x96   :  { %1003 = vrot.lane.b32.xlu1 %v2704_v37, %s2599_s13  ;;  %1001 = vrot.lane.b32.xlu0 %v2700_v36, %s2599_s13  ;;  %s2918_s13 = sld [smem:[#allocation3 + $0xa]]  ;;  %v2947_v26 = vsel %vm131_vm1, %v389_v4, %v400_v5  ;;  %v2959_v32 = vsel %vm131_vm1, %v431_v10, %v442_v11  ;;  %v2970_v35 = vsel %vm131_vm1, %v435_v15, %v446_v16 }
  0x97   :  { %v2980_v44 = vmul.f32 %v507_v28, %v504_v23  ;;  %v510_v39 = vmul.f32 %v509_v29, %v504_v23  ;;  %v2988_v54 = vmul.f32 %v551_v34, %v546_v30  ;;  %v633_v28 = vstv %s2963_s16  ;;  %s3339_s16 = sld [smem:[#allocation3 + $0x14]] }
  0x99   :  { %v526_v15 = vrot.slane %v510_v39, %v2773_v48  ;;  %v530_v16 = vrot.slane %v510_v39, %v2776_v51  ;;  %v568_v34 = vrot.slane %v2988_v54, %v2773_v48 }
  0x9a   :  { %1045 = vrot.lane.b32.xlu1 %v2704_v37, %s2600_s1  ;;  %1043 = vrot.lane.b32.xlu0 %v2700_v36, %s2600_s1  ;;  %s2984_s1 = sld [smem:[#allocation3 + $0x3c]] }
  0x9c   :  { %v591_v58 = vstv %s2918_s13  ;;  %s3300_s13 = sld [smem:[#allocation3 + $0x13]] }
  0x9e   :  { %1087 = vrot.lane.b32.xlu1 %v2704_v37, %s2601_s20  ;;  %1085 = vrot.lane.b32.xlu0 %v2700_v36, %s2601_s20  ;;  %s2609_s20 = smov 112  }
  0xa2   :  { %1129 = vrot.lane.b32.xlu1 %v2704_v37, %s2602_s22  ;;  %1127 = vrot.lane.b32.xlu0 %v2700_v36, %s2602_s22  ;;  %s3064_s22 = sld [smem:[#allocation3 + $0x3e]] }
  0xa6   :  { %1206 = vrot.lane.b32.xlu1 %v2704_v37, %s2603_s27  ;;  %1204 = vrot.lane.b32.xlu0 %v2700_v36, %s2603_s27  ;;  %s3137_s27 = sld [smem:[#allocation3 + $0xf]] }
  0xaa   :  { %1248 = vrot.lane.b32.xlu1 %v2704_v37, %s2604_s6  ;;  %1246 = vrot.lane.b32.xlu0 %v2700_v36, %s2604_s6  ;;  %s2614_s6 = smov 98  }
  0xae   :  { %1290 = vrot.lane.b32.xlu1 %v2704_v37, %s2605_s7  ;;  %1288 = vrot.lane.b32.xlu0 %v2700_v36, %s2605_s7  ;;  %s3225_s7 = sld [smem:[#allocation3 + $0x11]] }
  0xb2   :  { %1332 = vrot.lane.b32.xlu1 %v2704_v37, %s2606_s12  ;;  %1330 = vrot.lane.b32.xlu0 %v2700_v36, %s2606_s12  ;;  %s2616_s12 = smov 96  }
  0xb6   :  { %1374 = vrot.lane.b32.xlu1 %v2704_v37, %s2607_s15  ;;  %1372 = vrot.lane.b32.xlu0 %v2700_v36, %s2607_s15  ;;  %s2617_s15 = smov 95  }
  0xb8   :  { %v204_v24 = vpop.permute.xlu1 %203  ;;  %v160_v25 = vpop.permute.xlu0 %159 }
  0xba   :  { %1416 = vrot.lane.b32.xlu1 %v2704_v37, %s2608_s17  ;;  %1414 = vrot.lane.b32.xlu0 %v2700_v36, %s2608_s17  ;;  %s3341_s17 = sld [smem:[#allocation3 + $0x45]] }
  0xbc   :  { %v206_v46 = vpop.permute.xlu1 %205  ;;  %v162_v49 = vpop.permute.xlu0 %161 }
  0xbd   :  { %v208_v60 = vsel %vm207_vm2, %v204_v24, %v206_v46  ;;  %v209_v61 = vsel %vm207_vm2, %v206_v46, %v204_v24  ;;  %v166_v62 = vsel %vm165_vm3, %v160_v25, %v162_v49  ;;  %v167_v63 = vsel %vm165_vm3, %v162_v49, %v160_v25 }
  0xbe   :  { %v3005_v4 = vmul.f32 %v2828_v9, %v209_v61  ;;  %v3008_v5 = vmul.f32 %v2840_v13, %v208_v60  ;;  %v3011_v6 = vmul.f32 %v2849_v18, %v167_v63  ;;  %v3014_v7 = vmul.f32 %v2882_v50, %v166_v62  ;;  %1458 = vrot.lane.b32.xlu1 %v2704_v37, %s2609_s20 }
  0xbf   :  { %1456 = vrot.lane.b32.xlu0 %v2700_v36, %s2609_s20  ;;  %v3021_v9 = vsel %vm131_vm1, %v477_v41, %v488_v42  ;;  %v515_v13 = vrot.slane %v2980_v44, %v2773_v48  ;;  %v519_v18 = vrot.slane %v2980_v44, %v2776_v51  ;;  %v3027_v50 = vmul.f32 %v591_v58, %v588_v45  ;;  %s3411_s20 = sld [smem:[#allocation3 + $0x15]] }
  0xc0   :  { %v248_v10 = vpop.permute.xlu1 %247  ;;  %v246_v11 = vpop.permute.xlu0 %245  ;;  %v557_v25 = vrot.slane %v2986_v53, %v2773_v48  ;;  %v635_v41 = vstv %s2984_s1  ;;  %v672_v42 = vmul.f32 %v2858_v27, %v2834_v12  ;;  %v610_v45 = vrot.slane %v3031_v20, %v2773_v48  ;;  %s2618_s1 = smov 94  }
  0xc1   :  { %v250_v23 = vsel %vm249_vm4, %v246_v11, %v248_v10  ;;  %v251_v24 = vsel %vm249_vm4, %v248_v10, %v246_v11  ;;  %v3068_v46 = vmul.f32 %v633_v28, %v630_v22  ;;  %v675_v49 = vstv %s2992_s18  ;;  %s3390_s18 = sld [smem:[#allocation3 + $0x18]] }
  0xc2   :  { %v3045_v29 = vmul.f32 %v2886_v52, %v251_v24  ;;  %v3048_v30 = vmul.f32 %v2898_v56, %v250_v23  ;;  %1500 = vrot.lane.b32.xlu1 %v2704_v37, %s2610_s21  ;;  %v572_v52 = vrot.slane %v2988_v54, %v2776_v51  ;;  %v599_v56 = vrot.slane %v3027_v50, %v2773_v48 }
  0xc3   :  { %1498 = vrot.lane.b32.xlu0 %v2700_v36, %s2610_s21  ;;  %v677_v53 = vstv %s2994_s19  ;;  %v3078_v59 = vsel %vm131_vm1, %v515_v13, %v526_v15  ;;  %v3082_v60 = vsel %vm131_vm1, %v519_v18, %v530_v16  ;;  %v3094_v63 = vsel %vm131_vm1, %v557_v25, %v568_v34  ;;  %s2619_s19 = smov 93   ;;  %s3423_s21 = sld [smem:[#allocation3 + $0x49]] }
  0xc4   :  { %v290_v44 = vpop.permute.xlu1 %289  ;;  %v288_v39 = vpop.permute.xlu0 %287  ;;  %v636_v13 = vmul.f32 %v635_v41, %v630_v22  ;;  %v676_v18 = vmul.f32 %v675_v49, %v672_v42  ;;  %v678_v10 = vmul.f32 %v677_v53, %v672_v42  ;;  %v614_v16 = vrot.slane %v3031_v20, %v2776_v51 }
  0xc5   :  { %v292_v54 = vsel %vm291_vm5, %v288_v39, %v290_v44  ;;  %v293_v58 = vsel %vm291_vm5, %v290_v44, %v288_v39  ;;  %v3111_v22 = vsel %vm131_vm1, %v599_v56, %v610_v45  ;;  %v641_v23 = vrot.slane %v3068_v46, %v2773_v48  ;;  %v3130_v56 = vld [vmem:[#allocation7 + $0x11] ss:$8 sm:$0x3] }
  0xc6   :  { %v3085_v61 = vmul.f32 %v2910_v1, %v293_v58  ;;  %v3088_v62 = vmul.f32 %v2914_v2, %v292_v54  ;;  %1542 = vrot.lane.b32.xlu1 %v2704_v37, %s2611_s23  ;;  %v3103_v1 = vsel %vm131_vm1, %v561_v33, %v572_v52  ;;  %v603_v2 = vrot.slane %v3027_v50, %v2776_v51 }
  0xc7   :  { %1540 = vrot.lane.b32.xlu0 %v2700_v36, %s2611_s23  ;;  %v714_v24 = vmul.f32 %v2858_v27, %v2845_v17  ;;  %v645_v20 = vrot.slane %v3068_v46, %v2776_v51  ;;  %v717_v28 = vstv %s3042_s2  ;;  %v652_v27 = vrot.slane %v636_v13, %v2773_v48  ;;  %s3413_s2 = sld [smem:[#allocation3 + $0x46]] }
  0xc8   :  { %v332_v11 = vpop.permute.xlu1 %331  ;;  %v330_v15 = vpop.permute.xlu0 %329  ;;  %v656_v52 = vrot.slane %v636_v13, %v2776_v51  ;;  %v683_v41 = vrot.slane %v676_v18, %v2773_v48  ;;  %v687_v42 = vrot.slane %v676_v18, %v2776_v51  ;;  %v698_v49 = vrot.slane %v678_v10, %v2776_v51  ;;  %s3472_s23 = sld [smem:[#allocation3 + $0x16]] }
  0xc9   :  { %v334_v50 = vsel %vm333_vm6, %v330_v15, %v332_v11  ;;  %v335_v25 = vsel %vm333_vm6, %v332_v11, %v330_v15  ;;  %v3146_v53 = vmul.f32 %v717_v28, %v714_v24  ;;  %v756_v58 = vmul.f32 %v3130_v56, %v2754_v40 }
  0xca   :  { %v367_v33 = vmul.f32 %v2931_v14, %v335_v25  ;;  %v368_v34 = vmul.f32 %v2937_v19, %v334_v50  ;;  %1584 = vrot.lane.b32.xlu1 %v2704_v37, %s2612_s26  ;;  %v694_v14 = vrot.slane %v678_v10, %v2773_v48  ;;  %v719_v19 = vstv %s3064_s22  ;;  %s2620_s22 = smov 83  }
  0xcb   :  { %1582 = vrot.lane.b32.xlu0 %v2700_v36, %s2612_s26  ;;  %v759_v10 = vstv %s3096_s24  ;;  %v761_v11 = vstv %s3098_s25  ;;  %v720_v15 = vmul.f32 %v719_v19, %v714_v24  ;;  %vm795_vm2 = vcmp.lt.s32.totalorder %v2824_v8, 18  ;;  %s2621_s24 = smov 82   ;;  %s3498_s25 = sld [smem:[#allocation3 + $0x47]] }
  0xcc   :  { %v3140_v44 = vadd.f32 %v367_v33, %v3011_v6  ;;  %v3143_v39 = vadd.f32 %v368_v34, %v3014_v7  ;;  %v374_v45 = vpop.permute.xlu1 %373  ;;  %v372_v46 = vpop.permute.xlu0 %371  ;;  %v3158_v7 = vsel %vm131_vm1, %v603_v2, %v614_v16  ;;  %v3173_v2 = vsel %vm131_vm1, %v641_v23, %v652_v27  ;;  %s2622_s26 = smov 81  }
  0xcd   :  { %v376_v54 = vsel %vm375_vm7, %v372_v46, %v374_v45  ;;  %v377_v6 = vsel %vm375_vm7, %v374_v45, %v372_v46  ;;  %v3191_v23 = vsel %vm131_vm1, %v687_v42, %v698_v49  ;;  %v3199_v24 = vmul.f32 %v759_v10, %v756_v58 }
  0xce   :  { %v409_v13 = vmul.f32 %v2947_v26, %v377_v6  ;;  %v410_v18 = vmul.f32 %v2955_v31, %v376_v54  ;;  %1626 = vrot.lane.b32.xlu1 %v2704_v37, %s2613_s30  ;;  %v3177_v26 = vsel %vm131_vm1, %v645_v20, %v656_v52  ;;  %v3181_v31 = vsel %vm131_vm1, %v683_v41, %v694_v14 }
  0xcf   :  { %1624 = vrot.lane.b32.xlu0 %v2700_v36, %s2613_s30  ;;  %v725_v20 = vrot.slane %v3146_v53, %v2773_v48  ;;  %v729_v52 = vrot.slane %v3146_v53, %v2776_v51  ;;  %v798_v41 = vmul.f32 %v3130_v56, %v2750_v38  ;;  %v736_v42 = vrot.slane %v720_v15, %v2773_v48  ;;  %s3555_s30 = sld [smem:[#allocation3 + $0x19]] }
  0xd0   :  { %v3184_v16 = vadd.f32 %v409_v13, %v3005_v4  ;;  %v3187_v50 = vadd.f32 %v410_v18, %v3008_v5  ;;  %v416_v25 = vpop.permute.xlu1 %415  ;;  %v414_v28 = vpop.permute.xlu0 %413  ;;  %v3201_v5 = vmul.f32 %v761_v11, %v756_v58  ;;  %v801_v14 = vstv %s3137_s27  ;;  %s3519_s27 = sld [smem:[#allocation3 + $0x17]] }
  0xd1   :  { %v418_v33 = vsel %vm417_vm8, %v414_v28, %v416_v25  ;;  %v419_v4 = vsel %vm417_vm8, %v416_v25, %v414_v28  ;;  %v803_v53 = vstv %s3148_s28  ;;  %v843_v54 = vstv %s3150_s29  ;;  %s3538_s28 = sld [smem:[#allocation3 + $0x48]]  ;;  %s2623_s29 = smov 80  }
  0xd2   :  { %v451_v34 = vmul.f32 %v2959_v32, %v419_v4  ;;  %v452_v27 = vmul.f32 %v2970_v35, %v418_v33  ;;  %1668 = vrot.lane.b32.xlu1 %v2704_v37, %s2614_s6  ;;  %v740_v32 = vrot.slane %v720_v15, %v2776_v51  ;;  %v840_v35 = vmul.f32 %v3130_v56, %v2768_v47 }
  0xd3   :  { %1666 = vrot.lane.b32.xlu0 %v2700_v36, %s2614_s6  ;;  %v3241_v18 = vmul.f32 %v801_v14, %v798_v41  ;;  %v845_v10 = vstv %s3168_s0  ;;  %v3247_v11 = vsel %vm131_vm1, %v725_v20, %v736_v42  ;;  %v771_v4 = vrot.slane %v3199_v24, %v2776_v51  ;;  %s3560_s0 = sld [smem:[#allocation3 + $0x4a]]  ;;  %s2624_s6 = smov 79  }
  0xd4   :  { %v3218_v19 = vadd.f32 %v451_v34, %v3045_v29  ;;  %v3221_v45 = vadd.f32 %v452_v27, %v3048_v30  ;;  %v458_v46 = vpop.permute.xlu1 %457  ;;  %v456_v49 = vpop.permute.xlu0 %455  ;;  %v767_v29 = vrot.slane %v3199_v24, %v2773_v48  ;;  %v778_v30 = vrot.slane %v3201_v5, %v2773_v48 }
  0xd5   :  { %v460_v6 = vsel %vm459_vm9, %v456_v49, %v458_v46  ;;  %v461_v47 = vsel %vm459_vm9, %v458_v46, %v456_v49  ;;  %v3251_v15 = vsel %vm131_vm1, %v729_v52, %v740_v32  ;;  %v782_v34 = vrot.slane %v3201_v5, %v2776_v51 }
  0xd6   :  { %v493_v58 = vmul.f32 %v2978_v43, %v461_v47  ;;  %v494_v13 = vmul.f32 %v3021_v9, %v460_v6  ;;  %1710 = vrot.lane.b32.xlu1 %v2704_v37, %s2615_s9  ;;  %v804_v43 = vmul.f32 %v803_v53, %v798_v41  ;;  %v3253_v9 = vmul.f32 %v843_v54, %v840_v35 }
  0xd7   :  { %1708 = vrot.lane.b32.xlu0 %v2700_v36, %s2615_s9  ;;  %v809_v24 = vrot.slane %v3241_v18, %v2773_v48  ;;  %v813_v5 = vrot.slane %v3241_v18, %v2776_v51  ;;  %v882_v14 = vmul.f32 %v3130_v56, %v2788_v55  ;;  %v885_v54 = vstv %s3225_s7  ;;  %s3601_s7 = sld [smem:[#allocation3 + $0x1a]]  ;;  %s2625_s9 = smov 78  }
  0xd8   :  { %v3260_v25 = vadd.f32 %v493_v58, %v3085_v61  ;;  %v3263_v28 = vadd.f32 %v494_v13, %v3088_v62  ;;  %v500_v33 = vpop.permute.xlu1 %499  ;;  %v498_v20 = vpop.permute.xlu0 %497  ;;  %v3275_v61 = vsel %vm131_vm1, %v767_v29, %v778_v30  ;;  %v846_v62 = vmul.f32 %v845_v10, %v840_v35 }
  0xd9   :  { %v502_v27 = vsel %vm501_vm10, %v498_v20, %v500_v33  ;;  %v503_v52 = vsel %vm501_vm10, %v500_v33, %v498_v20  ;;  %v820_v32 = vrot.slane %v804_v43, %v2773_v48  ;;  %v887_v6 = vstv %s3227_s8  ;;  %s3616_s8 = sld [smem:[#allocation3 + $0x4b]] }
  0xda   :  { %v535_v41 = vmul.f32 %v3078_v59, %v503_v52  ;;  %v536_v42 = vmul.f32 %v3082_v60, %v502_v27  ;;  %1752 = vrot.lane.b32.xlu1 %v2704_v37, %s2616_s12  ;;  %v824_v59 = vrot.slane %v804_v43, %v2776_v51  ;;  %v851_v60 = vrot.slane %v3253_v9, %v2773_v48 }
  0xdb   :  { %1750 = vrot.lane.b32.xlu0 %v2700_v36, %s2616_s12  ;;  %v862_v29 = vrot.slane %v846_v62, %v2773_v48  ;;  %v866_v13 = vrot.slane %v846_v62, %v2776_v51  ;;  %v924_v18 = vmul.f32 %v3130_v56, %v2793_v57  ;;  %v3319_v10 = vmul.f32 %v885_v54, %v882_v14  ;;  %s2626_s12 = smov 77  }
  0xdc   :  { %v3293_v35 = vadd.f32 %v535_v41, %v3140_v44  ;;  %v3296_v46 = vadd.f32 %v536_v42, %v3143_v39  ;;  %v542_v49 = vpop.permute.xlu1 %541  ;;  %v540_v53 = vpop.permute.xlu0 %539  ;;  %v855_v39 = vrot.slane %v3253_v9, %v2776_v51  ;;  %v3321_v43 = vmul.f32 %v887_v6, %v882_v14 }
  0xdd   :  { %v544_v47 = vsel %vm543_vm11, %v540_v53, %v542_v49  ;;  %v545_v44 = vsel %vm543_vm11, %v542_v49, %v540_v53  ;;  %v927_v9 = vstv %s3255_s10  ;;  %v3333_v52 = vsel %vm131_vm1, %v771_v4, %v782_v34  ;;  %s3645_s10 = sld [smem:[#allocation3 + $0x1b]] }
  0xde   :  { %v577_v30 = vmul.f32 %v3094_v63, %v545_v44  ;;  %v578_v58 = vmul.f32 %v3103_v1, %v544_v47  ;;  %1794 = vrot.lane.b32.xlu1 %v2704_v37, %s2617_s15  ;;  %v929_v63 = vstv %s3257_s11  ;;  %v3337_v57 = vsel %vm131_vm1, %v809_v24, %v820_v32  ;;  %s3647_s11 = sld [smem:[#allocation3 + $0x4c]] }
  0xdf   :  { %1792 = vrot.lane.b32.xlu0 %v2700_v36, %s2617_s15  ;;  %v3349_v62 = vsel %vm131_vm1, %v813_v5, %v824_v59  ;;  %v3353_v4 = vsel %vm131_vm1, %v851_v60, %v862_v29  ;;  %v3359_v42 = vmul.f32 %v927_v9, %v924_v18  ;;  %v3361_v24 = vmul.f32 %v929_v63, %v924_v18  ;;  %s3733_s15 = sld [smem:[#allocation3 + $0x1d]] }
  0xe0   :  { %v3326_v1 = vadd.f32 %v577_v30, %v3184_v16  ;;  %v3329_v33 = vadd.f32 %v578_v58, %v3187_v50  ;;  %v584_v20 = vpop.permute.xlu1 %583  ;;  %v582_v27 = vpop.permute.xlu0 %581  ;;  %v3366_v5 = vsel %vm131_vm1, %v855_v39, %v866_v13  ;;  %v966_v32 = vmul.f32 %v3130_v56, %v2834_v12 }
  0xe1   :  { %v586_v16 = vsel %vm585_vm12, %v582_v27, %v584_v20  ;;  %v587_v50 = vsel %vm585_vm12, %v584_v20, %v582_v27  ;;  %v969_v53 = vstv %s3300_s13  ;;  %v971_v54 = vstv %s3302_s14  ;;  %s3688_s13 = sld [smem:[#allocation3 + $0x1c]]  ;;  %s3700_s14 = sld [smem:[#allocation3 + $0x4d]] }
  0xe2   :  { %v619_v34 = vmul.f32 %v3111_v22, %v587_v50  ;;  %v620_v41 = vmul.f32 %v3158_v7, %v586_v16  ;;  %1836 = vrot.lane.b32.xlu1 %v2704_v37, %s2618_s1  ;;  %v893_v22 = vrot.slane %v3319_v10, %v2773_v48  ;;  %v904_v7 = vrot.slane %v3321_v43, %v2773_v48 }
  0xe3   :  { %1834 = vrot.lane.b32.xlu0 %v2700_v36, %s2618_s1  ;;  %v897_v44 = vrot.slane %v3319_v10, %v2776_v51  ;;  %v908_v12 = vrot.slane %v3321_v43, %v2776_v51  ;;  %v935_v39 = vrot.slane %v3359_v42, %v2773_v48  ;;  %v946_v29 = vrot.slane %v3361_v24, %v2773_v48  ;;  %s3805_s1 = sld [smem:[#allocation3 + $0x4f]] }
  0xe4   :  { %v3375_v59 = vadd.f32 %v619_v34, %v3218_v19  ;;  %v3378_v60 = vadd.f32 %v620_v41, %v3221_v45  ;;  %v626_v14 = vpop.permute.xlu1 %625  ;;  %v624_v49 = vpop.permute.xlu0 %623  ;;  %v3407_v30 = vmul.f32 %v971_v54, %v966_v32  ;;  %v1008_v58 = vmul.f32 %v3130_v56, %v2845_v17 }
  0xe5   :  { %v628_v6 = vsel %vm627_vm13, %v624_v49, %v626_v14  ;;  %v629_v47 = vsel %vm627_vm13, %v626_v14, %v624_v49  ;;  %v1011_v9 = vstv %s3339_s16  ;;  %v1013_v63 = vstv %s3341_s17  ;;  %s3735_s16 = sld [smem:[#allocation3 + $0x4e]] }
  0xe6   :  { %v661_v19 = vmul.f32 %v3173_v2, %v629_v47  ;;  %v662_v45 = vmul.f32 %v3177_v26, %v628_v6  ;;  %1878 = vrot.lane.b32.xlu1 %v2704_v37, %s2619_s19  ;;  %v3403_v2 = vsel %vm131_vm1, %v893_v22, %v904_v7  ;;  %v3405_v26 = vmul.f32 %v969_v53, %v966_v32  ;;  %s3795_s17 = sld [smem:[#allocation3 + $0x1e]] }
  0xe7   :  { %1876 = vrot.lane.b32.xlu0 %v2700_v36, %s2619_s19  ;;  %v3431_v56 = vsel %vm131_vm1, %v897_v44, %v908_v12  ;;  %v950_v50 = vrot.slane %v3361_v24, %v2776_v51  ;;  %v3445_v34 = vsel %vm131_vm1, %v935_v39, %v946_v29  ;;  %v3452_v41 = vmul.f32 %v1011_v9, %v1008_v58  ;;  %s3826_s19 = sld [smem:[#allocation3 + $0x50]] }
  0xe8   :  { %v3416_v13 = vadd.f32 %v661_v19, %v3260_v25  ;;  %v3419_v18 = vadd.f32 %v662_v45, %v3263_v28  ;;  %v668_v10 = vpop.permute.xlu1 %667  ;;  %v666_v43 = vpop.permute.xlu0 %665  ;;  %v939_v25 = vrot.slane %v3359_v42, %v2776_v51  ;;  %v3435_v28 = vld [vmem:[#allocation7 + $0x12] ss:$8 sm:$0x3]  ;;  %v3454_v42 = vmul.f32 %v1013_v63, %v1008_v58 }
  0xe9   :  { %v670_v20 = vsel %vm669_vm14, %v666_v43, %v668_v10  ;;  %v671_v17 = vsel %vm669_vm14, %v668_v10, %v666_v43  ;;  %v988_v14 = vrot.slane %v3407_v30, %v2773_v48  ;;  %v1169_v49 = vmul.f32 %v3435_v28, %v2788_v55 }
  0xea   :  { %v703_v27 = vmul.f32 %v3181_v31, %v671_v17  ;;  %v704_v16 = vmul.f32 %v3191_v23, %v670_v20  ;;  %1920 = vrot.lane.b32.xlu1 %v2704_v37, %s2620_s22  ;;  %v977_v31 = vrot.slane %v3405_v26, %v2773_v48  ;;  %v981_v23 = vrot.slane %v3405_v26, %v2776_v51 }
  0xeb   :  { %1918 = vrot.lane.b32.xlu0 %v2700_v36, %s2620_s22  ;;  %v1172_v54 = vstv %s3390_s18  ;;  %vm837_vm3 = vcmp.lt.s32.totalorder %v2824_v8, 17  ;;  %v3481_v55 = vsel %vm131_vm1, %v939_v25, %v950_v50  ;;  %v1050_v44 = vmul.f32 %v3435_v28, %v2754_v40  ;;  %s3813_s18 = sld [smem:[#allocation3 + $0x1f]]  ;;  %s3887_s22 = sld [smem:[#allocation3 + $0x52]] }
  0xec   :  { %v3457_v22 = vadd.f32 %v703_v27, %v3293_v35  ;;  %v3460_v24 = vadd.f32 %v704_v16, %v3296_v46  ;;  %v710_v7 = vpop.permute.xlu1 %709  ;;  %v708_v32 = vpop.permute.xlu0 %707  ;;  %v992_v46 = vrot.slane %v3407_v30, %v2776_v51  ;;  %v1053_v12 = vstv %s3411_s20  ;;  %s3860_s20 = sld [smem:[#allocation3 + $0x20]] }
  0xed   :  { %v712_v53 = vsel %vm711_vm15, %v708_v32, %v710_v7  ;;  %v713_v35 = vsel %vm711_vm15, %v710_v7, %v708_v32  ;;  %v1055_v19 = vstv %s3413_s2  ;;  %v3500_v40 = vmul.f32 %v1172_v54, %v1169_v49  ;;  %s3868_s2 = sld [smem:[#allocation3 + $0x51]] }
  0xee   :  { %v745_v6 = vmul.f32 %v3247_v11, %v713_v35  ;;  %v746_v47 = vmul.f32 %v3251_v15, %v712_v53  ;;  %1962 = vrot.lane.b32.xlu1 %v2704_v37, %s2621_s24  ;;  %v1019_v11 = vrot.slane %v3452_v41, %v2773_v48  ;;  %v1030_v15 = vrot.slane %v3454_v42, %v2773_v48 }
  0xef   :  { %1960 = vrot.lane.b32.xlu0 %v2700_v36, %s2621_s24  ;;  %v1174_v30 = vstv %s3423_s21  ;;  %vm879_vm4 = vcmp.lt.s32.totalorder %v2824_v8, 16  ;;  %v1054_v63 = vmul.f32 %v1053_v12, %v1050_v44  ;;  %v1056_v20 = vmul.f32 %v1055_v19, %v1050_v44  ;;  %s3873_s21 = sld [smem:[#allocation3 + $0x21]]  ;;  %s3929_s24 = sld [smem:[#allocation3 + $0x53]] }
  0xf0   :  { %v3493_v45 = vadd.f32 %v745_v6, %v3326_v1  ;;  %v3496_v39 = vadd.f32 %v746_v47, %v3329_v33  ;;  %v752_v29 = vpop.permute.xlu1 %751  ;;  %v750_v26 = vpop.permute.xlu0 %749  ;;  %v3509_v1 = vsel %vm131_vm1, %v977_v31, %v988_v14  ;;  %v3513_v33 = vsel %vm131_vm1, %v981_v23, %v992_v46 }
  0xf1   :  { %v754_v58 = vsel %vm753_vm0, %v750_v26, %v752_v29  ;;  %v755_v10 = vsel %vm753_vm0, %v752_v29, %v750_v26  ;;  %v1023_v17 = vrot.slane %v3452_v41, %v2776_v51  ;;  %v1175_v25 = vmul.f32 %v1174_v30, %v1169_v49 }
  0xf2   :  { %v787_v43 = vmul.f32 %v3275_v61, %v755_v10  ;;  %v788_v9 = vmul.f32 %v3333_v52, %v754_v58  ;;  %2004 = vrot.lane.b32.xlu1 %v2704_v37, %s2622_s26  ;;  %v1034_v61 = vrot.slane %v3454_v42, %v2776_v51  ;;  %v3528_v52 = vsel %vm131_vm1, %v1019_v11, %v1030_v15 }
  0xf3   :  { %2002 = vrot.lane.b32.xlu0 %v2700_v36, %s2622_s26  ;;  %v1092_v23 = vmul.f32 %v3435_v28, %v2750_v38  ;;  %v1180_v41 = vrot.slane %v3500_v40, %v2773_v48  ;;  %v1095_v7 = vstv %s3472_s23  ;;  %vm921_vm5 = vcmp.lt.s32.totalorder %v2824_v8, 15  ;;  %s3924_s23 = sld [smem:[#allocation3 + $0x22]]  ;;  %s3944_s26 = sld [smem:[#allocation3 + $0x54]] }
  0xf4   :  { %v3531_v27 = vadd.f32 %v787_v43, %v3375_v59  ;;  %v3534_v16 = vadd.f32 %v788_v9, %v3378_v60  ;;  %v794_v50 = vpop.permute.xlu1 %793  ;;  %v792_v31 = vpop.permute.xlu0 %791  ;;  %v1184_v60 = vrot.slane %v3500_v40, %v2776_v51  ;;  %v1061_v38 = vrot.slane %v1054_v63, %v2773_v48 }
  0xf5   :  { %v796_v42 = vsel %vm795_vm2, %v792_v31, %v794_v50  ;;  %v797_v59 = vsel %vm795_vm2, %v794_v50, %v792_v31  ;;  %v1072_v49 = vrot.slane %v1056_v20, %v2773_v48  ;;  %v1065_v53 = vrot.slane %v1054_v63, %v2776_v51  ;;  %v3622_v31 = vld [vmem:[#allocation7 + $0x4] ss:$8 sm:$0x3] }
  0xf6   :  { %v829_v32 = vmul.f32 %v3337_v57, %v797_v59  ;;  %v830_v14 = vmul.f32 %v3349_v62, %v796_v42  ;;  %2046 = vrot.lane.b32.xlu1 %v2704_v37, %s2623_s29  ;;  %v1076_v57 = vrot.slane %v1056_v20, %v2776_v51  ;;  %v1191_v62 = vrot.slane %v1175_v25, %v2773_v48 }
  0xf7   :  { %2044 = vrot.lane.b32.xlu0 %v2700_v36, %s2623_s29  ;;  %v1195_v35 = vrot.slane %v1175_v25, %v2776_v51  ;;  %v3570_v44 = vmul.f32 %v1095_v7, %v1092_v23  ;;  %v1097_v11 = vstv %s3498_s25  ;;  %v3579_v19 = vsel %vm131_vm1, %v1023_v17, %v1034_v61  ;;  %s3936_s25 = sld [smem:[#allocation3 + $0x23]]  ;;  %s4000_s29 = sld [smem:[#allocation3 + $0x25]] }
  0xf8   :  { %v3565_v46 = vadd.f32 %v829_v32, %v3416_v13  ;;  %v3568_v54 = vadd.f32 %v830_v14, %v3419_v18  ;;  %v836_v6 = vpop.permute.xlu1 %835  ;;  %v834_v47 = vpop.permute.xlu0 %833  ;;  %v3581_v13 = vld [vmem:[#allocation7 + $0x2] ss:$8 sm:$0x3]  ;;  %vm963_vm6 = vcmp.lt.s32.totalorder %v2824_v8, 14  ;;  %v3591_v40 = vsel %vm131_vm1, %v1061_v38, %v1072_v49 }
  0xf9   :  { %v838_v15 = vsel %vm837_vm3, %v834_v47, %v836_v6  ;;  %v839_v12 = vsel %vm837_vm3, %v836_v6, %v834_v47  ;;  %v1134_v18 = vmul.f32 %v3581_v13, %v3435_v28  ;;  %v1137_v30 = vstv %s3519_s27  ;;  %s3972_s27 = sld [smem:[#allocation3 + $0x24]] }
  0xfa   :  { %v871_v29 = vmul.f32 %v3353_v4, %v839_v12  ;;  %v872_v26 = vmul.f32 %v3366_v5, %v838_v15  ;;  %2088 = vrot.lane.b32.xlu1 %v2704_v37, %s2624_s6  ;;  %v3597_v58 = vsel %vm131_vm1, %v1065_v53, %v1076_v57  ;;  %v3599_v4 = vmul.f32 %v1097_v11, %v1092_v23  ;;  %v3668_v11 = vld [vmem:[#allocation7 + $0x5] ss:$8 sm:$0x3] }
  0xfb   :  { %2086 = vrot.lane.b32.xlu0 %v2700_v36, %s2624_s6  ;;  %v1198_v5 = vsel %vm131_vm1, %v1180_v41, %v1191_v62  ;;  %v1199_v10 = vsel %vm131_vm1, %v1184_v60, %v1195_v35  ;;  %v1103_v17 = vrot.slane %v3570_v44, %v2773_v48  ;;  %v1139_v61 = vstv %s3538_s28  ;;  %s3974_s28 = sld [smem:[#allocation3 + $0x55]]  ;;  %s4037_s6 = sld [smem:[#allocation3 + $0x57]] }
  0xfc   :  { %v3608_v43 = vadd.f32 %v871_v29, %v3457_v22  ;;  %v3611_v9 = vadd.f32 %v872_v26, %v3460_v24  ;;  %v878_v63 = vpop.permute.xlu1 %877  ;;  %v876_v20 = vpop.permute.xlu0 %875  ;;  %v1138_v50 = vmul.f32 %v1137_v30, %v1134_v18  ;;  %v1211_v24 = vmul.f32 %v3622_v31, %v3435_v28 }
  0xfd   :  { %v880_v25 = vsel %vm879_vm4, %v876_v20, %v878_v63  ;;  %v881_v22 = vsel %vm879_vm4, %v878_v63, %v876_v20  ;;  %vm1005_vm7 = vcmp.lt.s32.totalorder %v2824_v8, 13  ;;  %v1107_v42 = vrot.slane %v3570_v44, %v2776_v51 }
  0xfe   :  { %v913_v23 = vmul.f32 %v3403_v2, %v881_v22  ;;  %v914_v41 = vmul.f32 %v3431_v56, %v880_v25  ;;  %2130 = vrot.lane.b32.xlu1 %v2704_v37, %s2625_s9  ;;  %v1214_v59 = vstv %s3555_s30  ;;  %v1114_v7 = vrot.slane %v3599_v4, %v2773_v48  ;;  %s4004_s30 = sld [smem:[#allocation3 + $0x56]] }
  0xff   :  { %2128 = vrot.lane.b32.xlu0 %v2700_v36, %s2625_s9  ;;  %v1118_v60 = vrot.slane %v3599_v4, %v2776_v51  ;;  %v1140_v2 = vmul.f32 %v1139_v61, %v1134_v18  ;;  %v1216_v32 = vstv %s3560_s0  ;;  %v3650_v53 = vmul.f32 %v1198_v5, %v2700_v36  ;;  %s4032_s0 = sld [smem:[#allocation3 + $0x26]]  ;;  %s4094_s9 = sld [smem:[#allocation3 + $0x28]] }
 0x100   :  { %v3640_v56 = vadd.f32 %v913_v23, %v3493_v45  ;;  %v3643_v14 = vadd.f32 %v914_v41, %v3496_v39  ;;  %v920_v38 = vpop.permute.xlu1 %919  ;;  %v918_v49 = vpop.permute.xlu0 %917  ;;  %v3653_v57 = vmul.f32 %v1199_v10, %v2704_v37  ;;  %v1145_v39 = vrot.slane %v1138_v50, %v2773_v48 }
 0x101   :  { %v922_v62 = vsel %vm921_vm5, %v918_v49, %v920_v38  ;;  %v923_v45 = vsel %vm921_vm5, %v920_v38, %v918_v49  ;;  %v3660_v35 = vmul.f32 %v1214_v59, %v1211_v24  ;;  %vm1047_vm8 = vcmp.lt.s32.totalorder %v2824_v8, 3 }
 0x102   :  { %v955_v6 = vmul.f32 %v3445_v34, %v923_v45  ;;  %v956_v47 = vmul.f32 %v3481_v55, %v922_v62  ;;  %2172 = vrot.lane.b32.xlu1 %v2704_v37, %s2626_s12  ;;  %v3666_v44 = vmul.f32 %v1216_v32, %v1211_v24  ;;  %v1253_v15 = vmul.f32 %v3668_v11, %v3435_v28  ;;  %v3723_v24 = vld [vmem:[#allocation7 + $0x13] ss:$8 sm:$0x3] }
 0x103   :  { %2170 = vrot.lane.b32.xlu0 %v2700_v36, %s2626_s12  ;;  %v1149_v12 = vrot.slane %v1138_v50, %v2776_v51  ;;  %v1156_v34 = vrot.slane %v1140_v2, %v2773_v48  ;;  %v1160_v55 = vrot.slane %v1140_v2, %v2776_v51  ;;  %v1256_v18 = vstv %s3601_s7  ;;  %s4047_s7 = sld [smem:[#allocation3 + $0x27]]  ;;  %s4129_s12 = sld [smem:[#allocation3 + $0x5a]] }
 0x104   :  { %v3678_v37 = vadd.f32 %v955_v6, %v3531_v27  ;;  %v3681_v29 = vadd.f32 %v956_v47, %v3534_v16  ;;  %v962_v26 = vpop.permute.xlu1 %961  ;;  %v960_v30 = vpop.permute.xlu0 %959  ;;  %v3685_v4 = vsel %vm131_vm1, %v1103_v17, %v1114_v7  ;;  %v1258_v36 = vstv %s3616_s8  ;;  %s4056_s8 = sld [smem:[#allocation3 + $0x58]] }
 0x105   :  { %v964_v5 = vsel %vm963_vm6, %v960_v30, %v962_v26  ;;  %v965_v10 = vsel %vm963_vm6, %v962_v26, %v960_v30  ;;  %v3696_v27 = vsel %vm131_vm1, %v1107_v42, %v1118_v60  ;;  %v1222_v16 = vrot.slane %v3660_v35, %v2773_v48 }
 0x106   :  { %v997_v63 = vmul.f32 %v3509_v1, %v965_v10  ;;  %v998_v20 = vmul.f32 %v3513_v33, %v964_v5  ;;  %vm1089_vm9 = vcmp.lt.s32.totalorder %v2824_v8, 2  ;;  %v1233_v17 = vrot.slane %v3666_v44, %v2773_v48  ;;  %v3719_v1 = vld [vmem:[#allocation7 + $0x6] ss:$8 sm:$0x3] }
 0x107   :  { %v3707_v61 = vmul.f32 %v1256_v18, %v1253_v15  ;;  %v3711_v25 = vsel %vm131_vm1, %v1145_v39, %v1156_v34  ;;  %v3715_v22 = vsel %vm131_vm1, %v1149_v12, %v1160_v55  ;;  %v3717_v50 = vmul.f32 %v1258_v36, %v1253_v15 }
 0x108   :  { %v1295_v33 = vmul.f32 %v3719_v1, %v3435_v28  ;;  %v3726_v23 = vadd.f32 %v997_v63, %v3565_v46  ;;  %v3729_v41 = vadd.f32 %v998_v20, %v3568_v54  ;;  %v1004_v42 = vpop.permute.xlu1 %1003  ;;  %v1002_v59 = vpop.permute.xlu0 %1001  ;;  %v1298_v7 = vstv %s3645_s10  ;;  %s4105_s10 = sld [smem:[#allocation3 + $0x59]] }
 0x109   :  { %v1300_v60 = vstv %s3647_s11  ;;  %v1006_v2 = vsel %vm1005_vm7, %v1002_v59, %v1004_v42  ;;  %v1007_v28 = vsel %vm1005_vm7, %v1004_v42, %v1002_v59  ;;  %v1226_v46 = vrot.slane %v3660_v35, %v2776_v51  ;;  %s4113_s11 = sld [smem:[#allocation3 + $0x29]] }
 0x10a   :  { %v1237_v54 = vrot.slane %v3666_v44, %v2776_v51  ;;  %v1039_v32 = vmul.f32 %v3528_v52, %v1007_v28  ;;  %v1040_v38 = vmul.f32 %v3579_v19, %v1006_v2  ;;  %vm1131_vm10 = vcmp.lt.s32.totalorder %v2824_v8, 1  ;;  %v3760_v52 = vld [vmem:[#allocation7] ss:$8 sm:$0x3] }
 0x10b   :  { %v3750_v49 = vsel %vm131_vm1, %v1222_v16, %v1233_v17  ;;  %v1264_v62 = vrot.slane %v3707_v61, %v2773_v48  ;;  %v1268_v45 = vrot.slane %v3707_v61, %v2776_v51  ;;  %v3756_v39 = vmul.f32 %v1298_v7, %v1295_v33 }
 0x10c   :  { %v3758_v35 = vmul.f32 %v1300_v60, %v1295_v33  ;;  %v1337_v19 = vmul.f32 %v3760_v52, %v3723_v24  ;;  %v1041_v6 = vadd.f32 %v1039_v32, %v3608_v43  ;;  %v1042_v47 = vadd.f32 %v1040_v38, %v3611_v9  ;;  %v1046_v44 = vpop.permute.xlu1 %1045  ;;  %v1044_v15 = vpop.permute.xlu0 %1043 }
 0x10d   :  { %v1275_v12 = vrot.slane %v3717_v50, %v2773_v48  ;;  %v1340_v34 = vstv %s3688_s13  ;;  %v1048_v55 = vsel %vm1047_vm8, %v1044_v15, %v1046_v44  ;;  %v1049_v18 = vsel %vm1047_vm8, %v1046_v44, %v1044_v15  ;;  %s4153_s13 = sld [smem:[#allocation3 + $0x2a]] }
 0x10e   :  { %v1279_v26 = vrot.slane %v3717_v50, %v2776_v51  ;;  %v1342_v30 = vstv %s3700_s14  ;;  %v1081_v43 = vmul.f32 %v3591_v40, %v1049_v18  ;;  %v1082_v9 = vmul.f32 %v3597_v58, %v1048_v55  ;;  %v3791_v40 = vld [vmem:[#allocation7 + $0x1] ss:$8 sm:$0x3]  ;;  %s4162_s14 = sld [smem:[#allocation3 + $0x5b]] }
 0x10f   :  { %vm1208_vm11 = vcmp.lt.s32.totalorder %v2824_v8, 127  ;;  %v3780_v36 = vadd.f32 %v3650_v53, %v1041_v6  ;;  %v3783_v5 = vadd.f32 %v3653_v57, %v1042_v47  ;;  %v1306_v10 = vrot.slane %v3756_v39, %v2773_v48 }
 0x110   :  { %v1317_v16 = vrot.slane %v3758_v35, %v2773_v48  ;;  %v3789_v63 = vmul.f32 %v1340_v34, %v1337_v19  ;;  %v1379_v58 = vmul.f32 %v3791_v40, %v3723_v24  ;;  %v3798_v53 = vadd.f32 %v1081_v43, %v3640_v56  ;;  %v1088_v20 = vpop.permute.xlu1 %1087  ;;  %v1086_v17 = vpop.permute.xlu0 %1085 }
 0x111   :  { %v3801_v57 = vadd.f32 %v1082_v9, %v3643_v14  ;;  %v1382_v61 = vstv %s3733_s15  ;;  %v1384_v50 = vstv %s3735_s16  ;;  %v1090_v33 = vsel %vm1089_vm9, %v1086_v17, %v1088_v20  ;;  %v3856_v9 = vld [vmem:[#allocation7 + $0x3] ss:$8 sm:$0x3]  ;;  %s4170_s15 = sld [smem:[#allocation3 + $0x2b]]  ;;  %s4183_s16 = sld [smem:[#allocation3 + $0x5c]] }
 0x112   :  { %v1091_v42 = vsel %vm1089_vm9, %v1088_v20, %v1086_v17  ;;  %v1241_v59 = vsel %vm131_vm1, %v1226_v46, %v1237_v54  ;;  %v1343_v56 = vmul.f32 %v1342_v30, %v1337_v19  ;;  %v1124_v7 = vmul.f32 %v3696_v27, %v1090_v33 }
 0x113   :  { %v1123_v14 = vmul.f32 %v3685_v4, %v1091_v42  ;;  %vm1250_vm12 = vcmp.lt.s32.totalorder %v2824_v8, 126  ;;  %v1282_v60 = vsel %vm131_vm1, %v1264_v62, %v1275_v12  ;;  %v1283_v2 = vsel %vm131_vm1, %v1268_v45, %v1279_v26 }
 0x114   :  { %v1310_v28 = vrot.slane %v3756_v39, %v2776_v51  ;;  %v1321_v46 = vrot.slane %v3758_v35, %v2776_v51  ;;  %v1383_v54 = vmul.f32 %v1382_v61, %v1379_v58  ;;  %v1385_v32 = vmul.f32 %v1384_v50, %v1379_v58  ;;  %v1130_v38 = vpop.permute.xlu1 %1129  ;;  %v1128_v62 = vpop.permute.xlu0 %1127 }
 0x115   :  { %v1125_v4 = vadd.f32 %v1123_v14, %v3678_v37  ;;  %v1126_v27 = vadd.f32 %v1124_v7, %v3681_v29  ;;  %v3832_v45 = vsel %vm131_vm1, %v1306_v10, %v1317_v16  ;;  %v1348_v39 = vrot.slane %v3789_v63, %v2773_v48 }
 0x116   :  { %v1132_v35 = vsel %vm1131_vm10, %v1128_v62, %v1130_v38  ;;  %v1133_v19 = vsel %vm1131_vm10, %v1130_v38, %v1128_v62  ;;  %v1352_v37 = vrot.slane %v3789_v63, %v2776_v51  ;;  %v1359_v29 = vrot.slane %v1343_v56, %v2773_v48 }
 0x117   :  { %v1165_v6 = vmul.f32 %v3711_v25, %v1133_v19  ;;  %v1166_v47 = vmul.f32 %v3715_v22, %v1132_v35  ;;  %vm1292_vm13 = vcmp.lt.s32.totalorder %v2824_v8, 125  ;;  %v1363_v44 = vrot.slane %v1343_v56, %v2776_v51 }
 0x118   :  { %v1421_v15 = vmul.f32 %v3581_v13, %v3723_v24  ;;  %v1390_v12 = vrot.slane %v1383_v54, %v2773_v48  ;;  %v1394_v34 = vrot.slane %v1383_v54, %v2776_v51  ;;  %v1401_v55 = vrot.slane %v1385_v32, %v2773_v48  ;;  %v1207_v22 = vpop.permute.xlu1 %1206  ;;  %v1205_v30 = vpop.permute.xlu0 %1204 }
 0x119   :  { %v1424_v18 = vstv %s3795_s17  ;;  %v1167_v26 = vadd.f32 %v1165_v6, %v3726_v23  ;;  %v1168_v25 = vadd.f32 %v1166_v47, %v3729_v41  ;;  %v1426_v43 = vstv %s3805_s1  ;;  %s4217_s17 = sld [smem:[#allocation3 + $0x2c]]  ;;  %s4222_s1 = sld [smem:[#allocation3 + $0x5d]] }
 0x11a   :  { %v1463_v10 = vmul.f32 %v3856_v9, %v3723_v24  ;;  %v1209_v16 = vsel %vm1208_vm11, %v1205_v30, %v1207_v22  ;;  %v1210_v63 = vsel %vm1208_vm11, %v1207_v22, %v1205_v30  ;;  %v1405_v23 = vrot.slane %v1385_v32, %v2776_v51 }
 0x11b   :  { %v1466_v41 = vstv %s3813_s18  ;;  %v1242_v58 = vmul.f32 %v3750_v49, %v1209_v16  ;;  %v1243_v20 = vmul.f32 %v1241_v59, %v1210_v63  ;;  %v1325_v17 = vsel %vm131_vm1, %v1310_v28, %v1321_v46  ;;  %s4231_s18 = sld [smem:[#allocation3 + $0x2d]] }
 0x11c   :  { %v1425_v61 = vmul.f32 %v1424_v18, %v1421_v15  ;;  %vm1334_vm14 = vcmp.lt.s32.totalorder %v2824_v8, 115  ;;  %v1366_v50 = vsel %vm131_vm1, %v1348_v39, %v1359_v29  ;;  %v1427_v33 = vmul.f32 %v1426_v43, %v1421_v15  ;;  %v1249_v49 = vpop.permute.xlu1 %1248  ;;  %v1247_v59 = vpop.permute.xlu0 %1246 }
 0x11d   :  { %v1468_v42 = vstv %s3826_s19  ;;  %v3880_v56 = vadd.f32 %v1242_v58, %v3798_v53  ;;  %v3883_v14 = vadd.f32 %v1243_v20, %v3801_v57  ;;  %v1367_v7 = vsel %vm131_vm1, %v1352_v37, %v1363_v44  ;;  %s4241_s19 = sld [smem:[#allocation3 + $0x5e]] }
 0x11e   :  { %v1467_v28 = vmul.f32 %v1466_v41, %v1463_v10  ;;  %v1251_v46 = vsel %vm1250_vm12, %v1247_v59, %v1249_v49  ;;  %v1252_v54 = vsel %vm1250_vm12, %v1249_v49, %v1247_v59  ;;  %v3895_v53 = vsel %vm131_vm1, %v1390_v12, %v1401_v55 }
 0x11f   :  { %v3899_v57 = vsel %vm131_vm1, %v1394_v34, %v1405_v23  ;;  %v1284_v32 = vmul.f32 %v1282_v60, %v1251_v46  ;;  %v1285_v38 = vmul.f32 %v1283_v2, %v1252_v54  ;;  %vm1376_vm15 = vcmp.lt.s32.totalorder %v2824_v8, 114 }
 0x120   :  { %v1432_v62 = vrot.slane %v1425_v61, %v2773_v48  ;;  %v1469_v39 = vmul.f32 %v1468_v42, %v1463_v10  ;;  %v1436_v35 = vrot.slane %v1425_v61, %v2776_v51  ;;  %v1443_v19 = vrot.slane %v1427_v33, %v2773_v48  ;;  %v1291_v2 = vpop.permute.xlu1 %1290  ;;  %v1289_v47 = vpop.permute.xlu0 %1288 }
 0x121   :  { %v1447_v37 = vrot.slane %v1427_v33, %v2776_v51  ;;  %v1505_v29 = vmul.f32 %v3622_v31, %v3723_v24  ;;  %v3908_v6 = vadd.f32 %v1284_v32, %v1125_v4  ;;  %v3910_v60 = vadd.f32 %v1285_v38, %v1126_v27 }
 0x122   :  { %v1474_v44 = vrot.slane %v1467_v28, %v2773_v48  ;;  %v1508_v15 = vstv %s3860_s20  ;;  %v1293_v12 = vsel %vm1292_vm13, %v1289_v47, %v1291_v2  ;;  %v1294_v34 = vsel %vm1292_vm13, %v1291_v2, %v1289_v47  ;;  %s4272_s20 = sld [smem:[#allocation3 + $0x2e]] }
 0x123   :  { %v1510_v55 = vstv %s3868_s2  ;;  %v1547_v18 = vmul.f32 %v3668_v11, %v3723_v24  ;;  %v1326_v4 = vmul.f32 %v3832_v45, %v1293_v12  ;;  %v1327_v27 = vmul.f32 %v1325_v17, %v1294_v34  ;;  %s4282_s2 = sld [smem:[#allocation3 + $0x5f]] }
 0x124   :  { %v1485_v22 = vrot.slane %v1469_v39, %v2773_v48  ;;  %v1550_v30 = vstv %s3873_s21  ;;  %vm1418_vm0 = vcmp.lt.s32.totalorder %v2824_v8, 113  ;;  %v1478_v43 = vrot.slane %v1467_v28, %v2776_v51  ;;  %v1333_v45 = vpop.permute.xlu1 %1332  ;;  %v1331_v41 = vpop.permute.xlu0 %1330  ;;  %s4291_s21 = sld [smem:[#allocation3 + $0x2f]] }
 0x125   :  { %v1489_v10 = vrot.slane %v1469_v39, %v2776_v51  ;;  %v1509_v16 = vmul.f32 %v1508_v15, %v1505_v29  ;;  %v3931_v63 = vadd.f32 %v1326_v4, %v1167_v26  ;;  %v3933_v23 = vadd.f32 %v1327_v27, %v1168_v25 }
 0x126   :  { %v1511_v58 = vmul.f32 %v1510_v55, %v1505_v29  ;;  %v1552_v20 = vstv %s3887_s22  ;;  %v1335_v17 = vsel %vm1334_vm14, %v1331_v41, %v1333_v45  ;;  %v1336_v61 = vsel %vm1334_vm14, %v1333_v45, %v1331_v41  ;;  %s4298_s22 = sld [smem:[#allocation3 + $0x60]] }
 0x127   :  { %v1450_v33 = vsel %vm131_vm1, %v1432_v62, %v1443_v19  ;;  %v1551_v42 = vmul.f32 %v1550_v30, %v1547_v18  ;;  %v1368_v26 = vmul.f32 %v1366_v50, %v1335_v17  ;;  %v1369_v25 = vmul.f32 %v1367_v7, %v1336_v61  ;;  %v3963_v19 = vld [vmem:[#allocation7 + $0x14] ss:$8 sm:$0x3] }
 0x128   :  { %v1451_v49 = vsel %vm131_vm1, %v1436_v35, %v1447_v37  ;;  %v1492_v59 = vsel %vm131_vm1, %v1474_v44, %v1485_v22  ;;  %vm1460_vm2 = vcmp.lt.s32.totalorder %v2824_v8, 112  ;;  %v1493_v28 = vsel %vm131_vm1, %v1478_v43, %v1489_v10  ;;  %v1375_v7 = vpop.permute.xlu1 %1374  ;;  %v1373_v62 = vpop.permute.xlu0 %1372 }
 0x129   :  { %v1516_v46 = vrot.slane %v1509_v16, %v2773_v48  ;;  %v1520_v54 = vrot.slane %v1509_v16, %v2776_v51  ;;  %v1553_v32 = vmul.f32 %v1552_v20, %v1547_v18  ;;  %v3956_v38 = vadd.f32 %v1368_v26, %v3780_v36 }
 0x12a   :  { %v3959_v50 = vadd.f32 %v1369_v25, %v3783_v5  ;;  %v1527_v39 = vrot.slane %v1511_v58, %v2773_v48  ;;  %v1531_v35 = vrot.slane %v1511_v58, %v2776_v51  ;;  %v1377_v37 = vsel %vm1376_vm15, %v1373_v62, %v1375_v7 }
 0x12b   :  { %v1378_v36 = vsel %vm1376_vm15, %v1375_v7, %v1373_v62  ;;  %v1558_v29 = vrot.slane %v1551_v42, %v2773_v48  ;;  %v1589_v5 = vmul.f32 %v3719_v1, %v3723_v24  ;;  %v1410_v2 = vmul.f32 %v3895_v53, %v1377_v37 }
 0x12c   :  { %v1411_v47 = vmul.f32 %v3899_v57, %v1378_v36  ;;  %v1562_v44 = vrot.slane %v1551_v42, %v2776_v51  ;;  %v1592_v15 = vstv %s3924_s23  ;;  %vm1502_vm3 = vcmp.lt.s32.totalorder %v2824_v8, 111  ;;  %v1417_v57 = vpop.permute.xlu1 %1416  ;;  %v1415_v4 = vpop.permute.xlu0 %1414  ;;  %s4330_s23 = sld [smem:[#allocation3 + $0x30]] }
 0x12d   :  { %v1569_v12 = vrot.slane %v1553_v32, %v2773_v48  ;;  %v1573_v34 = vrot.slane %v1553_v32, %v2776_v51  ;;  %v1594_v24 = vstv %s3929_s24  ;;  %v1631_v55 = vmul.f32 %v3760_v52, %v3963_v19  ;;  %s4332_s24 = sld [smem:[#allocation3 + $0x61]] }
 0x12e   :  { %v3987_v18 = vadd.f32 %v1410_v2, %v3880_v56  ;;  %v3990_v53 = vadd.f32 %v1411_v47, %v3883_v14  ;;  %v1534_v27 = vsel %vm131_vm1, %v1516_v46, %v1527_v39  ;;  %v1634_v22 = vstv %s3936_s25  ;;  %s2627_s25 = smov [#allocation9]  }
 0x12f   :  { %v1419_v30 = vsel %vm1418_vm0, %v1415_v4, %v1417_v57  ;;  %v1420_v43 = vsel %vm1418_vm0, %v1417_v57, %v1415_v4  ;;  %v1593_v10 = vmul.f32 %v1592_v15, %v1589_v5  ;;  %v1636_v16 = vstv %s3944_s26  ;;  %s2303_s26 = sshll.u32 %s2627_s25, 4  ;;  %s2304_s26 = int_to_ptr.vmem [resolvable:$true] %s2303_s26 }
 0x130   :  { %v1452_v56 = vmul.f32 %v1450_v33, %v1419_v30  ;;  %v1453_v45 = vmul.f32 %v1451_v49, %v1420_v43  ;;  %v1535_v14 = vsel %vm131_vm1, %v1520_v54, %v1531_v35  ;;  %v1595_v41 = vmul.f32 %v1594_v24, %v1589_v5  ;;  %v1459_v42 = vpop.permute.xlu1 %1458  ;;  %p2547_p6 = scmp.lt.s32.totalorder %s2304_s26, %s2304_s26 }
 0x131   :  { %vm1544_vm4 = vcmp.lt.s32.totalorder %v2824_v8, 110  ;;  %v1576_v58 = vsel %vm131_vm1, %v1558_v29, %v1569_v12  ;;  %v1577_v20 = vsel %vm131_vm1, %v1562_v44, %v1573_v34  ;;  %v1635_v17 = vmul.f32 %v1634_v22, %v1631_v55  ;;  %v1457_v49 = vpop.permute.xlu0 %1456 }
 0x132   :  { %v4012_v61 = vadd.f32 %v1452_v56, %v3908_v6  ;;  %v4015_v33 = vadd.f32 %v1453_v45, %v3910_v60  ;;  %v1637_v26 = vmul.f32 %v1636_v16, %v1631_v55  ;;  %v1673_v25 = vmul.f32 %v3791_v40, %v3963_v19 }
 0x133   :  { %v1600_v46 = vrot.slane %v1593_v10, %v2773_v48  ;;  %v1604_v54 = vrot.slane %v1593_v10, %v2776_v51  ;;  %v1676_v32 = vstv %s3972_s27  ;;  %v1678_v7 = vstv %s3974_s28  ;;  %s2542_s27 = scalar_lea.vmem %s2304_s26, 256 }
 0x134   :  { %v1461_v62 = vsel %vm1460_vm2, %v1457_v49, %v1459_v42  ;;  %v1462_v6 = vsel %vm1460_vm2, %v1459_v42, %v1457_v49  ;;  %v1611_v60 = vrot.slane %v1595_v41, %v2773_v48  ;;  %v1615_v39 = vrot.slane %v1595_v41, %v2776_v51  ;;  %v1501_v5 = vpop.permute.xlu1 %1500  ;;  %p2543_p5 = scmp.ne.s32.totalorder %s2304_s26, %s2542_s27  ;;  %p2548_p7 = scmp.lt.s32.totalorder %s2542_s27, %s2542_s27 }
 0x135   :  { %v1494_v35 = vmul.f32 %v1492_v59, %v1461_v62  ;;  %v1495_v37 = vmul.f32 %v1493_v28, %v1462_v6  ;;  %vm1586_vm5 = vcmp.lt.s32.totalorder %v2824_v8, 109  ;;  %v1642_v36 = vrot.slane %v1635_v17, %v2773_v48  ;;  %v1499_v12 = vpop.permute.xlu0 %1498 }
 0x136   :  { %v1646_v29 = vrot.slane %v1635_v17, %v2776_v51  ;;  %v1653_v2 = vrot.slane %v1637_v26, %v2773_v48  ;;  %v1677_v47 = vmul.f32 %v1676_v32, %v1673_v25  ;;  %v1679_v44 = vmul.f32 %v1678_v7, %v1673_v25  ;;  %p2549_p8 = por %p2548_p7, %p2547_p6 }
 0x137   :  { %v1715_v15 = vmul.f32 %v3581_v13, %v3963_v19  ;;  %v4040_v59 = vadd.f32 %v1494_v35, %v3931_v63  ;;  %v4043_v28 = vadd.f32 %v1495_v37, %v3933_v23  ;;  %v1657_v34 = vrot.slane %v1637_v26, %v2776_v51 }
 0x138   :  { %v1718_v24 = vstv %s4000_s29  ;;  %v1503_v55 = vsel %vm1502_vm3, %v1499_v12, %v1501_v5  ;;  %v1504_v57 = vsel %vm1502_vm3, %v1501_v5, %v1499_v12  ;;  %v1618_v4 = vsel %vm131_vm1, %v1600_v46, %v1611_v60  ;;  %v1543_v43 = vpop.permute.xlu1 %1542  ;;  %p2550_p9 = pnand %p2549_p8, %p2543_p5 }
 0x139   :  { %v1720_v63 = vstv %s4004_s30  ;;  %v1536_v23 = vmul.f32 %v1534_v27, %v1503_v55  ;;  %v1537_v22 = vmul.f32 %v1535_v14, %v1504_v57  ;;  %v1619_v30 = vsel %vm131_vm1, %v1604_v54, %v1615_v39  ;;  %v1541_v14 = vpop.permute.xlu0 %1540 }
 0x13a   :  { %vm1628_vm6 = vcmp.lt.s32.totalorder %v2824_v8, 99  ;;  %v1660_v10 = vsel %vm131_vm1, %v1642_v36, %v1653_v2  ;;  %v1684_v16 = vrot.slane %v1677_v47, %v2773_v48  ;;  %v1695_v56 = vrot.slane %v1679_v44, %v2773_v48 }
 0x13b   :  { %v4065_v45 = vmul.f32 %v1718_v24, %v1715_v15  ;;  %v4068_v41 = vadd.f32 %v1536_v23, %v3956_v38  ;;  %v4071_v27 = vadd.f32 %v1537_v22, %v3959_v50  ;;  %v1661_v17 = vsel %vm131_vm1, %v1646_v29, %v1657_v34 }
 0x13c   :  { %v4075_v42 = vmul.f32 %v1720_v63, %v1715_v15  ;;  %v1545_v26 = vsel %vm1544_vm4, %v1541_v14, %v1543_v43  ;;  %v1546_v25 = vsel %vm1544_vm4, %v1543_v43, %v1541_v14  ;;  %v1688_v49 = vrot.slane %v1677_v47, %v2776_v51  ;;  %v1585_v7 = vpop.permute.xlu1 %1584 }
 0x13d   :  { %v1757_v38 = vmul.f32 %v3856_v9, %v3963_v19  ;;  %v1578_v50 = vmul.f32 %v1576_v58, %v1545_v26  ;;  %v1579_v46 = vmul.f32 %v1577_v20, %v1546_v25  ;;  %vm1670_vm7 = vcmp.lt.s32.totalorder %v2824_v8, 98  ;;  %v1583_v35 = vpop.permute.xlu0 %1582 }
 0x13e   :  { %v1699_v54 = vrot.slane %v1679_v44, %v2776_v51  ;;  %v1760_v32 = vstv %s4032_s0  ;;  %v1702_v62 = vsel %vm131_vm1, %v1684_v16, %v1695_v56  ;;  %v1726_v6 = vrot.slane %v4065_v45, %v2773_v48 }
 0x13f   :  { %v1762_v60 = vstv %s4037_s6  ;;  %v1799_v39 = vmul.f32 %v3622_v31, %v3963_v19  ;;  %v4097_v58 = vadd.f32 %v1578_v50, %v3987_v18  ;;  %v4100_v20 = vadd.f32 %v1579_v46, %v3990_v53 }
 0x140   :  { %v1737_v37 = vrot.slane %v4075_v42, %v2773_v48  ;;  %v1802_v36 = vstv %s4047_s7  ;;  %v1587_v29 = vsel %vm1586_vm5, %v1583_v35, %v1585_v7  ;;  %v1588_v5 = vsel %vm1586_vm5, %v1585_v7, %v1583_v35  ;;  %v1627_v15 = vpop.permute.xlu1 %1626 }
 0x141   :  { %v1761_v2 = vmul.f32 %v1760_v32, %v1757_v38  ;;  %v1804_v47 = vstv %s4056_s8  ;;  %v1620_v18 = vmul.f32 %v1618_v4, %v1587_v29  ;;  %v1621_v44 = vmul.f32 %v1619_v30, %v1588_v5  ;;  %v1625_v63 = vpop.permute.xlu0 %1624 }
 0x142   :  { %vm1712_vm8 = vcmp.lt.s32.totalorder %v2824_v8, 97  ;;  %v1763_v53 = vmul.f32 %v1762_v60, %v1757_v38  ;;  %v1703_v12 = vsel %vm131_vm1, %v1688_v49, %v1699_v54  ;;  %v1730_v34 = vrot.slane %v4065_v45, %v2776_v51 }
 0x143   :  { %v1741_v24 = vrot.slane %v4075_v42, %v2776_v51  ;;  %v1803_v55 = vmul.f32 %v1802_v36, %v1799_v39  ;;  %v4122_v57 = vadd.f32 %v1620_v18, %v4012_v61  ;;  %v4125_v4 = vadd.f32 %v1621_v44, %v4015_v33  ;;  %v4181_v44 = vld [vmem:[#allocation7 + $0x15] ss:$8 sm:$0x3] }
 0x144   :  { %v1744_v23 = vsel %vm131_vm1, %v1726_v6, %v1737_v37  ;;  %v1805_v22 = vmul.f32 %v1804_v47, %v1799_v39  ;;  %v1629_v30 = vsel %vm1628_vm6, %v1625_v63, %v1627_v15  ;;  %v1630_v43 = vsel %vm1628_vm6, %v1627_v15, %v1625_v63  ;;  %v1669_v42 = vpop.permute.xlu1 %1668 }
 0x145   :  { %v1768_v61 = vrot.slane %v1761_v2, %v2773_v48  ;;  %v1772_v33 = vrot.slane %v1761_v2, %v2776_v51  ;;  %v1662_v16 = vmul.f32 %v1660_v10, %v1629_v30  ;;  %v1663_v56 = vmul.f32 %v1661_v17, %v1630_v43  ;;  %v1667_v17 = vpop.permute.xlu0 %1666 }
 0x146   :  { %vm1754_vm9 = vcmp.lt.s32.totalorder %v2824_v8, 96  ;;  %v1779_v45 = vrot.slane %v1763_v53, %v2773_v48  ;;  %v1841_v14 = vmul.f32 %v3668_v11, %v3963_v19  ;;  %v1783_v26 = vrot.slane %v1763_v53, %v2776_v51 }
 0x147   :  { %v1810_v25 = vrot.slane %v1803_v55, %v2773_v48  ;;  %v1814_v49 = vrot.slane %v1803_v55, %v2776_v51  ;;  %v1844_v38 = vstv %s4094_s9  ;;  %v4146_v50 = vadd.f32 %v1662_v16, %v4040_v59 }
 0x148   :  { %v4149_v10 = vadd.f32 %v1663_v56, %v4043_v28  ;;  %v1821_v46 = vrot.slane %v1805_v22, %v2773_v48  ;;  %v1846_v54 = vstv %s4105_s10  ;;  %v1671_v32 = vsel %vm1670_vm7, %v1667_v17, %v1669_v42  ;;  %v1711_v37 = vpop.permute.xlu1 %1710 }
 0x149   :  { %v1672_v7 = vsel %vm1670_vm7, %v1669_v42, %v1667_v17  ;;  %v1825_v6 = vrot.slane %v1805_v22, %v2776_v51  ;;  %v1883_v59 = vmul.f32 %v3719_v1, %v3963_v19  ;;  %v1704_v28 = vmul.f32 %v1702_v62, %v1671_v32  ;;  %v1709_v2 = vpop.permute.xlu0 %1708 }
 0x14a   :  { %v1705_v60 = vmul.f32 %v1703_v12, %v1672_v7  ;;  %v1845_v39 = vmul.f32 %v1844_v38, %v1841_v14  ;;  %v1886_v35 = vstv %s4113_s11  ;;  %v1745_v36 = vsel %vm131_vm1, %v1730_v34, %v1741_v24 }
 0x14b   :  { %v1786_v29 = vsel %vm131_vm1, %v1768_v61, %v1779_v45  ;;  %vm1796_vm10 = vcmp.lt.s32.totalorder %v2824_v8, 95  ;;  %v1847_v5 = vmul.f32 %v1846_v54, %v1841_v14  ;;  %v4173_v19 = vadd.f32 %v1704_v28, %v4068_v41 }
 0x14c   :  { %v4176_v62 = vadd.f32 %v1705_v60, %v4071_v27  ;;  %v1787_v47 = vsel %vm131_vm1, %v1772_v33, %v1783_v26  ;;  %v1888_v18 = vstv %s4129_s12  ;;  %v1713_v53 = vsel %vm1712_vm8, %v1709_v2, %v1711_v37  ;;  %v1753_v63 = vpop.permute.xlu1 %1752 }
 0x14d   :  { %v1714_v15 = vsel %vm1712_vm8, %v1711_v37, %v1709_v2  ;;  %v1828_v41 = vsel %vm131_vm1, %v1810_v25, %v1821_v46  ;;  %v1887_v27 = vmul.f32 %v1886_v35, %v1883_v59  ;;  %v1746_v12 = vmul.f32 %v1744_v23, %v1713_v53  ;;  %v1751_v16 = vpop.permute.xlu0 %1750 }
 0x14e   :  { %v1747_v34 = vmul.f32 %v1745_v36, %v1714_v15  ;;  %v1829_v24 = vsel %vm131_vm1, %v1814_v49, %v1825_v6  ;;  %vm1838_vm11 = vcmp.lt.s32.totalorder %v2824_v8, 94  ;;  %v1852_v55 = vrot.slane %v1845_v39, %v2773_v48 }
 0x14f   :  { %v1856_v22 = vrot.slane %v1845_v39, %v2776_v51  ;;  %v1863_v30 = vrot.slane %v1847_v5, %v2773_v48  ;;  %v1889_v43 = vmul.f32 %v1888_v18, %v1883_v59  ;;  %v1925_v61 = vmul.f32 %v3760_v52, %v4181_v44 }
 0x150   :  { %v4200_v23 = vadd.f32 %v1746_v12, %v4097_v58  ;;  %v4203_v33 = vadd.f32 %v1747_v34, %v4100_v20  ;;  %v1867_v56 = vrot.slane %v1847_v5, %v2776_v51  ;;  %v1928_v45 = vstv %s4153_s13  ;;  %v1795_v38 = vpop.permute.xlu1 %1794 }
 0x151   :  { %v1755_v14 = vsel %vm1754_vm9, %v1751_v16, %v1753_v63  ;;  %v1756_v42 = vsel %vm1754_vm9, %v1753_v63, %v1751_v16  ;;  %v1894_v26 = vrot.slane %v1887_v27, %v2773_v48  ;;  %v1930_v52 = vstv %s4162_s14  ;;  %v1793_v59 = vpop.permute.xlu0 %1792 }
 0x152   :  { %v1788_v25 = vmul.f32 %v1786_v29, %v1755_v14  ;;  %v1789_v58 = vmul.f32 %v1787_v47, %v1756_v42  ;;  %vm1880_vm12 = vcmp.lt.s32.totalorder %v2824_v8, 93  ;;  %v1898_v20 = vrot.slane %v1887_v27, %v2776_v51 }
 0x153   :  { %v1967_v49 = vmul.f32 %v3791_v40, %v4181_v44  ;;  %v1905_v17 = vrot.slane %v1889_v43, %v2773_v48  ;;  %v1909_v46 = vrot.slane %v1889_v43, %v2776_v51  ;;  %v1929_v54 = vmul.f32 %v1928_v45, %v1925_v61 }
 0x154   :  { %v1970_v32 = vstv %s4170_s15  ;;  %v4225_v7 = vadd.f32 %v1788_v25, %v4122_v57  ;;  %v4228_v6 = vadd.f32 %v1789_v58, %v4125_v4  ;;  %v1931_v28 = vmul.f32 %v1930_v52, %v1925_v61  ;;  %v1837_v29 = vpop.permute.xlu1 %1836 }
 0x155   :  { %v1972_v40 = vstv %s4183_s16  ;;  %v1797_v60 = vsel %vm1796_vm10, %v1793_v59, %v1795_v38  ;;  %v1798_v39 = vsel %vm1796_vm10, %v1795_v38, %v1793_v59  ;;  %v1870_v35 = vsel %vm131_vm1, %v1852_v55, %v1863_v30 }
 0x156   :  { %v1871_v57 = vsel %vm131_vm1, %v1856_v22, %v1867_v56  ;;  %v1830_v4 = vmul.f32 %v1828_v41, %v1797_v60  ;;  %v1831_v37 = vmul.f32 %v1829_v24, %v1798_v39  ;;  %vm1922_vm13 = vcmp.lt.s32.totalorder %v2824_v8, 83  ;;  %v1835_v41 = vpop.permute.xlu0 %1834 }
 0x157   :  { %v1971_v36 = vmul.f32 %v1970_v32, %v1967_v49  ;;  %v1912_v5 = vsel %vm131_vm1, %v1894_v26, %v1905_v17  ;;  %v1913_v2 = vsel %vm131_vm1, %v1898_v20, %v1909_v46  ;;  %v1936_v47 = vrot.slane %v1929_v54, %v2773_v48 }
 0x158   :  { %v1973_v18 = vmul.f32 %v1972_v40, %v1967_v49  ;;  %v4250_v53 = vadd.f32 %v1830_v4, %v4146_v50  ;;  %v4253_v15 = vadd.f32 %v1831_v37, %v4149_v10  ;;  %v1940_v27 = vrot.slane %v1929_v54, %v2776_v51  ;;  %v1879_v43 = vpop.permute.xlu1 %1878 }
 0x159   :  { %v1947_v12 = vrot.slane %v1931_v28, %v2773_v48  ;;  %v1839_v34 = vsel %vm1838_vm11, %v1835_v41, %v1837_v29  ;;  %v1840_v24 = vsel %vm1838_vm11, %v1837_v29, %v1835_v41  ;;  %v1951_v55 = vrot.slane %v1931_v28, %v2776_v51 }
 0x15a   :  { %v2009_v50 = vmul.f32 %v3581_v13, %v4181_v44  ;;  %v1872_v10 = vmul.f32 %v1870_v35, %v1839_v34  ;;  %v1873_v63 = vmul.f32 %v1871_v57, %v1840_v24  ;;  %vm1964_vm14 = vcmp.lt.s32.totalorder %v2824_v8, 82  ;;  %v1877_v42 = vpop.permute.xlu0 %1876 }
 0x15b   :  { %v1978_v22 = vrot.slane %v1971_v36, %v2773_v48  ;;  %v2012_v30 = vstv %s4217_s17  ;;  %v1982_v61 = vrot.slane %v1971_v36, %v2776_v51  ;;  %v1989_v16 = vrot.slane %v1973_v18, %v2773_v48 }
 0x15c   :  { %v2014_v56 = vstv %s4222_s1  ;;  %v2051_v45 = vmul.f32 %v3856_v9, %v4181_v44  ;;  %v4275_v13 = vadd.f32 %v1872_v10, %v4173_v19  ;;  %v4278_v14 = vadd.f32 %v1873_v63, %v4176_v62  ;;  %v1921_v17 = vpop.permute.xlu1 %1920 }
 0x15d   :  { %v1993_v26 = vrot.slane %v1973_v18, %v2776_v51  ;;  %v2054_v52 = vstv %s4231_s18  ;;  %v1881_v25 = vsel %vm1880_vm12, %v1877_v42, %v1879_v43  ;;  %v1882_v9 = vsel %vm1880_vm12, %v1879_v43, %v1877_v42 }
 0x15e   :  { %v2013_v58 = vmul.f32 %v2012_v30, %v2009_v50  ;;  %v2056_v20 = vstv %s4241_s19  ;;  %v1914_v49 = vmul.f32 %v1912_v5, %v1881_v25  ;;  %v1915_v19 = vmul.f32 %v1913_v2, %v1882_v9  ;;  %v1919_v40 = vpop.permute.xlu0 %1918 }
 0x15f   :  { %v1954_v62 = vsel %vm131_vm1, %v1936_v47, %v1947_v12  ;;  %v2015_v38 = vmul.f32 %v2014_v56, %v2009_v50  ;;  %v1955_v46 = vsel %vm131_vm1, %v1940_v27, %v1951_v55  ;;  %v1996_v54 = vsel %vm131_vm1, %v1978_v22, %v1989_v16 }
 0x160   :  { %vm2006_vm15 = vcmp.lt.s32.totalorder %v2824_v8, 81  ;;  %v2055_v32 = vmul.f32 %v2054_v52, %v2051_v45  ;;  %v4301_v59 = vadd.f32 %v1914_v49, %v4200_v23  ;;  %v4304_v28 = vadd.f32 %v1915_v19, %v4203_v33  ;;  %v1963_v5 = vpop.permute.xlu1 %1962 }
 0x161   :  { %v1997_v60 = vsel %vm131_vm1, %v1982_v61, %v1993_v26  ;;  %v2057_v39 = vmul.f32 %v2056_v20, %v2051_v45  ;;  %v1923_v35 = vsel %vm1922_vm13, %v1919_v40, %v1921_v17  ;;  %v1924_v57 = vsel %vm1922_vm13, %v1921_v17, %v1919_v40 }
 0x162   :  { %v2020_v4 = vrot.slane %v2013_v58, %v2773_v48  ;;  %v2024_v23 = vrot.slane %v2013_v58, %v2776_v51  ;;  %v1956_v37 = vmul.f32 %v1954_v62, %v1923_v35  ;;  %v1957_v33 = vmul.f32 %v1955_v46, %v1924_v57  ;;  %v1961_v34 = vpop.permute.xlu0 %1960 }
 0x163   :  { %v2031_v36 = vrot.slane %v2015_v38, %v2773_v48  ;;  %vm2048_vm0 = vcmp.lt.s32.totalorder %v2824_v8, 80  ;;  %v2093_v29 = vmul.f32 %v3622_v31, %v4181_v44  ;;  %v2035_v2 = vrot.slane %v2015_v38, %v2776_v51 }
 0x164   :  { %v2062_v47 = vrot.slane %v2055_v32, %v2773_v48  ;;  %v2066_v18 = vrot.slane %v2055_v32, %v2776_v51  ;;  %v2096_v41 = vstv %s4272_s20  ;;  %v4323_v27 = vadd.f32 %v1956_v37, %v4225_v7  ;;  %v2005_v43 = vpop.permute.xlu1 %2004 }
 0x165   :  { %v4326_v12 = vadd.f32 %v1957_v33, %v4228_v6  ;;  %v2073_v24 = vrot.slane %v2057_v39, %v2773_v48  ;;  %v2098_v31 = vstv %s4282_s2  ;;  %v1965_v55 = vsel %vm1964_vm14, %v1961_v34, %v1963_v5 }
 0x166   :  { %v1966_v50 = vsel %vm1964_vm14, %v1963_v5, %v1961_v34  ;;  %v2077_v7 = vrot.slane %v2057_v39, %v2776_v51  ;;  %v2135_v6 = vmul.f32 %v3668_v11, %v4181_v44  ;;  %v1998_v10 = vmul.f32 %v1996_v54, %v1965_v55  ;;  %v2003_v52 = vpop.permute.xlu0 %2002 }
 0x167   :  { %v1999_v63 = vmul.f32 %v1997_v60, %v1966_v50  ;;  %v2097_v22 = vmul.f32 %v2096_v41, %v2093_v29  ;;  %v2138_v30 = vstv %s4291_s21  ;;  %v2038_v61 = vsel %vm131_vm1, %v2020_v4, %v2031_v36 }
 0x168   :  { %v2039_v16 = vsel %vm131_vm1, %v2024_v23, %v2035_v2  ;;  %v2099_v56 = vmul.f32 %v2098_v31, %v2093_v29  ;;  %v2140_v45 = vstv %s4298_s22  ;;  %v4348_v42 = vadd.f32 %v1998_v10, %v4250_v53  ;;  %v2047_v62 = vpop.permute.xlu1 %2046 }
 0x169   :  { %v2001_v26 = vadd.f32 %v1999_v63, %v4253_v15  ;;  %v2080_v11 = vsel %vm131_vm1, %v2062_v47, %v2073_v24  ;;  %vm2090_vm2 = vcmp.lt.s32.totalorder %v2824_v8, 79  ;;  %v2007_v25 = vsel %vm2006_vm15, %v2003_v52, %v2005_v43 }
 0x16a   :  { %v2008_v9 = vsel %vm2006_vm15, %v2005_v43, %v2003_v52  ;;  %v2081_v53 = vsel %vm131_vm1, %v2066_v18, %v2077_v7  ;;  %v2139_v58 = vmul.f32 %v2138_v30, %v2135_v6  ;;  %v2040_v20 = vmul.f32 %v2038_v61, %v2007_v25  ;;  %v2045_v60 = vpop.permute.xlu0 %2044 }
 0x16b   :  { %v2041_v15 = vmul.f32 %v2039_v16, %v2008_v9  ;;  %v2104_v49 = vrot.slane %v2097_v22, %v2773_v48  ;;  %v2141_v19 = vmul.f32 %v2140_v45, %v2135_v6  ;;  %v2108_v38 = vrot.slane %v2097_v22, %v2776_v51 }
 0x16c   :  { %v2115_v17 = vrot.slane %v2099_v56, %v2773_v48  ;;  %v2119_v46 = vrot.slane %v2099_v56, %v2776_v51  ;;  %v2177_v54 = vmul.f32 %v3719_v1, %v4181_v44  ;;  %v2042_v32 = vadd.f32 %v2040_v20, %v4275_v13  ;;  %v2089_v13 = vpop.permute.xlu1 %2088 }
 0x16d   :  { %v2043_v40 = vadd.f32 %v2041_v15, %v4278_v14  ;;  %v2180_v39 = vstv %s4330_s23  ;;  %v2182_v35 = vstv %s4332_s24  ;;  %v2049_v57 = vsel %vm2048_vm0, %v2045_v60, %v2047_v62 }
 0x16e   :  { %v2050_v4 = vsel %vm2048_vm0, %v2047_v62, %v2045_v60  ;;  %v2146_v23 = vrot.slane %v2139_v58, %v2773_v48  ;;  %v2150_v37 = vrot.slane %v2139_v58, %v2776_v51  ;;  %v2082_v33 = vmul.f32 %v2080_v11, %v2049_v57  ;;  %v2087_v41 = vpop.permute.xlu0 %2086 }
 0x16f   :  { %v2083_v36 = vmul.f32 %v2081_v53, %v2050_v4  ;;  %v2157_v1 = vrot.slane %v2141_v19, %v2773_v48  ;;  %v2161_v44 = vrot.slane %v2141_v19, %v2776_v51  ;;  %v2122_v14 = vsel %vm131_vm1, %v2104_v49, %v2115_v17 }
 0x170   :  { %v2123_v29 = vsel %vm131_vm1, %v2108_v38, %v2119_v46  ;;  %v2181_v5 = vmul.f32 %v2180_v39, %v2177_v54  ;;  %v2183_v2 = vmul.f32 %v2182_v35, %v2177_v54  ;;  %v2084_v47 = vadd.f32 %v2082_v33, %v4301_v59  ;;  %v2131_v59 = vpop.permute.xlu1 %2130  ;;  %v2274_v33 = vld [vmem:[#allocation4 + $0x1] ss:$4 sm:$0x3] }
 0x171   :  { %v2085_v18 = vadd.f32 %v2083_v36, %v4304_v28  ;;  %v2091_v34 = vsel %vm2090_vm2, %v2087_v41, %v2089_v13  ;;  %v2092_v24 = vsel %vm2090_vm2, %v2089_v13, %v2087_v41  ;;  %vm2132_vm3 = vcmp.lt.s32.totalorder %v2824_v8, 78  ;;  %v2282_v36 = vld [vmem:[#allocation4 + $0x2] ss:$4 sm:$0x3] }
 0x172   :  { %v2124_v31 = vmul.f32 %v2122_v14, %v2091_v34  ;;  %v2125_v55 = vmul.f32 %v2123_v29, %v2092_v24  ;;  %v2164_v50 = vsel %vm131_vm1, %v2146_v23, %v2157_v1  ;;  %v2165_v7 = vsel %vm131_vm1, %v2150_v37, %v2161_v44  ;;  %v2129_v43 = vpop.permute.xlu0 %2128  ;;  %v2290_v1 = vld [vmem:[#allocation4 + $0x3] ss:$4 sm:$0x3]  ;;  %v2275_v14 = vld [vmem:[#allocation4 + $0x9] ss:$4 sm:$0x3] }
 0x173   :  { %v2188_v28 = vrot.slane %v2181_v5, %v2773_v48  ;;  %v2192_v6 = vrot.slane %v2181_v5, %v2776_v51  ;;  %v2199_v10 = vrot.slane %v2183_v2, %v2773_v48  ;;  %v2203_v63 = vrot.slane %v2183_v2, %v2776_v51  ;;  %v2283_v29 = vld [vmem:[#allocation4 + $0xa] ss:$4 sm:$0x3]  ;;  %v2291_v2 = vld [vmem:[#allocation4 + $0xb] ss:$4 sm:$0x3] }
 0x174   :  { %v2126_v22 = vadd.f32 %v2124_v31, %v4323_v27  ;;  %v2127_v30 = vadd.f32 %v2125_v55, %v4326_v12  ;;  %v2133_v61 = vsel %vm2132_vm3, %v2129_v43, %v2131_v59  ;;  %v2134_v16 = vsel %vm2132_vm3, %v2131_v59, %v2129_v43  ;;  %v2173_v52 = vpop.permute.xlu1 %2172  ;;  %v2487_v55 = vld [vmem:[#allocation4 + $0x8] ss:$4 sm:$0x3] }
 0x175   :  { %v2166_v56 = vmul.f32 %v2164_v50, %v2133_v61  ;;  %v2167_v45 = vmul.f32 %v2165_v7, %v2134_v16  ;;  %vm2174_vm4 = vcmp.lt.s32.totalorder %v2824_v8, 77  ;;  %v2206_v11 = vsel %vm131_vm1, %v2188_v28, %v2199_v10 }
 0x176   :  { %v2207_v48 = vsel %vm131_vm1, %v2192_v6, %v2203_v63  ;;  %v2171_v27 = vpop.permute.xlu0 %2170  ;;  %vm4408_vm1 = vcmp.lt.s32.totalorder %v78_v0, 256 }
 0x177   :  { %v2168_v51 = vadd.f32 %v2166_v56, %v4348_v42  ;;  %v2169_v25 = vadd.f32 %v2167_v45, %v2001_v26  ;;  %v2175_v9 = vsel %vm2174_vm4, %v2171_v27, %v2173_v52  ;;  %v2176_v12 = vsel %vm2174_vm4, %v2173_v52, %v2171_v27 }
 0x178   :  { %v2208_v20 = vmul.f32 %v2206_v11, %v2175_v9  ;;  %v2209_v15 = vmul.f32 %v2207_v48, %v2176_v12 }
 0x179   :  { %v2214_v53 = vadd.f32 %v2168_v51, %v2126_v22  ;;  %v2215_v58 = vadd.f32 %v2169_v25, %v2127_v30 }
 0x17a   :  { %v2210_v49 = vadd.f32 %v2208_v20, %v2042_v32  ;;  %v2211_v19 = vadd.f32 %v2209_v15, %v2043_v40 }
 0x17c   :  { %v2212_v8 = vadd.f32 %v2210_v49, %v2084_v47  ;;  %v2213_v62 = vadd.f32 %v2211_v19, %v2085_v18  ;;  %v2486_v18 = vld [vmem:[#allocation4] ss:$4 sm:$0x3] }
 0x17e   :  { %v2216_v38 = vadd.f32 %v2214_v53, %v2212_v8  ;;  %v2217_v17 = vadd.f32 %v2215_v58, %v2213_v62 }
 0x180   :  { %v2220_v46 = vrot.slane %v2216_v38, 2  ;;  %v2221_v54 = vrot.slane %v2217_v17, 2 }
 0x182   :  { %v2224_v3 = vadd.f32 %v2220_v46, %v2216_v38  ;;  %v2225_v60 = vadd.f32 %v2221_v54, %v2217_v17 }
 0x184   :  { %v2413_v39 = vmul.f32 -1.442695, %v2224_v3  ;;  %v2414_v42 = vmul.f32 -1.442695, %v2225_v60 }
 0x186   :  { %2471 = vpow2.f32 %v2413_v39 }
 0x187   :  { %2473 = vpow2.f32 %v2414_v42 }
 0x190   :  { %v2472_v26 = vpop.eup %2471 }
 0x191   :  { %v2474_v35 = vpop.eup %2473  ;;  %v2232_v57 = vadd.f32 1.0, %v2472_v26 }
 0x192   :  { %v2233_v4 = vadd.f32 1.0, %v2474_v35 }
 0x193   :  { %2475 = vrcp.f32 %v2232_v57 }
 0x194   :  { %2477 = vrcp.f32 %v2233_v4 }
 0x19d   :  { %v2476_v32 = vpop.eup %2475 }
 0x19e   :  { %v2478_v40 = vpop.eup %2477 }
 0x19f   :  { %v2240_v23 = vcombine.low %v2476_v32, %v2478_v40 }
 0x1a1   :  { %v2247_v37 = vrot.slane %v2240_v23, %v2692_v21 }
 0x1a3   :  { %v2248_v44 = vcombine.high %v2247_v37, %v2247_v37  ;;  %v2255_v13 = vrot.slane %v2247_v37, %v2692_v21 }
 0x1a5   :  { %v2262_v47 = vrot.slane %v2248_v44, %v2692_v21  ;;  %v2265_v41 = vmul.f32 %v2486_v18, %v2255_v13  ;;  %v2276_v34 = vmul.f32 %v2274_v33, %v2255_v13  ;;  %v2284_v24 = vmul.f32 %v2282_v36, %v2255_v13 }
 0x1a6   :  { %v2292_v31 = vmul.f32 %v2290_v1, %v2255_v13 }
 0x1a7   :  { %v2266_v50 = vmul.f32 %v2487_v55, %v2262_v47  ;;  %2271 = vst.msk [vmem:[#allocation9] ss:$4 sm:$0x3] %vm4408_vm1, %v2265_v41  ;;  %v2277_v7 = vmul.f32 %v2275_v14, %v2262_v47  ;;  %2279 = vst.msk [vmem:[#allocation9 + $0x1] ss:$4 sm:$0x3] %vm4408_vm1, %v2276_v34  ;;  %v2285_v0 = vmul.f32 %v2283_v29, %v2262_v47 }
 0x1a8   :  { %2287 = vst.msk [vmem:[#allocation9 + $0x2] ss:$4 sm:$0x3] %vm4408_vm1, %v2284_v24  ;;  %v2293_v59 = vmul.f32 %v2291_v2, %v2262_v47  ;;  %2295 = vst.msk [vmem:[#allocation9 + $0x3] ss:$4 sm:$0x3] %vm4408_vm1, %v2292_v31 }
 0x1a9   :  { %2273 = vst.msk [vmem:[#allocation9 + $0x8] ss:$4 sm:$0x3] %vm4408_vm1, %v2266_v50  ;;  %2281 = vst.msk [vmem:[#allocation9 + $0x9] ss:$4 sm:$0x3] %vm4408_vm1, %v2277_v7 }
 0x1aa   :  { %2289 = vst.msk [vmem:[#allocation9 + $0xa] ss:$4 sm:$0x3] %vm4408_vm1, %v2285_v0  ;;  %2297 = vst.msk [vmem:[#allocation9 + $0xb] ss:$4 sm:$0x3] %vm4408_vm1, %v2293_v59 }
 0x1ab   :  { %2553 = shalt.err (!%p2550_p9)
}
 0x1ac   :  { %s2554_s30 = scalar_lea.hbm %s4447_s3, 256 }
 0x1ad   :  { %p2555_p10 = scmp.ne.s32.totalorder %s4447_s3, %s2554_s30  ;;  %p2558_p11 = scmp.lt.u32.totalorder %s2554_s30, %s4447_s3 }
 0x1af   :  { %p2560_p12 = pnand %p2558_p11, %p2555_p10 }
 0x1b1   :  { %2563 = shalt.err (!%p2560_p12)
}
 0x1b2   :  { %2309 = dma.vmem_to_hbm [thread:$0]  %s2304_s26, 256, %s4447_s3, [#allocation6], %s2574_s4, %s2574_s4, %s2575_s5  }
 0x1b3   :  { %2570 = dma.done.wait [#allocation6], 256  }
 0x1b4   :  { %2571 = vsyncadd [#allocation6], 4294967040 }
 0x1b5   :  { %2313 = vsyncpa [#allocation5], 1 }
 0x1b6   :  { %2314 = vsyncpa [#allocation8], 1 }
 0x1b7   :  { %2315 = vsyncpa [#allocation6], 1 }

</bundles_post_ra>
